<compile_context>
chip_gen: v6e
topology: v6e:2x2x1
jax: 0.10.0
libtpu: 0.0.40
codegen_flags: <defaults>
</compile_context>

<pallas_src>
import math
import functools

import jax
import jax.numpy as jnp
from jax.experimental import pallas as pl
from jax.experimental.pallas import tpu as pltpu

LN_EPS = 1e-5   # nn.LayerNorm default
OPAD = 128      # lane-dense padded head output width (sliced back to 2)


# ----------------------------- in-kernel helpers -----------------------------

def _layernorm(x, g, b):
    mu = jnp.mean(x, axis=-1, keepdims=True)
    var = jnp.mean((x - mu) ** 2, axis=-1, keepdims=True)
    return (x - mu) * jax.lax.rsqrt(var + LN_EPS) * g + b


def _erf(x):
    # Abramowitz & Stegun 7.1.26 polynomial approximation of erf (|err|<1.5e-7).
    a1, a2, a3, a4, a5 = 0.254829592, -0.284496736, 1.421413741, -1.453152027, 1.061405429
    p = 0.3275911
    sgn = jnp.where(x >= 0.0, 1.0, -1.0)
    ax = jnp.abs(x)
    t = 1.0 / (1.0 + p * ax)
    poly = ((((a5 * t + a4) * t + a3) * t + a2) * t + a1) * t
    return sgn * (1.0 - poly * jnp.exp(-ax * ax))


def _gelu_exact(x):
    # TODO(synk): optional tanh-GELU variant would move work to the EUP at
    # ~1e-3 deviation; kept exact-erf to match nn.GELU() numerics.
    return 0.5 * x * (1.0 + _erf(x * (1.0 / math.sqrt(2.0))))


# --------------------------------- fused kernel -------------------------------

def _fused_rna_kernel(tok_ref, mask_ref, pos_ref, tab_ref,
                      ln_in_g, ln_in_b,
                      wqkv_ref, bqkv_ref, wo_ref, bo_ref,
                      ln1_g, ln1_b, w1_ref, b1_ref, w2_ref, b2_ref,
                      ln2_g, ln2_b, ln_out_g, ln_out_b,
                      wh_ref, bh_ref, o_ref, *, nhead, depth, L):
    """Whole RNAModel forward for ONE batch element (grid axis = batch)."""
    D = tab_ref.shape[1]
    dh = D // nhead
    bf16 = jnp.bfloat16

    # ---- embedding lookup: V=4 VPU multiply-selects (row 0 is padding row) ---
    tok = tok_ref[...].reshape(L, 1)                       # (L, 1) int32
    tab = tab_ref[...]                                     # (V, D) f32
    x = jnp.zeros((L, D), jnp.float32)
    for vtok in range(tab_ref.shape[0]):                   # static V loop
        sel = (tok == vtok).astype(jnp.float32)            # (L, 1)
        x = x + sel * tab[vtok:vtok + 1, :]                # broadcast (L, D)

    # positional embedding (shared across batch, constant index_map) + input LN
    x = _layernorm(x + pos_ref[...], ln_in_g[...], ln_in_b[...])

    # key-padding bias, hoisted across layers: masked key column -> -1e9
    key_bias = (mask_ref[...].reshape(1, L) - 1.0) * 1e9   # (1, L)

    for l in range(depth):                                 # static layer loop
        # fused QKV projection (1/sqrt(dh) is pre-folded into the Q columns)
        qkv = jnp.dot(x.astype(bf16), wqkv_ref[l],
                      preferred_element_type=jnp.float32) + bqkv_ref[l]
        q = qkv[:, 0:D]
        k = qkv[:, D:2 * D]
        v = qkv[:, 2 * D:3 * D]

        # TODO(synk): per-head (L, L) scores are fully materialized; switch to
        # a KV-tiled online-softmax (flash-style) path once L reaches ~1k.
        ctx_parts = []
        for h in range(nhead):                             # static head loop
            sl = slice(h * dh, (h + 1) * dh)
            s = jnp.einsum("qd,kd->qk", q[:, sl].astype(bf16), k[:, sl].astype(bf16),
                           preferred_element_type=jnp.float32) + key_bias
            s = s - jnp.max(s, axis=-1, keepdims=True)
            p = jnp.exp(s)
            p = p * pl.reciprocal(jnp.sum(p, axis=-1, keepdims=True), approx=True)
            ctx_parts.append(jnp.dot(p.astype(bf16), v[:, sl].astype(bf16),
                                     preferred_element_type=jnp.float32))
        ctx = jnp.concatenate(ctx_parts, axis=-1)          # (L, D) head-packed
        # single K=D output projection instead of nhead K=dh matmuls
        attn = jnp.dot(ctx.astype(bf16), wo_ref[l],
                       preferred_element_type=jnp.float32) + bo_ref[l]
        x = _layernorm(x + attn, ln1_g[l], ln1_b[l])

        h1 = jnp.dot(x.astype(bf16), w1_ref[l],
                     preferred_element_type=jnp.float32) + b1_ref[l]
        h1 = _gelu_exact(h1)
        ff = jnp.dot(h1.astype(bf16), w2_ref[l],
                     preferred_element_type=jnp.float32) + b2_ref[l]
        x = _layernorm(x + ff, ln2_g[l], ln2_b[l])

    # ---- output LayerNorm + head (lane-dense 128-wide padded output) --------
    # TODO(synk): at very large B*L the 128-wide padded head write is 64x
    # oversized HBM traffic; pack multiple tokens' logits per row if it shows.
    x = _layernorm(x, ln_out_g[...], ln_out_b[...])
    logits = jnp.dot(x.astype(bf16), wh_ref[...],
                     preferred_element_type=jnp.float32) + bh_ref[...]
    o_ref[...] = logits.reshape(1, L, OPAD)


# ------------------------------ pallas_call glue ------------------------------

def fused_forward_call(tok3, mask3, posemb, wk, *, nhead, B, L):
    V, D = wk["emb"].shape
    depth = wk["wqkv"].shape[0]
    F = wk["w1"].shape[2]

    def batch_spec(full_shape):            # leading dim indexed by the grid
        nd = len(full_shape)
        return pl.BlockSpec((1,) + tuple(full_shape[1:]),
                            lambda b, _nd=nd: (b,) + (0,) * (_nd - 1))

    def const_spec(shape):                 # constant index_map: VMEM-resident
        nd = len(shape)
        return pl.BlockSpec(tuple(shape), lambda b, _nd=nd: (0,) * _nd)

    kern = functools.partial(_fused_rna_kernel, nhead=nhead, depth=depth, L=L)

    # TODO(synk): for large depth (weights no longer VMEM-resident, esp. v7x's
    # 64 MiB VMEM) move the layer loop to a grid axis with double-buffered
    # weight DMA instead of the constant-index full-stack residency used here.
    return pl.pallas_call(
        kern,
        out_shape=jax.ShapeDtypeStruct((B, L, OPAD), jnp.float32),
        grid=(B,),
        in_specs=[
            batch_spec((B, L, 1)),                             # tokens
            batch_spec((B, 1, L)),                             # key-padding mask
            const_spec((L, D)),                                # positional emb
            const_spec((V, D)),                                # embedding table
            const_spec((1, D)), const_spec((1, D)),            # input LN g, b
            const_spec((depth, D, 3 * D)), const_spec((depth, 1, 3 * D)),  # wqkv, bqkv
            const_spec((depth, D, D)), const_spec((depth, 1, D)),          # wo, bo
            const_spec((depth, 1, D)), const_spec((depth, 1, D)),          # ln1 g, b
            const_spec((depth, D, F)), const_spec((depth, 1, F)),          # w1, b1
            const_spec((depth, F, D)), const_spec((depth, 1, D)),          # w2, b2
            const_spec((depth, 1, D)), const_spec((depth, 1, D)),          # ln2 g, b
            const_spec((1, D)), const_spec((1, D)),            # output LN g, b
            const_spec((D, OPAD)), const_spec((1, OPAD)),      # head W, b (padded)
        ],
        out_specs=batch_spec((B, L, OPAD)),
        compiler_params=pltpu.CompilerParams(
            dimension_semantics=("parallel",),       # shard batch across TCs
            vmem_limit_bytes=32 * 1024 * 1024),
    )(tok3, mask3, posemb, wk["emb"], wk["ln_in_g"], wk["ln_in_b"],
      wk["wqkv"], wk["bqkv"], wk["wo"], wk["bo"], wk["ln1_g"], wk["ln1_b"],
      wk["w1"], wk["b1"], wk["w2"], wk["b2"], wk["ln2_g"], wk["ln2_b"],
      wk["ln_out_g"], wk["ln_out_b"], wk["wh"], wk["bh"])


# ------------------------------- model wrapper --------------------------------

def init_params(key, dim, depth, vocab=4, ffn_mult=4):
    """Deterministic synthetic parameters (f32, PyTorch-equivalent layout).
    Weight matrices are stored (in_features, out_features) — the transpose of
    PyTorch nn.Linear — so kernels compute y = x @ W + b. Per-layer weights are
    stacked along a leading `depth` axis; Q/K/V are fused into one (D, 3D)."""
    std = 0.02
    f = ffn_mult * dim
    keys = jax.random.split(key, 2 + depth)
    emb = std * jax.random.normal(keys[0], (vocab, dim), jnp.float32)
    emb = emb.at[0].set(0.0)                    # padding_idx=0
    kh = jax.random.split(keys[1], 2)

    wqkv, wo, w1, w2 = [], [], [], []
    for l in range(depth):
        lk = jax.random.split(keys[2 + l], 6)
        wq = std * jax.random.normal(lk[0], (dim, dim), jnp.float32)
        wk = std * jax.random.normal(lk[1], (dim, dim), jnp.float32)
        wv = std * jax.random.normal(lk[2], (dim, dim), jnp.float32)
        wqkv.append(jnp.concatenate([wq, wk, wv], axis=1))
        wo.append(std * jax.random.normal(lk[3], (dim, dim), jnp.float32))
        w1.append(std * jax.random.normal(lk[4], (dim, f), jnp.float32))
        w2.append(std * jax.random.normal(lk[5], (f, dim), jnp.float32))

    zeros = lambda n: jnp.zeros((depth, 1, n), jnp.float32)
    ones = lambda n: jnp.ones((depth, 1, n), jnp.float32)
    return {
        "emb": emb,
        "ln_in_g": jnp.ones((1, dim), jnp.float32),
        "ln_in_b": jnp.zeros((1, dim), jnp.float32),
        "ln_out_g": jnp.ones((1, dim), jnp.float32),
        "ln_out_b": jnp.zeros((1, dim), jnp.float32),
        "w_head": std * jax.random.normal(kh[0], (dim, 2), jnp.float32),
        "b_head": jnp.zeros((1, 2), jnp.float32),
        "wqkv": jnp.stack(wqkv), "bqkv": zeros(3 * dim),
        "wo": jnp.stack(wo), "bo": zeros(dim),
        "ln1_g": ones(dim), "ln1_b": zeros(dim),
        "w1": jnp.stack(w1), "b1": zeros(f),
        "w2": jnp.stack(w2), "b2": zeros(dim),
        "ln2_g": ones(dim), "ln2_b": zeros(dim),
    }


def prepare_weights(params, *, nhead):
    """Fold the attention scale into Wq, pad the 2-wide head to 128 lanes, and
    cast the big matrices to bf16 (halves HBM weight DMA; f32 accumulation in
    the kernel). LayerNorm params, biases and the tiny embedding stay f32."""
    D = params["emb"].shape[1]
    dh = D // nhead
    scale = 1.0 / math.sqrt(dh)
    wqkv = params["wqkv"].at[:, :, :D].multiply(scale)
    bqkv = params["bqkv"].at[:, :, :D].multiply(scale)
    w_head_pad = jnp.zeros((D, OPAD), jnp.float32).at[:, :2].set(params["w_head"])
    b_head_pad = jnp.zeros((1, OPAD), jnp.float32).at[:, :2].set(params["b_head"])
    bf = jnp.bfloat16
    return {
        "emb": params["emb"],
        "ln_in_g": params["ln_in_g"], "ln_in_b": params["ln_in_b"],
        "ln_out_g": params["ln_out_g"], "ln_out_b": params["ln_out_b"],
        "wqkv": wqkv.astype(bf), "bqkv": bqkv,
        "wo": params["wo"].astype(bf), "bo": params["bo"],
        "ln1_g": params["ln1_g"], "ln1_b": params["ln1_b"],
        "w1": params["w1"].astype(bf), "b1": params["b1"],
        "w2": params["w2"].astype(bf), "b2": params["b2"],
        "ln2_g": params["ln2_g"], "ln2_b": params["ln2_b"],
        "wh": w_head_pad.astype(bf), "bh": b_head_pad,
    }


def rna_model_forward(tokens, padding_mask, params, *, nhead):
    """tokens: (B, L_full) int32 in [0,4); padding_mask: (B, L_full) bool."""
    B, L_full = tokens.shape
    D = params["emb"].shape[1]

    # Data-dependent truncation (mirrors x[:, :Lmax] in PyTorch). Compute
    # length is bucketed: multiple of 8 for small L (sublane alignment),
    # multiple of 128 once L is large (lane-dense scores/softmax).
    # TODO(synk): the int() forces one device->host sync per forward, same as
    # the PyTorch dynamic slice; fully-jitted use would need a fixed bucket set.
    Lmax = int(jnp.max(jnp.sum(padding_mask.astype(jnp.int32), axis=-1)))
    if Lmax >= 128:
        Lpad = ((Lmax + 127) // 128) * 128
    else:
        Lpad = max(8, ((Lmax + 7) // 8) * 8)

    keep = min(Lpad, L_full)
    tok = tokens[:, :keep].astype(jnp.int32)
    msk = padding_mask[:, :keep].astype(jnp.float32)
    if Lpad > keep:
        tok = jnp.pad(tok, ((0, 0), (0, Lpad - keep)))
        msk = jnp.pad(msk, ((0, 0), (0, Lpad - keep)))

    # Sinusoidal positional embedding ([sin | cos]; parameter-free host glue,
    # passed ONCE as (Lpad, D) and broadcast over batch in-kernel).
    half = D // 2
    freqs = jnp.exp(jnp.arange(half, dtype=jnp.float32) * (-math.log(10000.0) / half))
    pe = jnp.arange(Lpad, dtype=jnp.float32)[:, None] * freqs[None, :]
    posemb = jnp.concatenate([jnp.sin(pe), jnp.cos(pe)], axis=-1)       # (Lpad, D)

    tok3 = tok[:, :, None]                  # (B, Lpad, 1)
    mask3 = msk[:, None, :]                 # (B, 1, Lpad), True(1.0)=valid

    wk = prepare_weights(params, nhead=nhead)
    out = fused_forward_call(tok3, mask3, posemb, wk, nhead=nhead, B=B, L=Lpad)
    return out[:, :Lmax, :2]


# ----------------------------------- main -------------------------------------

if __name__ == "__main__":
    # Small config consistent with RNAModel(dim, depth, head_size).
    dim, depth, head_size = 128, 2, 32
    nhead = dim // head_size
    B, L_full = 2, 24

    key = jax.random.PRNGKey(0)
    k_tok, k_par = jax.random.split(key)

    tokens = jax.random.randint(k_tok, (B, L_full), 0, 4, dtype=jnp.int32)
    lengths = jnp.array([16, 11], dtype=jnp.int32)
    padding_mask = jnp.arange(L_full)[None, :] < lengths[:, None]      # (B, L_full) bool

    params = init_params(k_par, dim, depth)

    out = rna_model_forward(tokens, padding_mask, params, nhead=nhead)
    out = jax.block_until_ready(out)

    assert out.shape == (B, 16, 2), out.shape          # Lmax = 16
    assert bool(jnp.all(jnp.isfinite(out)))
    print("KERNEL_OK")
</pallas_src>

<mosaic_0001>
module attributes {stable_mosaic.version = 11 : i64} {
  func.func @_fused_rna_kernel(%arg0: i32, %arg1: memref<1x16x1xi32, #tpu.memory_space<vmem>>, %arg2: memref<1x1x16xf32, #tpu.memory_space<vmem>>, %arg3: memref<16x128xf32, #tpu.memory_space<vmem>>, %arg4: memref<4x128xf32, #tpu.memory_space<vmem>>, %arg5: memref<1x128xf32, #tpu.memory_space<vmem>>, %arg6: memref<1x128xf32, #tpu.memory_space<vmem>>, %arg7: memref<2x128x384xbf16, #tpu.memory_space<vmem>>, %arg8: memref<2x1x384xf32, #tpu.memory_space<vmem>>, %arg9: memref<2x128x128xbf16, #tpu.memory_space<vmem>>, %arg10: memref<2x1x128xf32, #tpu.memory_space<vmem>>, %arg11: memref<2x1x128xf32, #tpu.memory_space<vmem>>, %arg12: memref<2x1x128xf32, #tpu.memory_space<vmem>>, %arg13: memref<2x128x512xbf16, #tpu.memory_space<vmem>>, %arg14: memref<2x1x512xf32, #tpu.memory_space<vmem>>, %arg15: memref<2x512x128xbf16, #tpu.memory_space<vmem>>, %arg16: memref<2x1x128xf32, #tpu.memory_space<vmem>>, %arg17: memref<2x1x128xf32, #tpu.memory_space<vmem>>, %arg18: memref<2x1x128xf32, #tpu.memory_space<vmem>>, %arg19: memref<1x128xf32, #tpu.memory_space<vmem>>, %arg20: memref<1x128xf32, #tpu.memory_space<vmem>>, %arg21: memref<128x128xbf16, #tpu.memory_space<vmem>>, %arg22: memref<1x128xf32, #tpu.memory_space<vmem>>, %arg23: memref<1x16x128xf32, #tpu.memory_space<vmem>>) attributes {dimension_semantics = [#tpu.dimension_semantics<parallel>], iteration_bounds = array<i64: 2>, scalar_prefetch = 0 : i64, scratch_operands = 0 : i64, tpu.core_type = #tpu.core_type<tc>, window_params = [{transform_indices = @transform_0, window_bounds = array<i64: 1, 16, 1>}, {transform_indices = @transform_1, window_bounds = array<i64: 1, 1, 16>}, {pipeline_mode = #tpu.pipeline_mode<synchronous>, transform_indices = @transform_2, window_bounds = array<i64: 16, 128>}, {pipeline_mode = #tpu.pipeline_mode<synchronous>, transform_indices = @transform_3, window_bounds = array<i64: 4, 128>}, {pipeline_mode = #tpu.pipeline_mode<synchronous>, transform_indices = @transform_4, window_bounds = array<i64: 1, 128>}, {pipeline_mode = #tpu.pipeline_mode<synchronous>, transform_indices = @transform_5, window_bounds = array<i64: 1, 128>}, {pipeline_mode = #tpu.pipeline_mode<synchronous>, transform_indices = @transform_6, window_bounds = array<i64: 2, 128, 384>}, {pipeline_mode = #tpu.pipeline_mode<synchronous>, transform_indices = @transform_7, window_bounds = array<i64: 2, 1, 384>}, {pipeline_mode = #tpu.pipeline_mode<synchronous>, transform_indices = @transform_8, window_bounds = array<i64: 2, 128, 128>}, {pipeline_mode = #tpu.pipeline_mode<synchronous>, transform_indices = @transform_9, window_bounds = array<i64: 2, 1, 128>}, {pipeline_mode = #tpu.pipeline_mode<synchronous>, transform_indices = @transform_10, window_bounds = array<i64: 2, 1, 128>}, {pipeline_mode = #tpu.pipeline_mode<synchronous>, transform_indices = @transform_11, window_bounds = array<i64: 2, 1, 128>}, {pipeline_mode = #tpu.pipeline_mode<synchronous>, transform_indices = @transform_12, window_bounds = array<i64: 2, 128, 512>}, {pipeline_mode = #tpu.pipeline_mode<synchronous>, transform_indices = @transform_13, window_bounds = array<i64: 2, 1, 512>}, {pipeline_mode = #tpu.pipeline_mode<synchronous>, transform_indices = @transform_14, window_bounds = array<i64: 2, 512, 128>}, {pipeline_mode = #tpu.pipeline_mode<synchronous>, transform_indices = @transform_15, window_bounds = array<i64: 2, 1, 128>}, {pipeline_mode = #tpu.pipeline_mode<synchronous>, transform_indices = @transform_16, window_bounds = array<i64: 2, 1, 128>}, {pipeline_mode = #tpu.pipeline_mode<synchronous>, transform_indices = @transform_17, window_bounds = array<i64: 2, 1, 128>}, {pipeline_mode = #tpu.pipeline_mode<synchronous>, transform_indices = @transform_18, window_bounds = array<i64: 1, 128>}, {pipeline_mode = #tpu.pipeline_mode<synchronous>, transform_indices = @transform_19, window_bounds = array<i64: 1, 128>}, {pipeline_mode = #tpu.pipeline_mode<synchronous>, transform_indices = @transform_20, window_bounds = array<i64: 128, 128>}, {pipeline_mode = #tpu.pipeline_mode<synchronous>, transform_indices = @transform_21, window_bounds = array<i64: 1, 128>}, {transform_indices = @transform_22, window_bounds = array<i64: 1, 16, 128>}]} {
    %c0 = arith.constant 0 : index
    %c0_0 = arith.constant 0 : index
    %c0_1 = arith.constant 0 : index
    %0 = vector.load %arg1[%c0, %c0_0, %c0_1] : memref<1x16x1xi32, #tpu.memory_space<vmem>>, vector<1x16x1xi32>
    %1 = vector.shape_cast %0 : vector<1x16x1xi32> to vector<16x1xi32>
    %c0_2 = arith.constant 0 : index
    %c0_3 = arith.constant 0 : index
    %2 = vector.load %arg4[%c0_2, %c0_3] : memref<4x128xf32, #tpu.memory_space<vmem>>, vector<4x128xf32>
    %cst = arith.constant 0.000000e+00 : f32
    %3 = vector.broadcast %cst : f32 to vector<16x128xf32>
    %c0_i32 = arith.constant 0 : i32
    %4 = vector.broadcast %c0_i32 : i32 to vector<16x1xi32>
    %5 = arith.cmpi eq, %1, %4 : vector<16x1xi32>
    %6 = arith.extui %5 : vector<16x1xi1> to vector<16x1xi32>
    %7 = arith.sitofp %6 : vector<16x1xi32> to vector<16x1xf32>
    %8 = vector.extract_strided_slice %2 {offsets = [0, 0], sizes = [1, 128], strides = [1, 1]} : vector<4x128xf32> to vector<1x128xf32>
    %9 = vector.broadcast %7 : vector<16x1xf32> to vector<16x128xf32>
    %10 = vector.broadcast %8 : vector<1x128xf32> to vector<16x128xf32>
    %11 = arith.mulf %9, %10 : vector<16x128xf32>
    %12 = arith.addf %3, %11 : vector<16x128xf32>
    %c1_i32 = arith.constant 1 : i32
    %13 = vector.broadcast %c1_i32 : i32 to vector<16x1xi32>
    %14 = arith.cmpi eq, %1, %13 : vector<16x1xi32>
    %15 = arith.extui %14 : vector<16x1xi1> to vector<16x1xi32>
    %16 = arith.sitofp %15 : vector<16x1xi32> to vector<16x1xf32>
    %17 = vector.extract_strided_slice %2 {offsets = [1, 0], sizes = [1, 128], strides = [1, 1]} : vector<4x128xf32> to vector<1x128xf32>
    %18 = vector.broadcast %16 : vector<16x1xf32> to vector<16x128xf32>
    %19 = vector.broadcast %17 : vector<1x128xf32> to vector<16x128xf32>
    %20 = arith.mulf %18, %19 : vector<16x128xf32>
    %21 = arith.addf %12, %20 : vector<16x128xf32>
    %c2_i32 = arith.constant 2 : i32
    %22 = vector.broadcast %c2_i32 : i32 to vector<16x1xi32>
    %23 = arith.cmpi eq, %1, %22 : vector<16x1xi32>
    %24 = arith.extui %23 : vector<16x1xi1> to vector<16x1xi32>
    %25 = arith.sitofp %24 : vector<16x1xi32> to vector<16x1xf32>
    %26 = vector.extract_strided_slice %2 {offsets = [2, 0], sizes = [1, 128], strides = [1, 1]} : vector<4x128xf32> to vector<1x128xf32>
    %27 = vector.broadcast %25 : vector<16x1xf32> to vector<16x128xf32>
    %28 = vector.broadcast %26 : vector<1x128xf32> to vector<16x128xf32>
    %29 = arith.mulf %27, %28 : vector<16x128xf32>
    %30 = arith.addf %21, %29 : vector<16x128xf32>
    %c3_i32 = arith.constant 3 : i32
    %31 = vector.broadcast %c3_i32 : i32 to vector<16x1xi32>
    %32 = arith.cmpi eq, %1, %31 : vector<16x1xi32>
    %33 = arith.extui %32 : vector<16x1xi1> to vector<16x1xi32>
    %34 = arith.sitofp %33 : vector<16x1xi32> to vector<16x1xf32>
    %35 = vector.extract_strided_slice %2 {offsets = [3, 0], sizes = [1, 128], strides = [1, 1]} : vector<4x128xf32> to vector<1x128xf32>
    %36 = vector.broadcast %34 : vector<16x1xf32> to vector<16x128xf32>
    %37 = vector.broadcast %35 : vector<1x128xf32> to vector<16x128xf32>
    %38 = arith.mulf %36, %37 : vector<16x128xf32>
    %39 = arith.addf %30, %38 : vector<16x128xf32>
    %c0_4 = arith.constant 0 : index
    %c0_5 = arith.constant 0 : index
    %40 = vector.load %arg3[%c0_4, %c0_5] : memref<16x128xf32, #tpu.memory_space<vmem>>, vector<16x128xf32>
    %41 = arith.addf %39, %40 : vector<16x128xf32>
    %c0_6 = arith.constant 0 : index
    %c0_7 = arith.constant 0 : index
    %42 = vector.load %arg5[%c0_6, %c0_7] : memref<1x128xf32, #tpu.memory_space<vmem>>, vector<1x128xf32>
    %c0_8 = arith.constant 0 : index
    %c0_9 = arith.constant 0 : index
    %43 = vector.load %arg6[%c0_8, %c0_9] : memref<1x128xf32, #tpu.memory_space<vmem>>, vector<1x128xf32>
    %cst_10 = arith.constant dense<0.000000e+00> : vector<16xf32>
    %44 = vector.multi_reduction <add>, %41, %cst_10 [1] : vector<16x128xf32> to vector<16xf32>
    %45 = vector.shape_cast %44 : vector<16xf32> to vector<16x1xf32>
    %cst_11 = arith.constant 1.280000e+02 : f32
    %46 = vector.broadcast %cst_11 : f32 to vector<16x1xf32>
    %47 = arith.divf %45, %46 : vector<16x1xf32>
    %48 = vector.broadcast %47 : vector<16x1xf32> to vector<16x128xf32>
    %49 = arith.subf %41, %48 : vector<16x128xf32>
    %50 = arith.mulf %49, %49 : vector<16x128xf32>
    %cst_12 = arith.constant dense<0.000000e+00> : vector<16xf32>
    %51 = vector.multi_reduction <add>, %50, %cst_12 [1] : vector<16x128xf32> to vector<16xf32>
    %52 = vector.shape_cast %51 : vector<16xf32> to vector<16x1xf32>
    %cst_13 = arith.constant 1.280000e+02 : f32
    %53 = vector.broadcast %cst_13 : f32 to vector<16x1xf32>
    %54 = arith.divf %52, %53 : vector<16x1xf32>
    %55 = vector.broadcast %47 : vector<16x1xf32> to vector<16x128xf32>
    %56 = arith.subf %41, %55 : vector<16x128xf32>
    %cst_14 = arith.constant 9.99999974E-6 : f32
    %57 = vector.broadcast %cst_14 : f32 to vector<16x1xf32>
    %58 = arith.addf %54, %57 : vector<16x1xf32>
    %59 = math.rsqrt %58 : vector<16x1xf32>
    %60 = vector.broadcast %59 : vector<16x1xf32> to vector<16x128xf32>
    %61 = arith.mulf %56, %60 : vector<16x128xf32>
    %62 = vector.broadcast %42 : vector<1x128xf32> to vector<16x128xf32>
    %63 = arith.mulf %61, %62 : vector<16x128xf32>
    %64 = vector.broadcast %43 : vector<1x128xf32> to vector<16x128xf32>
    %65 = arith.addf %63, %64 : vector<16x128xf32>
    %c0_15 = arith.constant 0 : index
    %c0_16 = arith.constant 0 : index
    %c0_17 = arith.constant 0 : index
    %66 = vector.load %arg2[%c0_15, %c0_16, %c0_17] : memref<1x1x16xf32, #tpu.memory_space<vmem>>, vector<1x1x16xf32>
    %67 = vector.shape_cast %66 : vector<1x1x16xf32> to vector<1x16xf32>
    %cst_18 = arith.constant 1.000000e+00 : f32
    %68 = vector.broadcast %cst_18 : f32 to vector<1x16xf32>
    %69 = arith.subf %67, %68 : vector<1x16xf32>
    %cst_19 = arith.constant 1.000000e+09 : f32
    %70 = vector.broadcast %cst_19 : f32 to vector<1x16xf32>
    %71 = arith.mulf %69, %70 : vector<1x16xf32>
    %72 = arith.truncf %65 : vector<16x128xf32> to vector<16x128xbf16>
    %c0_20 = arith.constant 0 : index
    %c0_21 = arith.constant 0 : index
    %c0_22 = arith.constant 0 : index
    %73 = vector.load %arg7[%c0_20, %c0_21, %c0_22] : memref<2x128x384xbf16, #tpu.memory_space<vmem>>, vector<1x128x384xbf16>
    %74 = vector.shape_cast %73 : vector<1x128x384xbf16> to vector<128x384xbf16>
    %cst_23 = arith.constant dense<0.000000e+00> : vector<16x384xf32>
    %75 = tpu.matmul %72, %74, %cst_23 {dimension_numbers = #tpu.dot_dimension_numbers<[1], [0], [0], [1], [0, 0, 1, 1], [], []>} : vector<16x128xbf16>, vector<128x384xbf16>, vector<16x384xf32> -> vector<16x384xf32>
    %c0_24 = arith.constant 0 : index
    %c0_25 = arith.constant 0 : index
    %c0_26 = arith.constant 0 : index
    %76 = vector.load %arg8[%c0_24, %c0_25, %c0_26] : memref<2x1x384xf32, #tpu.memory_space<vmem>>, vector<1x1x384xf32>
    %77 = vector.shape_cast %76 : vector<1x1x384xf32> to vector<1x384xf32>
    %78 = vector.broadcast %77 : vector<1x384xf32> to vector<16x384xf32>
    %79 = arith.addf %75, %78 : vector<16x384xf32>
    %80 = vector.extract_strided_slice %79 {offsets = [0, 0], sizes = [16, 128], strides = [1, 1]} : vector<16x384xf32> to vector<16x128xf32>
    %81 = vector.extract_strided_slice %79 {offsets = [0, 128], sizes = [16, 128], strides = [1, 1]} : vector<16x384xf32> to vector<16x128xf32>
    %82 = vector.extract_strided_slice %79 {offsets = [0, 256], sizes = [16, 128], strides = [1, 1]} : vector<16x384xf32> to vector<16x128xf32>
    %83 = vector.extract_strided_slice %80 {offsets = [0, 0], sizes = [16, 32], strides = [1, 1]} : vector<16x128xf32> to vector<16x32xf32>
    %84 = arith.truncf %83 : vector<16x32xf32> to vector<16x32xbf16>
    %85 = vector.extract_strided_slice %81 {offsets = [0, 0], sizes = [16, 32], strides = [1, 1]} : vector<16x128xf32> to vector<16x32xf32>
    %86 = arith.truncf %85 : vector<16x32xf32> to vector<16x32xbf16>
    "tpu.trace_start"() <{level = 10 : i32, message = "qd,kd->qk"}> : () -> ()
    %cst_27 = arith.constant dense<0.000000e+00> : vector<16x16xf32>
    %87 = tpu.matmul %84, %86, %cst_27 {dimension_numbers = #tpu.dot_dimension_numbers<[1], [1], [0], [0], [0, 0, 1, 0], [], []>} : vector<16x32xbf16>, vector<16x32xbf16>, vector<16x16xf32> -> vector<16x16xf32>
    "tpu.trace_stop"() : () -> ()
    %88 = vector.broadcast %71 : vector<1x16xf32> to vector<16x16xf32>
    %89 = arith.addf %87, %88 : vector<16x16xf32>
    %cst_28 = arith.constant dense<0xFF800000> : vector<16xf32>
    %90 = vector.multi_reduction <maximumf>, %89, %cst_28 [1] : vector<16x16xf32> to vector<16xf32>
    %91 = vector.shape_cast %90 : vector<16xf32> to vector<16x1xf32>
    %92 = vector.broadcast %91 : vector<16x1xf32> to vector<16x16xf32>
    %93 = arith.subf %89, %92 : vector<16x16xf32>
    %94 = math.exp %93 : vector<16x16xf32>
    %cst_29 = arith.constant dense<0.000000e+00> : vector<16xf32>
    %95 = vector.multi_reduction <add>, %94, %cst_29 [1] : vector<16x16xf32> to vector<16xf32>
    %96 = vector.shape_cast %95 : vector<16xf32> to vector<16x1xf32>
    %97 = tpu.reciprocal %96 {approx = true} : vector<16x1xf32> -> vector<16x1xf32>
    %98 = vector.broadcast %97 : vector<16x1xf32> to vector<16x16xf32>
    %99 = arith.mulf %94, %98 : vector<16x16xf32>
    %100 = arith.truncf %99 : vector<16x16xf32> to vector<16x16xbf16>
    %101 = vector.extract_strided_slice %82 {offsets = [0, 0], sizes = [16, 32], strides = [1, 1]} : vector<16x128xf32> to vector<16x32xf32>
    %102 = arith.truncf %101 : vector<16x32xf32> to vector<16x32xbf16>
    %cst_30 = arith.constant dense<0.000000e+00> : vector<16x32xf32>
    %103 = tpu.matmul %100, %102, %cst_30 {dimension_numbers = #tpu.dot_dimension_numbers<[1], [0], [0], [1], [0, 0, 1, 1], [], []>} : vector<16x16xbf16>, vector<16x32xbf16>, vector<16x32xf32> -> vector<16x32xf32>
    %104 = vector.extract_strided_slice %80 {offsets = [0, 32], sizes = [16, 32], strides = [1, 1]} : vector<16x128xf32> to vector<16x32xf32>
    %105 = arith.truncf %104 : vector<16x32xf32> to vector<16x32xbf16>
    %106 = vector.extract_strided_slice %81 {offsets = [0, 32], sizes = [16, 32], strides = [1, 1]} : vector<16x128xf32> to vector<16x32xf32>
    %107 = arith.truncf %106 : vector<16x32xf32> to vector<16x32xbf16>
    "tpu.trace_start"() <{level = 10 : i32, message = "qd,kd->qk"}> : () -> ()
    %cst_31 = arith.constant dense<0.000000e+00> : vector<16x16xf32>
    %108 = tpu.matmul %105, %107, %cst_31 {dimension_numbers = #tpu.dot_dimension_numbers<[1], [1], [0], [0], [0, 0, 1, 0], [], []>} : vector<16x32xbf16>, vector<16x32xbf16>, vector<16x16xf32> -> vector<16x16xf32>
    "tpu.trace_stop"() : () -> ()
    %109 = vector.broadcast %71 : vector<1x16xf32> to vector<16x16xf32>
    %110 = arith.addf %108, %109 : vector<16x16xf32>
    %cst_32 = arith.constant dense<0xFF800000> : vector<16xf32>
    %111 = vector.multi_reduction <maximumf>, %110, %cst_32 [1] : vector<16x16xf32> to vector<16xf32>
    %112 = vector.shape_cast %111 : vector<16xf32> to vector<16x1xf32>
    %113 = vector.broadcast %112 : vector<16x1xf32> to vector<16x16xf32>
    %114 = arith.subf %110, %113 : vector<16x16xf32>
    %115 = math.exp %114 : vector<16x16xf32>
    %cst_33 = arith.constant dense<0.000000e+00> : vector<16xf32>
    %116 = vector.multi_reduction <add>, %115, %cst_33 [1] : vector<16x16xf32> to vector<16xf32>
    %117 = vector.shape_cast %116 : vector<16xf32> to vector<16x1xf32>
    %118 = tpu.reciprocal %117 {approx = true} : vector<16x1xf32> -> vector<16x1xf32>
    %119 = vector.broadcast %118 : vector<16x1xf32> to vector<16x16xf32>
    %120 = arith.mulf %115, %119 : vector<16x16xf32>
    %121 = arith.truncf %120 : vector<16x16xf32> to vector<16x16xbf16>
    %122 = vector.extract_strided_slice %82 {offsets = [0, 32], sizes = [16, 32], strides = [1, 1]} : vector<16x128xf32> to vector<16x32xf32>
    %123 = arith.truncf %122 : vector<16x32xf32> to vector<16x32xbf16>
    %cst_34 = arith.constant dense<0.000000e+00> : vector<16x32xf32>
    %124 = tpu.matmul %121, %123, %cst_34 {dimension_numbers = #tpu.dot_dimension_numbers<[1], [0], [0], [1], [0, 0, 1, 1], [], []>} : vector<16x16xbf16>, vector<16x32xbf16>, vector<16x32xf32> -> vector<16x32xf32>
    %125 = vector.extract_strided_slice %80 {offsets = [0, 64], sizes = [16, 32], strides = [1, 1]} : vector<16x128xf32> to vector<16x32xf32>
    %126 = arith.truncf %125 : vector<16x32xf32> to vector<16x32xbf16>
    %127 = vector.extract_strided_slice %81 {offsets = [0, 64], sizes = [16, 32], strides = [1, 1]} : vector<16x128xf32> to vector<16x32xf32>
    %128 = arith.truncf %127 : vector<16x32xf32> to vector<16x32xbf16>
    "tpu.trace_start"() <{level = 10 : i32, message = "qd,kd->qk"}> : () -> ()
    %cst_35 = arith.constant dense<0.000000e+00> : vector<16x16xf32>
    %129 = tpu.matmul %126, %128, %cst_35 {dimension_numbers = #tpu.dot_dimension_numbers<[1], [1], [0], [0], [0, 0, 1, 0], [], []>} : vector<16x32xbf16>, vector<16x32xbf16>, vector<16x16xf32> -> vector<16x16xf32>
    "tpu.trace_stop"() : () -> ()
    %130 = vector.broadcast %71 : vector<1x16xf32> to vector<16x16xf32>
    %131 = arith.addf %129, %130 : vector<16x16xf32>
    %cst_36 = arith.constant dense<0xFF800000> : vector<16xf32>
    %132 = vector.multi_reduction <maximumf>, %131, %cst_36 [1] : vector<16x16xf32> to vector<16xf32>
    %133 = vector.shape_cast %132 : vector<16xf32> to vector<16x1xf32>
    %134 = vector.broadcast %133 : vector<16x1xf32> to vector<16x16xf32>
    %135 = arith.subf %131, %134 : vector<16x16xf32>
    %136 = math.exp %135 : vector<16x16xf32>
    %cst_37 = arith.constant dense<0.000000e+00> : vector<16xf32>
    %137 = vector.multi_reduction <add>, %136, %cst_37 [1] : vector<16x16xf32> to vector<16xf32>
    %138 = vector.shape_cast %137 : vector<16xf32> to vector<16x1xf32>
    %139 = tpu.reciprocal %138 {approx = true} : vector<16x1xf32> -> vector<16x1xf32>
    %140 = vector.broadcast %139 : vector<16x1xf32> to vector<16x16xf32>
    %141 = arith.mulf %136, %140 : vector<16x16xf32>
    %142 = arith.truncf %141 : vector<16x16xf32> to vector<16x16xbf16>
    %143 = vector.extract_strided_slice %82 {offsets = [0, 64], sizes = [16, 32], strides = [1, 1]} : vector<16x128xf32> to vector<16x32xf32>
    %144 = arith.truncf %143 : vector<16x32xf32> to vector<16x32xbf16>
    %cst_38 = arith.constant dense<0.000000e+00> : vector<16x32xf32>
    %145 = tpu.matmul %142, %144, %cst_38 {dimension_numbers = #tpu.dot_dimension_numbers<[1], [0], [0], [1], [0, 0, 1, 1], [], []>} : vector<16x16xbf16>, vector<16x32xbf16>, vector<16x32xf32> -> vector<16x32xf32>
    %146 = vector.extract_strided_slice %80 {offsets = [0, 96], sizes = [16, 32], strides = [1, 1]} : vector<16x128xf32> to vector<16x32xf32>
    %147 = arith.truncf %146 : vector<16x32xf32> to vector<16x32xbf16>
    %148 = vector.extract_strided_slice %81 {offsets = [0, 96], sizes = [16, 32], strides = [1, 1]} : vector<16x128xf32> to vector<16x32xf32>
    %149 = arith.truncf %148 : vector<16x32xf32> to vector<16x32xbf16>
    "tpu.trace_start"() <{level = 10 : i32, message = "qd,kd->qk"}> : () -> ()
    %cst_39 = arith.constant dense<0.000000e+00> : vector<16x16xf32>
    %150 = tpu.matmul %147, %149, %cst_39 {dimension_numbers = #tpu.dot_dimension_numbers<[1], [1], [0], [0], [0, 0, 1, 0], [], []>} : vector<16x32xbf16>, vector<16x32xbf16>, vector<16x16xf32> -> vector<16x16xf32>
    "tpu.trace_stop"() : () -> ()
    %151 = vector.broadcast %71 : vector<1x16xf32> to vector<16x16xf32>
    %152 = arith.addf %150, %151 : vector<16x16xf32>
    %cst_40 = arith.constant dense<0xFF800000> : vector<16xf32>
    %153 = vector.multi_reduction <maximumf>, %152, %cst_40 [1] : vector<16x16xf32> to vector<16xf32>
    %154 = vector.shape_cast %153 : vector<16xf32> to vector<16x1xf32>
    %155 = vector.broadcast %154 : vector<16x1xf32> to vector<16x16xf32>
    %156 = arith.subf %152, %155 : vector<16x16xf32>
    %157 = math.exp %156 : vector<16x16xf32>
    %cst_41 = arith.constant dense<0.000000e+00> : vector<16xf32>
    %158 = vector.multi_reduction <add>, %157, %cst_41 [1] : vector<16x16xf32> to vector<16xf32>
    %159 = vector.shape_cast %158 : vector<16xf32> to vector<16x1xf32>
    %160 = tpu.reciprocal %159 {approx = true} : vector<16x1xf32> -> vector<16x1xf32>
    %161 = vector.broadcast %160 : vector<16x1xf32> to vector<16x16xf32>
    %162 = arith.mulf %157, %161 : vector<16x16xf32>
    %163 = arith.truncf %162 : vector<16x16xf32> to vector<16x16xbf16>
    %164 = vector.extract_strided_slice %82 {offsets = [0, 96], sizes = [16, 32], strides = [1, 1]} : vector<16x128xf32> to vector<16x32xf32>
    %165 = arith.truncf %164 : vector<16x32xf32> to vector<16x32xbf16>
    %cst_42 = arith.constant dense<0.000000e+00> : vector<16x32xf32>
    %166 = tpu.matmul %163, %165, %cst_42 {dimension_numbers = #tpu.dot_dimension_numbers<[1], [0], [0], [1], [0, 0, 1, 1], [], []>} : vector<16x16xbf16>, vector<16x32xbf16>, vector<16x32xf32> -> vector<16x32xf32>
    %167 = tpu.concatenate %103, %124, %145, %166 in 1 : vector<16x32xf32>, vector<16x32xf32>, vector<16x32xf32>, vector<16x32xf32> -> vector<16x128xf32>
    %168 = arith.truncf %167 : vector<16x128xf32> to vector<16x128xbf16>
    %c0_43 = arith.constant 0 : index
    %c0_44 = arith.constant 0 : index
    %c0_45 = arith.constant 0 : index
    %169 = vector.load %arg9[%c0_43, %c0_44, %c0_45] : memref<2x128x128xbf16, #tpu.memory_space<vmem>>, vector<1x128x128xbf16>
    %170 = vector.shape_cast %169 : vector<1x128x128xbf16> to vector<128x128xbf16>
    %cst_46 = arith.constant dense<0.000000e+00> : vector<16x128xf32>
    %171 = tpu.matmul %168, %170, %cst_46 {dimension_numbers = #tpu.dot_dimension_numbers<[1], [0], [0], [1], [0, 0, 1, 1], [], []>} : vector<16x128xbf16>, vector<128x128xbf16>, vector<16x128xf32> -> vector<16x128xf32>
    %c0_47 = arith.constant 0 : index
    %c0_48 = arith.constant 0 : index
    %c0_49 = arith.constant 0 : index
    %172 = vector.load %arg10[%c0_47, %c0_48, %c0_49] : memref<2x1x128xf32, #tpu.memory_space<vmem>>, vector<1x1x128xf32>
    %173 = vector.shape_cast %172 : vector<1x1x128xf32> to vector<1x128xf32>
    %174 = vector.broadcast %173 : vector<1x128xf32> to vector<16x128xf32>
    %175 = arith.addf %171, %174 : vector<16x128xf32>
    %176 = arith.addf %65, %175 : vector<16x128xf32>
    %c0_50 = arith.constant 0 : index
    %c0_51 = arith.constant 0 : index
    %c0_52 = arith.constant 0 : index
    %177 = vector.load %arg11[%c0_50, %c0_51, %c0_52] : memref<2x1x128xf32, #tpu.memory_space<vmem>>, vector<1x1x128xf32>
    %178 = vector.shape_cast %177 : vector<1x1x128xf32> to vector<1x128xf32>
    %c0_53 = arith.constant 0 : index
    %c0_54 = arith.constant 0 : index
    %c0_55 = arith.constant 0 : index
    %179 = vector.load %arg12[%c0_53, %c0_54, %c0_55] : memref<2x1x128xf32, #tpu.memory_space<vmem>>, vector<1x1x128xf32>
    %180 = vector.shape_cast %179 : vector<1x1x128xf32> to vector<1x128xf32>
    %cst_56 = arith.constant dense<0.000000e+00> : vector<16xf32>
    %181 = vector.multi_reduction <add>, %176, %cst_56 [1] : vector<16x128xf32> to vector<16xf32>
    %182 = vector.shape_cast %181 : vector<16xf32> to vector<16x1xf32>
    %cst_57 = arith.constant 1.280000e+02 : f32
    %183 = vector.broadcast %cst_57 : f32 to vector<16x1xf32>
    %184 = arith.divf %182, %183 : vector<16x1xf32>
    %185 = vector.broadcast %184 : vector<16x1xf32> to vector<16x128xf32>
    %186 = arith.subf %176, %185 : vector<16x128xf32>
    %187 = arith.mulf %186, %186 : vector<16x128xf32>
    %cst_58 = arith.constant dense<0.000000e+00> : vector<16xf32>
    %188 = vector.multi_reduction <add>, %187, %cst_58 [1] : vector<16x128xf32> to vector<16xf32>
    %189 = vector.shape_cast %188 : vector<16xf32> to vector<16x1xf32>
    %cst_59 = arith.constant 1.280000e+02 : f32
    %190 = vector.broadcast %cst_59 : f32 to vector<16x1xf32>
    %191 = arith.divf %189, %190 : vector<16x1xf32>
    %192 = vector.broadcast %184 : vector<16x1xf32> to vector<16x128xf32>
    %193 = arith.subf %176, %192 : vector<16x128xf32>
    %cst_60 = arith.constant 9.99999974E-6 : f32
    %194 = vector.broadcast %cst_60 : f32 to vector<16x1xf32>
    %195 = arith.addf %191, %194 : vector<16x1xf32>
    %196 = math.rsqrt %195 : vector<16x1xf32>
    %197 = vector.broadcast %196 : vector<16x1xf32> to vector<16x128xf32>
    %198 = arith.mulf %193, %197 : vector<16x128xf32>
    %199 = vector.broadcast %178 : vector<1x128xf32> to vector<16x128xf32>
    %200 = arith.mulf %198, %199 : vector<16x128xf32>
    %201 = vector.broadcast %180 : vector<1x128xf32> to vector<16x128xf32>
    %202 = arith.addf %200, %201 : vector<16x128xf32>
    %203 = arith.truncf %202 : vector<16x128xf32> to vector<16x128xbf16>
    %c0_61 = arith.constant 0 : index
    %c0_62 = arith.constant 0 : index
    %c0_63 = arith.constant 0 : index
    %204 = vector.load %arg13[%c0_61, %c0_62, %c0_63] : memref<2x128x512xbf16, #tpu.memory_space<vmem>>, vector<1x128x512xbf16>
    %205 = vector.shape_cast %204 : vector<1x128x512xbf16> to vector<128x512xbf16>
    %cst_64 = arith.constant dense<0.000000e+00> : vector<16x512xf32>
    %206 = tpu.matmul %203, %205, %cst_64 {dimension_numbers = #tpu.dot_dimension_numbers<[1], [0], [0], [1], [0, 0, 1, 1], [], []>} : vector<16x128xbf16>, vector<128x512xbf16>, vector<16x512xf32> -> vector<16x512xf32>
    %c0_65 = arith.constant 0 : index
    %c0_66 = arith.constant 0 : index
    %c0_67 = arith.constant 0 : index
    %207 = vector.load %arg14[%c0_65, %c0_66, %c0_67] : memref<2x1x512xf32, #tpu.memory_space<vmem>>, vector<1x1x512xf32>
    %208 = vector.shape_cast %207 : vector<1x1x512xf32> to vector<1x512xf32>
    %209 = vector.broadcast %208 : vector<1x512xf32> to vector<16x512xf32>
    %210 = arith.addf %206, %209 : vector<16x512xf32>
    %cst_68 = arith.constant 5.000000e-01 : f32
    %211 = vector.broadcast %cst_68 : f32 to vector<16x512xf32>
    %212 = arith.mulf %211, %210 : vector<16x512xf32>
    %cst_69 = arith.constant 0.707106769 : f32
    %213 = vector.broadcast %cst_69 : f32 to vector<16x512xf32>
    %214 = arith.mulf %210, %213 : vector<16x512xf32>
    %cst_70 = arith.constant 0.000000e+00 : f32
    %215 = vector.broadcast %cst_70 : f32 to vector<16x512xf32>
    %216 = arith.cmpf oge, %214, %215 : vector<16x512xf32>
    %cst_71 = arith.constant 1.000000e+00 : f32
    %cst_72 = arith.constant -1.000000e+00 : f32
    %217 = vector.broadcast %cst_71 : f32 to vector<16x512xf32>
    %218 = vector.broadcast %cst_72 : f32 to vector<16x512xf32>
    %219 = arith.select %216, %217, %218 : vector<16x512xi1>, vector<16x512xf32>
    %220 = math.absf %214 : vector<16x512xf32>
    %cst_73 = arith.constant 0.327591091 : f32
    %221 = vector.broadcast %cst_73 : f32 to vector<16x512xf32>
    %222 = arith.mulf %221, %220 : vector<16x512xf32>
    %cst_74 = arith.constant 1.000000e+00 : f32
    %223 = vector.broadcast %cst_74 : f32 to vector<16x512xf32>
    %224 = arith.addf %223, %222 : vector<16x512xf32>
    %cst_75 = arith.constant 1.000000e+00 : f32
    %225 = vector.broadcast %cst_75 : f32 to vector<16x512xf32>
    %226 = arith.divf %225, %224 : vector<16x512xf32>
    %cst_76 = arith.constant 1.06140542 : f32
    %227 = vector.broadcast %cst_76 : f32 to vector<16x512xf32>
    %228 = arith.mulf %227, %226 : vector<16x512xf32>
    %cst_77 = arith.constant -1.45315206 : f32
    %229 = vector.broadcast %cst_77 : f32 to vector<16x512xf32>
    %230 = arith.addf %228, %229 : vector<16x512xf32>
    %231 = arith.mulf %230, %226 : vector<16x512xf32>
    %cst_78 = arith.constant 1.42141378 : f32
    %232 = vector.broadcast %cst_78 : f32 to vector<16x512xf32>
    %233 = arith.addf %231, %232 : vector<16x512xf32>
    %234 = arith.mulf %233, %226 : vector<16x512xf32>
    %cst_79 = arith.constant -0.284496725 : f32
    %235 = vector.broadcast %cst_79 : f32 to vector<16x512xf32>
    %236 = arith.addf %234, %235 : vector<16x512xf32>
    %237 = arith.mulf %236, %226 : vector<16x512xf32>
    %cst_80 = arith.constant 0.254829586 : f32
    %238 = vector.broadcast %cst_80 : f32 to vector<16x512xf32>
    %239 = arith.addf %237, %238 : vector<16x512xf32>
    %240 = arith.mulf %239, %226 : vector<16x512xf32>
    %cst_81 = arith.constant 0.000000e+00 : f32
    %241 = vector.broadcast %cst_81 : f32 to vector<16x512xf32>
    %242 = arith.subf %241, %220 : vector<16x512xf32>
    %243 = arith.mulf %242, %220 : vector<16x512xf32>
    %244 = math.exp %243 : vector<16x512xf32>
    %245 = arith.mulf %240, %244 : vector<16x512xf32>
    %cst_82 = arith.constant 1.000000e+00 : f32
    %246 = vector.broadcast %cst_82 : f32 to vector<16x512xf32>
    %247 = arith.subf %246, %245 : vector<16x512xf32>
    %248 = arith.mulf %219, %247 : vector<16x512xf32>
    %cst_83 = arith.constant 1.000000e+00 : f32
    %249 = vector.broadcast %cst_83 : f32 to vector<16x512xf32>
    %250 = arith.addf %249, %248 : vector<16x512xf32>
    %251 = arith.mulf %212, %250 : vector<16x512xf32>
    %252 = arith.truncf %251 : vector<16x512xf32> to vector<16x512xbf16>
    %c0_84 = arith.constant 0 : index
    %c0_85 = arith.constant 0 : index
    %c0_86 = arith.constant 0 : index
    %253 = vector.load %arg15[%c0_84, %c0_85, %c0_86] : memref<2x512x128xbf16, #tpu.memory_space<vmem>>, vector<1x512x128xbf16>
    %254 = vector.shape_cast %253 : vector<1x512x128xbf16> to vector<512x128xbf16>
    %cst_87 = arith.constant dense<0.000000e+00> : vector<16x128xf32>
    %255 = tpu.matmul %252, %254, %cst_87 {dimension_numbers = #tpu.dot_dimension_numbers<[1], [0], [0], [1], [0, 0, 1, 1], [], []>} : vector<16x512xbf16>, vector<512x128xbf16>, vector<16x128xf32> -> vector<16x128xf32>
    %c0_88 = arith.constant 0 : index
    %c0_89 = arith.constant 0 : index
    %c0_90 = arith.constant 0 : index
    %256 = vector.load %arg16[%c0_88, %c0_89, %c0_90] : memref<2x1x128xf32, #tpu.memory_space<vmem>>, vector<1x1x128xf32>
    %257 = vector.shape_cast %256 : vector<1x1x128xf32> to vector<1x128xf32>
    %258 = vector.broadcast %257 : vector<1x128xf32> to vector<16x128xf32>
    %259 = arith.addf %255, %258 : vector<16x128xf32>
    %260 = arith.addf %202, %259 : vector<16x128xf32>
    %c0_91 = arith.constant 0 : index
    %c0_92 = arith.constant 0 : index
    %c0_93 = arith.constant 0 : index
    %261 = vector.load %arg17[%c0_91, %c0_92, %c0_93] : memref<2x1x128xf32, #tpu.memory_space<vmem>>, vector<1x1x128xf32>
    %262 = vector.shape_cast %261 : vector<1x1x128xf32> to vector<1x128xf32>
    %c0_94 = arith.constant 0 : index
    %c0_95 = arith.constant 0 : index
    %c0_96 = arith.constant 0 : index
    %263 = vector.load %arg18[%c0_94, %c0_95, %c0_96] : memref<2x1x128xf32, #tpu.memory_space<vmem>>, vector<1x1x128xf32>
    %264 = vector.shape_cast %263 : vector<1x1x128xf32> to vector<1x128xf32>
    %cst_97 = arith.constant dense<0.000000e+00> : vector<16xf32>
    %265 = vector.multi_reduction <add>, %260, %cst_97 [1] : vector<16x128xf32> to vector<16xf32>
    %266 = vector.shape_cast %265 : vector<16xf32> to vector<16x1xf32>
    %cst_98 = arith.constant 1.280000e+02 : f32
    %267 = vector.broadcast %cst_98 : f32 to vector<16x1xf32>
    %268 = arith.divf %266, %267 : vector<16x1xf32>
    %269 = vector.broadcast %268 : vector<16x1xf32> to vector<16x128xf32>
    %270 = arith.subf %260, %269 : vector<16x128xf32>
    %271 = arith.mulf %270, %270 : vector<16x128xf32>
    %cst_99 = arith.constant dense<0.000000e+00> : vector<16xf32>
    %272 = vector.multi_reduction <add>, %271, %cst_99 [1] : vector<16x128xf32> to vector<16xf32>
    %273 = vector.shape_cast %272 : vector<16xf32> to vector<16x1xf32>
    %cst_100 = arith.constant 1.280000e+02 : f32
    %274 = vector.broadcast %cst_100 : f32 to vector<16x1xf32>
    %275 = arith.divf %273, %274 : vector<16x1xf32>
    %276 = vector.broadcast %268 : vector<16x1xf32> to vector<16x128xf32>
    %277 = arith.subf %260, %276 : vector<16x128xf32>
    %cst_101 = arith.constant 9.99999974E-6 : f32
    %278 = vector.broadcast %cst_101 : f32 to vector<16x1xf32>
    %279 = arith.addf %275, %278 : vector<16x1xf32>
    %280 = math.rsqrt %279 : vector<16x1xf32>
    %281 = vector.broadcast %280 : vector<16x1xf32> to vector<16x128xf32>
    %282 = arith.mulf %277, %281 : vector<16x128xf32>
    %283 = vector.broadcast %262 : vector<1x128xf32> to vector<16x128xf32>
    %284 = arith.mulf %282, %283 : vector<16x128xf32>
    %285 = vector.broadcast %264 : vector<1x128xf32> to vector<16x128xf32>
    %286 = arith.addf %284, %285 : vector<16x128xf32>
    %287 = arith.truncf %286 : vector<16x128xf32> to vector<16x128xbf16>
    %c1 = arith.constant 1 : index
    %c0_102 = arith.constant 0 : index
    %c0_103 = arith.constant 0 : index
    %288 = vector.load %arg7[%c1, %c0_102, %c0_103] : memref<2x128x384xbf16, #tpu.memory_space<vmem>>, vector<1x128x384xbf16>
    %289 = vector.shape_cast %288 : vector<1x128x384xbf16> to vector<128x384xbf16>
    %cst_104 = arith.constant dense<0.000000e+00> : vector<16x384xf32>
    %290 = tpu.matmul %287, %289, %cst_104 {dimension_numbers = #tpu.dot_dimension_numbers<[1], [0], [0], [1], [0, 0, 1, 1], [], []>} : vector<16x128xbf16>, vector<128x384xbf16>, vector<16x384xf32> -> vector<16x384xf32>
    %c1_105 = arith.constant 1 : index
    %c0_106 = arith.constant 0 : index
    %c0_107 = arith.constant 0 : index
    %291 = vector.load %arg8[%c1_105, %c0_106, %c0_107] : memref<2x1x384xf32, #tpu.memory_space<vmem>>, vector<1x1x384xf32>
    %292 = vector.shape_cast %291 : vector<1x1x384xf32> to vector<1x384xf32>
    %293 = vector.broadcast %292 : vector<1x384xf32> to vector<16x384xf32>
    %294 = arith.addf %290, %293 : vector<16x384xf32>
    %295 = vector.extract_strided_slice %294 {offsets = [0, 0], sizes = [16, 128], strides = [1, 1]} : vector<16x384xf32> to vector<16x128xf32>
    %296 = vector.extract_strided_slice %294 {offsets = [0, 128], sizes = [16, 128], strides = [1, 1]} : vector<16x384xf32> to vector<16x128xf32>
    %297 = vector.extract_strided_slice %294 {offsets = [0, 256], sizes = [16, 128], strides = [1, 1]} : vector<16x384xf32> to vector<16x128xf32>
    %298 = vector.extract_strided_slice %295 {offsets = [0, 0], sizes = [16, 32], strides = [1, 1]} : vector<16x128xf32> to vector<16x32xf32>
    %299 = arith.truncf %298 : vector<16x32xf32> to vector<16x32xbf16>
    %300 = vector.extract_strided_slice %296 {offsets = [0, 0], sizes = [16, 32], strides = [1, 1]} : vector<16x128xf32> to vector<16x32xf32>
    %301 = arith.truncf %300 : vector<16x32xf32> to vector<16x32xbf16>
    "tpu.trace_start"() <{level = 10 : i32, message = "qd,kd->qk"}> : () -> ()
    %cst_108 = arith.constant dense<0.000000e+00> : vector<16x16xf32>
    %302 = tpu.matmul %299, %301, %cst_108 {dimension_numbers = #tpu.dot_dimension_numbers<[1], [1], [0], [0], [0, 0, 1, 0], [], []>} : vector<16x32xbf16>, vector<16x32xbf16>, vector<16x16xf32> -> vector<16x16xf32>
    "tpu.trace_stop"() : () -> ()
    %303 = vector.broadcast %71 : vector<1x16xf32> to vector<16x16xf32>
    %304 = arith.addf %302, %303 : vector<16x16xf32>
    %cst_109 = arith.constant dense<0xFF800000> : vector<16xf32>
    %305 = vector.multi_reduction <maximumf>, %304, %cst_109 [1] : vector<16x16xf32> to vector<16xf32>
    %306 = vector.shape_cast %305 : vector<16xf32> to vector<16x1xf32>
    %307 = vector.broadcast %306 : vector<16x1xf32> to vector<16x16xf32>
    %308 = arith.subf %304, %307 : vector<16x16xf32>
    %309 = math.exp %308 : vector<16x16xf32>
    %cst_110 = arith.constant dense<0.000000e+00> : vector<16xf32>
    %310 = vector.multi_reduction <add>, %309, %cst_110 [1] : vector<16x16xf32> to vector<16xf32>
    %311 = vector.shape_cast %310 : vector<16xf32> to vector<16x1xf32>
    %312 = tpu.reciprocal %311 {approx = true} : vector<16x1xf32> -> vector<16x1xf32>
    %313 = vector.broadcast %312 : vector<16x1xf32> to vector<16x16xf32>
    %314 = arith.mulf %309, %313 : vector<16x16xf32>
    %315 = arith.truncf %314 : vector<16x16xf32> to vector<16x16xbf16>
    %316 = vector.extract_strided_slice %297 {offsets = [0, 0], sizes = [16, 32], strides = [1, 1]} : vector<16x128xf32> to vector<16x32xf32>
    %317 = arith.truncf %316 : vector<16x32xf32> to vector<16x32xbf16>
    %cst_111 = arith.constant dense<0.000000e+00> : vector<16x32xf32>
    %318 = tpu.matmul %315, %317, %cst_111 {dimension_numbers = #tpu.dot_dimension_numbers<[1], [0], [0], [1], [0, 0, 1, 1], [], []>} : vector<16x16xbf16>, vector<16x32xbf16>, vector<16x32xf32> -> vector<16x32xf32>
    %319 = vector.extract_strided_slice %295 {offsets = [0, 32], sizes = [16, 32], strides = [1, 1]} : vector<16x128xf32> to vector<16x32xf32>
    %320 = arith.truncf %319 : vector<16x32xf32> to vector<16x32xbf16>
    %321 = vector.extract_strided_slice %296 {offsets = [0, 32], sizes = [16, 32], strides = [1, 1]} : vector<16x128xf32> to vector<16x32xf32>
    %322 = arith.truncf %321 : vector<16x32xf32> to vector<16x32xbf16>
    "tpu.trace_start"() <{level = 10 : i32, message = "qd,kd->qk"}> : () -> ()
    %cst_112 = arith.constant dense<0.000000e+00> : vector<16x16xf32>
    %323 = tpu.matmul %320, %322, %cst_112 {dimension_numbers = #tpu.dot_dimension_numbers<[1], [1], [0], [0], [0, 0, 1, 0], [], []>} : vector<16x32xbf16>, vector<16x32xbf16>, vector<16x16xf32> -> vector<16x16xf32>
    "tpu.trace_stop"() : () -> ()
    %324 = vector.broadcast %71 : vector<1x16xf32> to vector<16x16xf32>
    %325 = arith.addf %323, %324 : vector<16x16xf32>
    %cst_113 = arith.constant dense<0xFF800000> : vector<16xf32>
    %326 = vector.multi_reduction <maximumf>, %325, %cst_113 [1] : vector<16x16xf32> to vector<16xf32>
    %327 = vector.shape_cast %326 : vector<16xf32> to vector<16x1xf32>
    %328 = vector.broadcast %327 : vector<16x1xf32> to vector<16x16xf32>
    %329 = arith.subf %325, %328 : vector<16x16xf32>
    %330 = math.exp %329 : vector<16x16xf32>
    %cst_114 = arith.constant dense<0.000000e+00> : vector<16xf32>
    %331 = vector.multi_reduction <add>, %330, %cst_114 [1] : vector<16x16xf32> to vector<16xf32>
    %332 = vector.shape_cast %331 : vector<16xf32> to vector<16x1xf32>
    %333 = tpu.reciprocal %332 {approx = true} : vector<16x1xf32> -> vector<16x1xf32>
    %334 = vector.broadcast %333 : vector<16x1xf32> to vector<16x16xf32>
    %335 = arith.mulf %330, %334 : vector<16x16xf32>
    %336 = arith.truncf %335 : vector<16x16xf32> to vector<16x16xbf16>
    %337 = vector.extract_strided_slice %297 {offsets = [0, 32], sizes = [16, 32], strides = [1, 1]} : vector<16x128xf32> to vector<16x32xf32>
    %338 = arith.truncf %337 : vector<16x32xf32> to vector<16x32xbf16>
    %cst_115 = arith.constant dense<0.000000e+00> : vector<16x32xf32>
    %339 = tpu.matmul %336, %338, %cst_115 {dimension_numbers = #tpu.dot_dimension_numbers<[1], [0], [0], [1], [0, 0, 1, 1], [], []>} : vector<16x16xbf16>, vector<16x32xbf16>, vector<16x32xf32> -> vector<16x32xf32>
    %340 = vector.extract_strided_slice %295 {offsets = [0, 64], sizes = [16, 32], strides = [1, 1]} : vector<16x128xf32> to vector<16x32xf32>
    %341 = arith.truncf %340 : vector<16x32xf32> to vector<16x32xbf16>
    %342 = vector.extract_strided_slice %296 {offsets = [0, 64], sizes = [16, 32], strides = [1, 1]} : vector<16x128xf32> to vector<16x32xf32>
    %343 = arith.truncf %342 : vector<16x32xf32> to vector<16x32xbf16>
    "tpu.trace_start"() <{level = 10 : i32, message = "qd,kd->qk"}> : () -> ()
    %cst_116 = arith.constant dense<0.000000e+00> : vector<16x16xf32>
    %344 = tpu.matmul %341, %343, %cst_116 {dimension_numbers = #tpu.dot_dimension_numbers<[1], [1], [0], [0], [0, 0, 1, 0], [], []>} : vector<16x32xbf16>, vector<16x32xbf16>, vector<16x16xf32> -> vector<16x16xf32>
    "tpu.trace_stop"() : () -> ()
    %345 = vector.broadcast %71 : vector<1x16xf32> to vector<16x16xf32>
    %346 = arith.addf %344, %345 : vector<16x16xf32>
    %cst_117 = arith.constant dense<0xFF800000> : vector<16xf32>
    %347 = vector.multi_reduction <maximumf>, %346, %cst_117 [1] : vector<16x16xf32> to vector<16xf32>
    %348 = vector.shape_cast %347 : vector<16xf32> to vector<16x1xf32>
    %349 = vector.broadcast %348 : vector<16x1xf32> to vector<16x16xf32>
    %350 = arith.subf %346, %349 : vector<16x16xf32>
    %351 = math.exp %350 : vector<16x16xf32>
    %cst_118 = arith.constant dense<0.000000e+00> : vector<16xf32>
    %352 = vector.multi_reduction <add>, %351, %cst_118 [1] : vector<16x16xf32> to vector<16xf32>
    %353 = vector.shape_cast %352 : vector<16xf32> to vector<16x1xf32>
    %354 = tpu.reciprocal %353 {approx = true} : vector<16x1xf32> -> vector<16x1xf32>
    %355 = vector.broadcast %354 : vector<16x1xf32> to vector<16x16xf32>
    %356 = arith.mulf %351, %355 : vector<16x16xf32>
    %357 = arith.truncf %356 : vector<16x16xf32> to vector<16x16xbf16>
    %358 = vector.extract_strided_slice %297 {offsets = [0, 64], sizes = [16, 32], strides = [1, 1]} : vector<16x128xf32> to vector<16x32xf32>
    %359 = arith.truncf %358 : vector<16x32xf32> to vector<16x32xbf16>
    %cst_119 = arith.constant dense<0.000000e+00> : vector<16x32xf32>
    %360 = tpu.matmul %357, %359, %cst_119 {dimension_numbers = #tpu.dot_dimension_numbers<[1], [0], [0], [1], [0, 0, 1, 1], [], []>} : vector<16x16xbf16>, vector<16x32xbf16>, vector<16x32xf32> -> vector<16x32xf32>
    %361 = vector.extract_strided_slice %295 {offsets = [0, 96], sizes = [16, 32], strides = [1, 1]} : vector<16x128xf32> to vector<16x32xf32>
    %362 = arith.truncf %361 : vector<16x32xf32> to vector<16x32xbf16>
    %363 = vector.extract_strided_slice %296 {offsets = [0, 96], sizes = [16, 32], strides = [1, 1]} : vector<16x128xf32> to vector<16x32xf32>
    %364 = arith.truncf %363 : vector<16x32xf32> to vector<16x32xbf16>
    "tpu.trace_start"() <{level = 10 : i32, message = "qd,kd->qk"}> : () -> ()
    %cst_120 = arith.constant dense<0.000000e+00> : vector<16x16xf32>
    %365 = tpu.matmul %362, %364, %cst_120 {dimension_numbers = #tpu.dot_dimension_numbers<[1], [1], [0], [0], [0, 0, 1, 0], [], []>} : vector<16x32xbf16>, vector<16x32xbf16>, vector<16x16xf32> -> vector<16x16xf32>
    "tpu.trace_stop"() : () -> ()
    %366 = vector.broadcast %71 : vector<1x16xf32> to vector<16x16xf32>
    %367 = arith.addf %365, %366 : vector<16x16xf32>
    %cst_121 = arith.constant dense<0xFF800000> : vector<16xf32>
    %368 = vector.multi_reduction <maximumf>, %367, %cst_121 [1] : vector<16x16xf32> to vector<16xf32>
    %369 = vector.shape_cast %368 : vector<16xf32> to vector<16x1xf32>
    %370 = vector.broadcast %369 : vector<16x1xf32> to vector<16x16xf32>
    %371 = arith.subf %367, %370 : vector<16x16xf32>
    %372 = math.exp %371 : vector<16x16xf32>
    %cst_122 = arith.constant dense<0.000000e+00> : vector<16xf32>
    %373 = vector.multi_reduction <add>, %372, %cst_122 [1] : vector<16x16xf32> to vector<16xf32>
    %374 = vector.shape_cast %373 : vector<16xf32> to vector<16x1xf32>
    %375 = tpu.reciprocal %374 {approx = true} : vector<16x1xf32> -> vector<16x1xf32>
    %376 = vector.broadcast %375 : vector<16x1xf32> to vector<16x16xf32>
    %377 = arith.mulf %372, %376 : vector<16x16xf32>
    %378 = arith.truncf %377 : vector<16x16xf32> to vector<16x16xbf16>
    %379 = vector.extract_strided_slice %297 {offsets = [0, 96], sizes = [16, 32], strides = [1, 1]} : vector<16x128xf32> to vector<16x32xf32>
    %380 = arith.truncf %379 : vector<16x32xf32> to vector<16x32xbf16>
    %cst_123 = arith.constant dense<0.000000e+00> : vector<16x32xf32>
    %381 = tpu.matmul %378, %380, %cst_123 {dimension_numbers = #tpu.dot_dimension_numbers<[1], [0], [0], [1], [0, 0, 1, 1], [], []>} : vector<16x16xbf16>, vector<16x32xbf16>, vector<16x32xf32> -> vector<16x32xf32>
    %382 = tpu.concatenate %318, %339, %360, %381 in 1 : vector<16x32xf32>, vector<16x32xf32>, vector<16x32xf32>, vector<16x32xf32> -> vector<16x128xf32>
    %383 = arith.truncf %382 : vector<16x128xf32> to vector<16x128xbf16>
    %c1_124 = arith.constant 1 : index
    %c0_125 = arith.constant 0 : index
    %c0_126 = arith.constant 0 : index
    %384 = vector.load %arg9[%c1_124, %c0_125, %c0_126] : memref<2x128x128xbf16, #tpu.memory_space<vmem>>, vector<1x128x128xbf16>
    %385 = vector.shape_cast %384 : vector<1x128x128xbf16> to vector<128x128xbf16>
    %cst_127 = arith.constant dense<0.000000e+00> : vector<16x128xf32>
    %386 = tpu.matmul %383, %385, %cst_127 {dimension_numbers = #tpu.dot_dimension_numbers<[1], [0], [0], [1], [0, 0, 1, 1], [], []>} : vector<16x128xbf16>, vector<128x128xbf16>, vector<16x128xf32> -> vector<16x128xf32>
    %c1_128 = arith.constant 1 : index
    %c0_129 = arith.constant 0 : index
    %c0_130 = arith.constant 0 : index
    %387 = vector.load %arg10[%c1_128, %c0_129, %c0_130] : memref<2x1x128xf32, #tpu.memory_space<vmem>>, vector<1x1x128xf32>
    %388 = vector.shape_cast %387 : vector<1x1x128xf32> to vector<1x128xf32>
    %389 = vector.broadcast %388 : vector<1x128xf32> to vector<16x128xf32>
    %390 = arith.addf %386, %389 : vector<16x128xf32>
    %391 = arith.addf %286, %390 : vector<16x128xf32>
    %c1_131 = arith.constant 1 : index
    %c0_132 = arith.constant 0 : index
    %c0_133 = arith.constant 0 : index
    %392 = vector.load %arg11[%c1_131, %c0_132, %c0_133] : memref<2x1x128xf32, #tpu.memory_space<vmem>>, vector<1x1x128xf32>
    %393 = vector.shape_cast %392 : vector<1x1x128xf32> to vector<1x128xf32>
    %c1_134 = arith.constant 1 : index
    %c0_135 = arith.constant 0 : index
    %c0_136 = arith.constant 0 : index
    %394 = vector.load %arg12[%c1_134, %c0_135, %c0_136] : memref<2x1x128xf32, #tpu.memory_space<vmem>>, vector<1x1x128xf32>
    %395 = vector.shape_cast %394 : vector<1x1x128xf32> to vector<1x128xf32>
    %cst_137 = arith.constant dense<0.000000e+00> : vector<16xf32>
    %396 = vector.multi_reduction <add>, %391, %cst_137 [1] : vector<16x128xf32> to vector<16xf32>
    %397 = vector.shape_cast %396 : vector<16xf32> to vector<16x1xf32>
    %cst_138 = arith.constant 1.280000e+02 : f32
    %398 = vector.broadcast %cst_138 : f32 to vector<16x1xf32>
    %399 = arith.divf %397, %398 : vector<16x1xf32>
    %400 = vector.broadcast %399 : vector<16x1xf32> to vector<16x128xf32>
    %401 = arith.subf %391, %400 : vector<16x128xf32>
    %402 = arith.mulf %401, %401 : vector<16x128xf32>
    %cst_139 = arith.constant dense<0.000000e+00> : vector<16xf32>
    %403 = vector.multi_reduction <add>, %402, %cst_139 [1] : vector<16x128xf32> to vector<16xf32>
    %404 = vector.shape_cast %403 : vector<16xf32> to vector<16x1xf32>
    %cst_140 = arith.constant 1.280000e+02 : f32
    %405 = vector.broadcast %cst_140 : f32 to vector<16x1xf32>
    %406 = arith.divf %404, %405 : vector<16x1xf32>
    %407 = vector.broadcast %399 : vector<16x1xf32> to vector<16x128xf32>
    %408 = arith.subf %391, %407 : vector<16x128xf32>
    %cst_141 = arith.constant 9.99999974E-6 : f32
    %409 = vector.broadcast %cst_141 : f32 to vector<16x1xf32>
    %410 = arith.addf %406, %409 : vector<16x1xf32>
    %411 = math.rsqrt %410 : vector<16x1xf32>
    %412 = vector.broadcast %411 : vector<16x1xf32> to vector<16x128xf32>
    %413 = arith.mulf %408, %412 : vector<16x128xf32>
    %414 = vector.broadcast %393 : vector<1x128xf32> to vector<16x128xf32>
    %415 = arith.mulf %413, %414 : vector<16x128xf32>
    %416 = vector.broadcast %395 : vector<1x128xf32> to vector<16x128xf32>
    %417 = arith.addf %415, %416 : vector<16x128xf32>
    %418 = arith.truncf %417 : vector<16x128xf32> to vector<16x128xbf16>
    %c1_142 = arith.constant 1 : index
    %c0_143 = arith.constant 0 : index
    %c0_144 = arith.constant 0 : index
    %419 = vector.load %arg13[%c1_142, %c0_143, %c0_144] : memref<2x128x512xbf16, #tpu.memory_space<vmem>>, vector<1x128x512xbf16>
    %420 = vector.shape_cast %419 : vector<1x128x512xbf16> to vector<128x512xbf16>
    %cst_145 = arith.constant dense<0.000000e+00> : vector<16x512xf32>
    %421 = tpu.matmul %418, %420, %cst_145 {dimension_numbers = #tpu.dot_dimension_numbers<[1], [0], [0], [1], [0, 0, 1, 1], [], []>} : vector<16x128xbf16>, vector<128x512xbf16>, vector<16x512xf32> -> vector<16x512xf32>
    %c1_146 = arith.constant 1 : index
    %c0_147 = arith.constant 0 : index
    %c0_148 = arith.constant 0 : index
    %422 = vector.load %arg14[%c1_146, %c0_147, %c0_148] : memref<2x1x512xf32, #tpu.memory_space<vmem>>, vector<1x1x512xf32>
    %423 = vector.shape_cast %422 : vector<1x1x512xf32> to vector<1x512xf32>
    %424 = vector.broadcast %423 : vector<1x512xf32> to vector<16x512xf32>
    %425 = arith.addf %421, %424 : vector<16x512xf32>
    %cst_149 = arith.constant 5.000000e-01 : f32
    %426 = vector.broadcast %cst_149 : f32 to vector<16x512xf32>
    %427 = arith.mulf %426, %425 : vector<16x512xf32>
    %cst_150 = arith.constant 0.707106769 : f32
    %428 = vector.broadcast %cst_150 : f32 to vector<16x512xf32>
    %429 = arith.mulf %425, %428 : vector<16x512xf32>
    %cst_151 = arith.constant 0.000000e+00 : f32
    %430 = vector.broadcast %cst_151 : f32 to vector<16x512xf32>
    %431 = arith.cmpf oge, %429, %430 : vector<16x512xf32>
    %cst_152 = arith.constant 1.000000e+00 : f32
    %cst_153 = arith.constant -1.000000e+00 : f32
    %432 = vector.broadcast %cst_152 : f32 to vector<16x512xf32>
    %433 = vector.broadcast %cst_153 : f32 to vector<16x512xf32>
    %434 = arith.select %431, %432, %433 : vector<16x512xi1>, vector<16x512xf32>
    %435 = math.absf %429 : vector<16x512xf32>
    %cst_154 = arith.constant 0.327591091 : f32
    %436 = vector.broadcast %cst_154 : f32 to vector<16x512xf32>
    %437 = arith.mulf %436, %435 : vector<16x512xf32>
    %cst_155 = arith.constant 1.000000e+00 : f32
    %438 = vector.broadcast %cst_155 : f32 to vector<16x512xf32>
    %439 = arith.addf %438, %437 : vector<16x512xf32>
    %cst_156 = arith.constant 1.000000e+00 : f32
    %440 = vector.broadcast %cst_156 : f32 to vector<16x512xf32>
    %441 = arith.divf %440, %439 : vector<16x512xf32>
    %cst_157 = arith.constant 1.06140542 : f32
    %442 = vector.broadcast %cst_157 : f32 to vector<16x512xf32>
    %443 = arith.mulf %442, %441 : vector<16x512xf32>
    %cst_158 = arith.constant -1.45315206 : f32
    %444 = vector.broadcast %cst_158 : f32 to vector<16x512xf32>
    %445 = arith.addf %443, %444 : vector<16x512xf32>
    %446 = arith.mulf %445, %441 : vector<16x512xf32>
    %cst_159 = arith.constant 1.42141378 : f32
    %447 = vector.broadcast %cst_159 : f32 to vector<16x512xf32>
    %448 = arith.addf %446, %447 : vector<16x512xf32>
    %449 = arith.mulf %448, %441 : vector<16x512xf32>
    %cst_160 = arith.constant -0.284496725 : f32
    %450 = vector.broadcast %cst_160 : f32 to vector<16x512xf32>
    %451 = arith.addf %449, %450 : vector<16x512xf32>
    %452 = arith.mulf %451, %441 : vector<16x512xf32>
    %cst_161 = arith.constant 0.254829586 : f32
    %453 = vector.broadcast %cst_161 : f32 to vector<16x512xf32>
    %454 = arith.addf %452, %453 : vector<16x512xf32>
    %455 = arith.mulf %454, %441 : vector<16x512xf32>
    %cst_162 = arith.constant 0.000000e+00 : f32
    %456 = vector.broadcast %cst_162 : f32 to vector<16x512xf32>
    %457 = arith.subf %456, %435 : vector<16x512xf32>
    %458 = arith.mulf %457, %435 : vector<16x512xf32>
    %459 = math.exp %458 : vector<16x512xf32>
    %460 = arith.mulf %455, %459 : vector<16x512xf32>
    %cst_163 = arith.constant 1.000000e+00 : f32
    %461 = vector.broadcast %cst_163 : f32 to vector<16x512xf32>
    %462 = arith.subf %461, %460 : vector<16x512xf32>
    %463 = arith.mulf %434, %462 : vector<16x512xf32>
    %cst_164 = arith.constant 1.000000e+00 : f32
    %464 = vector.broadcast %cst_164 : f32 to vector<16x512xf32>
    %465 = arith.addf %464, %463 : vector<16x512xf32>
    %466 = arith.mulf %427, %465 : vector<16x512xf32>
    %467 = arith.truncf %466 : vector<16x512xf32> to vector<16x512xbf16>
    %c1_165 = arith.constant 1 : index
    %c0_166 = arith.constant 0 : index
    %c0_167 = arith.constant 0 : index
    %468 = vector.load %arg15[%c1_165, %c0_166, %c0_167] : memref<2x512x128xbf16, #tpu.memory_space<vmem>>, vector<1x512x128xbf16>
    %469 = vector.shape_cast %468 : vector<1x512x128xbf16> to vector<512x128xbf16>
    %cst_168 = arith.constant dense<0.000000e+00> : vector<16x128xf32>
    %470 = tpu.matmul %467, %469, %cst_168 {dimension_numbers = #tpu.dot_dimension_numbers<[1], [0], [0], [1], [0, 0, 1, 1], [], []>} : vector<16x512xbf16>, vector<512x128xbf16>, vector<16x128xf32> -> vector<16x128xf32>
    %c1_169 = arith.constant 1 : index
    %c0_170 = arith.constant 0 : index
    %c0_171 = arith.constant 0 : index
    %471 = vector.load %arg16[%c1_169, %c0_170, %c0_171] : memref<2x1x128xf32, #tpu.memory_space<vmem>>, vector<1x1x128xf32>
    %472 = vector.shape_cast %471 : vector<1x1x128xf32> to vector<1x128xf32>
    %473 = vector.broadcast %472 : vector<1x128xf32> to vector<16x128xf32>
    %474 = arith.addf %470, %473 : vector<16x128xf32>
    %475 = arith.addf %417, %474 : vector<16x128xf32>
    %c1_172 = arith.constant 1 : index
    %c0_173 = arith.constant 0 : index
    %c0_174 = arith.constant 0 : index
    %476 = vector.load %arg17[%c1_172, %c0_173, %c0_174] : memref<2x1x128xf32, #tpu.memory_space<vmem>>, vector<1x1x128xf32>
    %477 = vector.shape_cast %476 : vector<1x1x128xf32> to vector<1x128xf32>
    %c1_175 = arith.constant 1 : index
    %c0_176 = arith.constant 0 : index
    %c0_177 = arith.constant 0 : index
    %478 = vector.load %arg18[%c1_175, %c0_176, %c0_177] : memref<2x1x128xf32, #tpu.memory_space<vmem>>, vector<1x1x128xf32>
    %479 = vector.shape_cast %478 : vector<1x1x128xf32> to vector<1x128xf32>
    %cst_178 = arith.constant dense<0.000000e+00> : vector<16xf32>
    %480 = vector.multi_reduction <add>, %475, %cst_178 [1] : vector<16x128xf32> to vector<16xf32>
    %481 = vector.shape_cast %480 : vector<16xf32> to vector<16x1xf32>
    %cst_179 = arith.constant 1.280000e+02 : f32
    %482 = vector.broadcast %cst_179 : f32 to vector<16x1xf32>
    %483 = arith.divf %481, %482 : vector<16x1xf32>
    %484 = vector.broadcast %483 : vector<16x1xf32> to vector<16x128xf32>
    %485 = arith.subf %475, %484 : vector<16x128xf32>
    %486 = arith.mulf %485, %485 : vector<16x128xf32>
    %cst_180 = arith.constant dense<0.000000e+00> : vector<16xf32>
    %487 = vector.multi_reduction <add>, %486, %cst_180 [1] : vector<16x128xf32> to vector<16xf32>
    %488 = vector.shape_cast %487 : vector<16xf32> to vector<16x1xf32>
    %cst_181 = arith.constant 1.280000e+02 : f32
    %489 = vector.broadcast %cst_181 : f32 to vector<16x1xf32>
    %490 = arith.divf %488, %489 : vector<16x1xf32>
    %491 = vector.broadcast %483 : vector<16x1xf32> to vector<16x128xf32>
    %492 = arith.subf %475, %491 : vector<16x128xf32>
    %cst_182 = arith.constant 9.99999974E-6 : f32
    %493 = vector.broadcast %cst_182 : f32 to vector<16x1xf32>
    %494 = arith.addf %490, %493 : vector<16x1xf32>
    %495 = math.rsqrt %494 : vector<16x1xf32>
    %496 = vector.broadcast %495 : vector<16x1xf32> to vector<16x128xf32>
    %497 = arith.mulf %492, %496 : vector<16x128xf32>
    %498 = vector.broadcast %477 : vector<1x128xf32> to vector<16x128xf32>
    %499 = arith.mulf %497, %498 : vector<16x128xf32>
    %500 = vector.broadcast %479 : vector<1x128xf32> to vector<16x128xf32>
    %501 = arith.addf %499, %500 : vector<16x128xf32>
    %c0_183 = arith.constant 0 : index
    %c0_184 = arith.constant 0 : index
    %502 = vector.load %arg19[%c0_183, %c0_184] : memref<1x128xf32, #tpu.memory_space<vmem>>, vector<1x128xf32>
    %c0_185 = arith.constant 0 : index
    %c0_186 = arith.constant 0 : index
    %503 = vector.load %arg20[%c0_185, %c0_186] : memref<1x128xf32, #tpu.memory_space<vmem>>, vector<1x128xf32>
    %cst_187 = arith.constant dense<0.000000e+00> : vector<16xf32>
    %504 = vector.multi_reduction <add>, %501, %cst_187 [1] : vector<16x128xf32> to vector<16xf32>
    %505 = vector.shape_cast %504 : vector<16xf32> to vector<16x1xf32>
    %cst_188 = arith.constant 1.280000e+02 : f32
    %506 = vector.broadcast %cst_188 : f32 to vector<16x1xf32>
    %507 = arith.divf %505, %506 : vector<16x1xf32>
    %508 = vector.broadcast %507 : vector<16x1xf32> to vector<16x128xf32>
    %509 = arith.subf %501, %508 : vector<16x128xf32>
    %510 = arith.mulf %509, %509 : vector<16x128xf32>
    %cst_189 = arith.constant dense<0.000000e+00> : vector<16xf32>
    %511 = vector.multi_reduction <add>, %510, %cst_189 [1] : vector<16x128xf32> to vector<16xf32>
    %512 = vector.shape_cast %511 : vector<16xf32> to vector<16x1xf32>
    %cst_190 = arith.constant 1.280000e+02 : f32
    %513 = vector.broadcast %cst_190 : f32 to vector<16x1xf32>
    %514 = arith.divf %512, %513 : vector<16x1xf32>
    %515 = vector.broadcast %507 : vector<16x1xf32> to vector<16x128xf32>
    %516 = arith.subf %501, %515 : vector<16x128xf32>
    %cst_191 = arith.constant 9.99999974E-6 : f32
    %517 = vector.broadcast %cst_191 : f32 to vector<16x1xf32>
    %518 = arith.addf %514, %517 : vector<16x1xf32>
    %519 = math.rsqrt %518 : vector<16x1xf32>
    %520 = vector.broadcast %519 : vector<16x1xf32> to vector<16x128xf32>
    %521 = arith.mulf %516, %520 : vector<16x128xf32>
    %522 = vector.broadcast %502 : vector<1x128xf32> to vector<16x128xf32>
    %523 = arith.mulf %521, %522 : vector<16x128xf32>
    %524 = vector.broadcast %503 : vector<1x128xf32> to vector<16x128xf32>
    %525 = arith.addf %523, %524 : vector<16x128xf32>
    %526 = arith.truncf %525 : vector<16x128xf32> to vector<16x128xbf16>
    %c0_192 = arith.constant 0 : index
    %c0_193 = arith.constant 0 : index
    %527 = vector.load %arg21[%c0_192, %c0_193] : memref<128x128xbf16, #tpu.memory_space<vmem>>, vector<128x128xbf16>
    %cst_194 = arith.constant dense<0.000000e+00> : vector<16x128xf32>
    %528 = tpu.matmul %526, %527, %cst_194 {dimension_numbers = #tpu.dot_dimension_numbers<[1], [0], [0], [1], [0, 0, 1, 1], [], []>} : vector<16x128xbf16>, vector<128x128xbf16>, vector<16x128xf32> -> vector<16x128xf32>
    %c0_195 = arith.constant 0 : index
    %c0_196 = arith.constant 0 : index
    %529 = vector.load %arg22[%c0_195, %c0_196] : memref<1x128xf32, #tpu.memory_space<vmem>>, vector<1x128xf32>
    %530 = vector.broadcast %529 : vector<1x128xf32> to vector<16x128xf32>
    %531 = arith.addf %528, %530 : vector<16x128xf32>
    %532 = vector.shape_cast %531 : vector<16x128xf32> to vector<1x16x128xf32>
    %c0_197 = arith.constant 0 : index
    %c0_198 = arith.constant 0 : index
    %c0_199 = arith.constant 0 : index
    %533 = vector.load %arg23[%c0_197, %c0_198, %c0_199] : memref<1x16x128xf32, #tpu.memory_space<vmem>>, vector<1x16x128xf32>
    tpu.vector_store %arg23[%c0_197, %c0_198, %c0_199], %532 {strides = array<i32>} : memref<1x16x128xf32, #tpu.memory_space<vmem>>, vector<1x16x128xf32>,
    return
  }
  func.func @transform_0(%arg0: i32) -> (i32, i32, i32) {
    %c0_i32 = arith.constant 0 : i32
    %c0_i32_0 = arith.constant 0 : i32
    %c0_i32_1 = arith.constant 0 : i32
    return %arg0, %c0_i32, %c0_i32_0 : i32, i32, i32
  }
  func.func @transform_1(%arg0: i32) -> (i32, i32, i32) {
    %c0_i32 = arith.constant 0 : i32
    %c0_i32_0 = arith.constant 0 : i32
    %c0_i32_1 = arith.constant 0 : i32
    return %arg0, %c0_i32, %c0_i32_0 : i32, i32, i32
  }
  func.func @transform_2(%arg0: i32) -> (i32, i32) {
    %c0_i32 = arith.constant 0 : i32
    %c0_i32_0 = arith.constant 0 : i32
    %c0_i32_1 = arith.constant 0 : i32
    return %c0_i32, %c0_i32_0 : i32, i32
  }
  func.func @transform_3(%arg0: i32) -> (i32, i32) {
    %c0_i32 = arith.constant 0 : i32
    %c0_i32_0 = arith.constant 0 : i32
    %c0_i32_1 = arith.constant 0 : i32
    return %c0_i32, %c0_i32_0 : i32, i32
  }
  func.func @transform_4(%arg0: i32) -> (i32, i32) {
    %c0_i32 = arith.constant 0 : i32
    %c0_i32_0 = arith.constant 0 : i32
    %c0_i32_1 = arith.constant 0 : i32
    return %c0_i32, %c0_i32_0 : i32, i32
  }
  func.func @transform_5(%arg0: i32) -> (i32, i32) {
    %c0_i32 = arith.constant 0 : i32
    %c0_i32_0 = arith.constant 0 : i32
    %c0_i32_1 = arith.constant 0 : i32
    return %c0_i32, %c0_i32_0 : i32, i32
  }
  func.func @transform_6(%arg0: i32) -> (i32, i32, i32) {
    %c0_i32 = arith.constant 0 : i32
    %c0_i32_0 = arith.constant 0 : i32
    %c0_i32_1 = arith.constant 0 : i32
    %c0_i32_2 = arith.constant 0 : i32
    return %c0_i32, %c0_i32_0, %c0_i32_1 : i32, i32, i32
  }
  func.func @transform_7(%arg0: i32) -> (i32, i32, i32) {
    %c0_i32 = arith.constant 0 : i32
    %c0_i32_0 = arith.constant 0 : i32
    %c0_i32_1 = arith.constant 0 : i32
    %c0_i32_2 = arith.constant 0 : i32
    return %c0_i32, %c0_i32_0, %c0_i32_1 : i32, i32, i32
  }
  func.func @transform_8(%arg0: i32) -> (i32, i32, i32) {
    %c0_i32 = arith.constant 0 : i32
    %c0_i32_0 = arith.constant 0 : i32
    %c0_i32_1 = arith.constant 0 : i32
    %c0_i32_2 = arith.constant 0 : i32
    return %c0_i32, %c0_i32_0, %c0_i32_1 : i32, i32, i32
  }
  func.func @transform_9(%arg0: i32) -> (i32, i32, i32) {
    %c0_i32 = arith.constant 0 : i32
    %c0_i32_0 = arith.constant 0 : i32
    %c0_i32_1 = arith.constant 0 : i32
    %c0_i32_2 = arith.constant 0 : i32
    return %c0_i32, %c0_i32_0, %c0_i32_1 : i32, i32, i32
  }
  func.func @transform_10(%arg0: i32) -> (i32, i32, i32) {
    %c0_i32 = arith.constant 0 : i32
    %c0_i32_0 = arith.constant 0 : i32
    %c0_i32_1 = arith.constant 0 : i32
    %c0_i32_2 = arith.constant 0 : i32
    return %c0_i32, %c0_i32_0, %c0_i32_1 : i32, i32, i32
  }
  func.func @transform_11(%arg0: i32) -> (i32, i32, i32) {
    %c0_i32 = arith.constant 0 : i32
    %c0_i32_0 = arith.constant 0 : i32
    %c0_i32_1 = arith.constant 0 : i32
    %c0_i32_2 = arith.constant 0 : i32
    return %c0_i32, %c0_i32_0, %c0_i32_1 : i32, i32, i32
  }
  func.func @transform_12(%arg0: i32) -> (i32, i32, i32) {
    %c0_i32 = arith.constant 0 : i32
    %c0_i32_0 = arith.constant 0 : i32
    %c0_i32_1 = arith.constant 0 : i32
    %c0_i32_2 = arith.constant 0 : i32
    return %c0_i32, %c0_i32_0, %c0_i32_1 : i32, i32, i32
  }
  func.func @transform_13(%arg0: i32) -> (i32, i32, i32) {
    %c0_i32 = arith.constant 0 : i32
    %c0_i32_0 = arith.constant 0 : i32
    %c0_i32_1 = arith.constant 0 : i32
    %c0_i32_2 = arith.constant 0 : i32
    return %c0_i32, %c0_i32_0, %c0_i32_1 : i32, i32, i32
  }
  func.func @transform_14(%arg0: i32) -> (i32, i32, i32) {
    %c0_i32 = arith.constant 0 : i32
    %c0_i32_0 = arith.constant 0 : i32
    %c0_i32_1 = arith.constant 0 : i32
    %c0_i32_2 = arith.constant 0 : i32
    return %c0_i32, %c0_i32_0, %c0_i32_1 : i32, i32, i32
  }
  func.func @transform_15(%arg0: i32) -> (i32, i32, i32) {
    %c0_i32 = arith.constant 0 : i32
    %c0_i32_0 = arith.constant 0 : i32
    %c0_i32_1 = arith.constant 0 : i32
    %c0_i32_2 = arith.constant 0 : i32
    return %c0_i32, %c0_i32_0, %c0_i32_1 : i32, i32, i32
  }
  func.func @transform_16(%arg0: i32) -> (i32, i32, i32) {
    %c0_i32 = arith.constant 0 : i32
    %c0_i32_0 = arith.constant 0 : i32
    %c0_i32_1 = arith.constant 0 : i32
    %c0_i32_2 = arith.constant 0 : i32
    return %c0_i32, %c0_i32_0, %c0_i32_1 : i32, i32, i32
  }
  func.func @transform_17(%arg0: i32) -> (i32, i32, i32) {
    %c0_i32 = arith.constant 0 : i32
    %c0_i32_0 = arith.constant 0 : i32
    %c0_i32_1 = arith.constant 0 : i32
    %c0_i32_2 = arith.constant 0 : i32
    return %c0_i32, %c0_i32_0, %c0_i32_1 : i32, i32, i32
  }
  func.func @transform_18(%arg0: i32) -> (i32, i32) {
    %c0_i32 = arith.constant 0 : i32
    %c0_i32_0 = arith.constant 0 : i32
    %c0_i32_1 = arith.constant 0 : i32
    return %c0_i32, %c0_i32_0 : i32, i32
  }
  func.func @transform_19(%arg0: i32) -> (i32, i32) {
    %c0_i32 = arith.constant 0 : i32
    %c0_i32_0 = arith.constant 0 : i32
    %c0_i32_1 = arith.constant 0 : i32
    return %c0_i32, %c0_i32_0 : i32, i32
  }
  func.func @transform_20(%arg0: i32) -> (i32, i32) {
    %c0_i32 = arith.constant 0 : i32
    %c0_i32_0 = arith.constant 0 : i32
    %c0_i32_1 = arith.constant 0 : i32
    return %c0_i32, %c0_i32_0 : i32, i32
  }
  func.func @transform_21(%arg0: i32) -> (i32, i32) {
    %c0_i32 = arith.constant 0 : i32
    %c0_i32_0 = arith.constant 0 : i32
    %c0_i32_1 = arith.constant 0 : i32
    return %c0_i32, %c0_i32_0 : i32, i32
  }
  func.func @transform_22(%arg0: i32) -> (i32, i32, i32) {
    %c0_i32 = arith.constant 0 : i32
    %c0_i32_0 = arith.constant 0 : i32
    %c0_i32_1 = arith.constant 0 : i32
    return %arg0, %c0_i32, %c0_i32_0 : i32, i32, i32
  }
}

</mosaic_0001>

<bundles_post_ra>
// kernel: tpu_custom_call.1
= control target key start
LH: loop header
LB: loop body
LE: loop exit
PB: predicated region body
PF: predicated region fallthrough
CT: control target
= control target key end

     0   :  { %s8303_s0 = inlined_call_operand.vmem [shape: s32[2,16,1], index: 0, kind: input, shape index: {}]   ;;  %s8304_s1 = inlined_call_operand.hbm [shape: f32[2,1,16], index: 1, kind: input, shape index: {}]   ;;  %s8305_s2 = inlined_call_operand.hbm [shape: f32[16,128], index: 2, kind: input, shape index: {}]   ;;  %s8306_s3 = inlined_call_operand.hbm [shape: f32[4,128], index: 3, kind: input, shape index: {}]   ;;  %s8307_s4 = inlined_call_operand.hbm [shape: f32[1,128], index: 4, kind: input, shape index: {}]   ;;  %s8308_s5 = inlined_call_operand.hbm [shape: f32[1,128], index: 5, kind: input, shape index: {}]   ;;  %s8309_s6 = inlined_call_operand.hbm [shape: bf16[2,128,384], index: 6, kind: input, shape index: {}]   ;;  %s8310_s7 = inlined_call_operand.vmem [shape: f32[2,1,384], index: 7, kind: input, shape index: {}]   ;;  %s8311_s8 = inlined_call_operand.hbm [shape: bf16[2,128,128], index: 8, kind: input, shape index: {}]   ;;  %s8312_s9 = inlined_call_operand.hbm [shape: f32[2,1,128], index: 9, kind: input, shape index: {}]   ;;  %s8313_s10 = inlined_call_operand.hbm [shape: f32[2,1,128], index: 10, kind: input, shape index: {}]   ;;  %s8314_s11 = inlined_call_operand.hbm [shape: f32[2,1,128], index: 11, kind: input, shape index: {}]   ;;  %s8315_s12 = inlined_call_operand.hbm [shape: bf16[2,128,512], index: 12, kind: input, shape index: {}]   ;;  %s8316_s13 = inlined_call_operand.hbm [shape: f32[2,1,512], index: 13, kind: input, shape index: {}]   ;;  %s8317_s14 = inlined_call_operand.hbm [shape: bf16[2,512,128], index: 14, kind: input, shape index: {}]   ;;  %s8318_s15 = inlined_call_operand.hbm [shape: f32[2,1,128], index: 15, kind: input, shape index: {}]   ;;  %s8319_s16 = inlined_call_operand.hbm [shape: f32[2,1,128], index: 16, kind: input, shape index: {}]   ;;  %s8320_s17 = inlined_call_operand.hbm [shape: f32[2,1,128], index: 17, kind: input, shape index: {}]   ;;  %s8321_s18 = inlined_call_operand.hbm [shape: f32[1,128], index: 18, kind: input, shape index: {}]   ;;  %s8322_s19 = inlined_call_operand.hbm [shape: f32[1,128], index: 19, kind: input, shape index: {}]   ;;  %s8323_s20 = inlined_call_operand.vmem [shape: bf16[128,128], index: 20, kind: input, shape index: {}]   ;;  %s8324_s21 = inlined_call_operand.vmem [shape: f32[1,128], index: 21, kind: input, shape index: {}]   ;;  %s8325_s22 = inlined_call_operand.hbm [shape: f32[2,16,128], index: 22, kind: output, shape index: {}]  }
   0x1   :  { %8341 = sst [smem:[#allocation45_spill]] %s8303_s0 }
   0x2   :  { %8342 = sst [smem:[#allocation46_spill]] %s8304_s1 }
   0x3   :  { %8343 = sst [smem:[#allocation47_spill]] %s8305_s2 }
   0x4   :  { %8344 = sst [smem:[#allocation48_spill]] %s8306_s3 }
   0x5   :  { %8345 = sst [smem:[#allocation49_spill]] %s8307_s4 }
   0x6   :  { %8346 = sst [smem:[#allocation50_spill]] %s8308_s5 }
   0x7   :  { %8347 = sst [smem:[#allocation51_spill]] %s8309_s6 }
   0x8   :  { %8348 = sst [smem:[#allocation52_spill]] %s8310_s7 }
   0x9   :  { %8349 = sst [smem:[#allocation53_spill]] %s8311_s8 }
   0xa   :  { %8350 = sst [smem:[#allocation54_spill]] %s8312_s9 }
   0xb   :  { %8351 = sst [smem:[#allocation55_spill]] %s8313_s10 }
   0xc   :  { %8352 = sst [smem:[#allocation56_spill]] %s8314_s11 }
   0xd   :  { %8353 = sst [smem:[#allocation57_spill]] %s8315_s12 }
   0xe   :  { %8354 = sst [smem:[#allocation58_spill]] %s8323_s20 }
   0xf   :  { %8355 = sst [smem:[#allocation59_spill]] %s8324_s21 }
  0x10   :  { %8356 = sst [smem:[#allocation60_spill]] %s8325_s22 }
  0x11   :  { %27 = vsyncpa [#allocation3], 0 }
  0x12   :  { %29 = vsyncpa [#allocation3 + $0x1], 0 }
  0x13   :  { %30 = vsyncpa [#allocation6], 0 }
  0x14   :  { %31 = vsyncpa [#allocation9], 0 }
  0x15   :  { %32 = vsyncpa [#allocation12], 0 }
  0x16   :  { %33 = vsyncpa [#allocation15], 0 }
  0x17   :  { %34 = vsyncpa [#allocation18], 0 }
  0x18   :  { %35 = vsyncpa [#allocation21], 0 }
  0x19   :  { %36 = vsyncpa [#allocation24], 0 }
  0x1a   :  { %37 = vsyncpa [#allocation27], 0 }
  0x1b   :  { %38 = vsyncpa [#allocation30], 0 }
  0x1c   :  { %39 = vsyncpa [#allocation4], 0 }
  0x1d   :  { %41 = vsyncpa [#allocation4 + $0x1], 0  ;;  %s7276_s3 = smov 0   ;;  %s7278_s28 = smov 0  }
  0x1e   :  { %s7280_s29 = smov 0   ;;  %s7282_s30 = smov 0  }
  0x1f LB: > { %s7124_s4 = smov [#allocation5]   ;;  %s7297_s23 = sadd.s32 4294967295, %s7122_s30   ;;  %s7122_s30 = sphi %s7282_s30, %s8415_s30   ;;  %s7118_s29 = sphi %s7280_s29, %s8414_s29   ;;  %s7114_s28 = sphi %s7278_s28, %s8413_s28   ;;  %s7110_s3 = sphi %s7276_s3, %s8412_s3  }
  0x20   : > { %s562_s0 = sshll.u32 %s7124_s4, 4  ;;  %8357 = sst [smem:[#allocation43_spill]] %s7297_s23  ;;  %s563_s0 = int_to_ptr.vmem [resolvable:$true] %s562_s0 }
  0x21   : > { %p5213_p0 = scmp.ge.s32.totalorder %s7122_s30, 1  ;;  %p8336_p1 = scmp.eq.s32.totalorder %s7297_s23, 0 }
  0x22   : > { %p550_p2 = scmp.lt.s32.totalorder %s7122_s30, 3  ;;  %s7125_s5 = smov [#allocation8]  }
  0x23   : > { %s587_s24 = sshll.u32 %s7125_s5, 4  ;;  %s7126_s25 = smov [#allocation11]   ;;  %s588_s24 = int_to_ptr.vmem [resolvable:$true] %s587_s24 }
  0x24   : > { %p7302_p3 = pnand %p5213_p0, %p550_p2  ;;  %s608_s26 = sshll.u32 %s7126_s25, 4  ;;  %s7315_s26 = int_to_ptr.vmem [resolvable:$true] %s608_s26 }
  0x25   : > { %s6563_s27 = scalar_lea.vmem %s563_s0, 256  ;;  %p6571_p11 = scmp.lt.s32.totalorder %s563_s0, %s563_s0 }
  0x26   : > { %s8358_s1 = scalar_select %p7302_p3, 1, 0 }
  0x27   : > { %p5937_p5 = pneg %p7302_p3  ;;  %p6564_p8 = scmp.ne.s32.totalorder %s563_s0, %s6563_s27 }
  0x28   : > { %8359 = sst [smem:[#allocation44_spill]] %s8358_s1  ;;  %p6572_p12 = scmp.lt.s32.totalorder %s6563_s27, %s6563_s27 }
  0x29   : > { %p7311_p6 = pnand %p5937_p5, %p8336_p1 }
  0x2a   : > { %p6573_p13 = por %p6572_p12, %p6571_p11 }
  0x2b   : > { %p7319_p7 = pneg %p7311_p6 }
  0x2d   : > { %p6566_p9 = pnand %p6564_p8, %p7319_p7 }
  0x2f   : > { %p6567_p10 = pneg %p6566_p9 }
  0x31   : > { %p6574_p0 = pnand %p6573_p13, %p6567_p10 }
  0x33   : > { %6577 = shalt.err (!%p6574_p0)
}
  0x34   : > { %s7127_s4 = smov 128   ;;  %s7128_s5 = smov 8  }
  0x35   : > { %s8362_s21 = sld [smem:[#allocation47_spill]]  ;;  %s6589_s20 = scalar_lea.vmem %s588_s24, 16 }
  0x36   : > { %p6590_p2 = scmp.ne.s32.totalorder %s588_s24, %s6589_s20  ;;  %s6596_s7 = scalar_lea.vmem %s588_s24, 32 }
  0x37   : > { %p6597_p9 = scmp.lt.s32.totalorder %s588_s24, %s588_s24  ;;  %p6598_p4 = scmp.lt.s32.totalorder %s6596_s7, %s6589_s20 }
  0x38   : > { %p6592_p5 = pnand %p6590_p2, %p7319_p7 }
  0x39   : > { %p6599_p11 = por %p6598_p4, %p6597_p9 }
  0x3a   : > { %p6593_p8 = pneg %p6592_p5 }
  0x3b   : > { %5940 = dma.hbm_to_vmem [thread:$0]  (!%p7311_p6), %s8362_s21, 256, %s563_s0, [#allocation6], %s7127_s4, %s7127_s4, %s7128_s5  }
  0x3c   : > { %p6600_p10 = pnand %p6599_p11, %p6593_p8 }
  0x3e   : > { %6603 = shalt.err (!%p6600_p10)
}
  0x3f   : > { %s8363_s23 = sld [smem:[#allocation49_spill]]  ;;  %s6615_s21 = scalar_lea.vmem %s7315_s26, 6144 }
  0x40   : > { %p6616_p12 = scmp.ne.s32.totalorder %s7315_s26, %s6615_s21  ;;  %p6623_p2 = scmp.lt.s32.totalorder %s7315_s26, %s7315_s26 }
  0x41   : > { %p6624_p4 = scmp.lt.s32.totalorder %s6615_s21, %s6615_s21 }
  0x42   : > { %p6618_p13 = pnand %p6616_p12, %p7319_p7 }
  0x43   : > { %p6625_p5 = por %p6624_p4, %p6623_p2 }
  0x44   : > { %p6619_p0 = pneg %p6618_p13 }
  0x45   : > { %5946 = dma.hbm_to_vmem [thread:$0]  (!%p7311_p6), %s8363_s23, 16, %s588_s24, [#allocation9]  }
  0x46   : > { %p6626_p8 = pnand %p6625_p5, %p6619_p0 }
  0x48   : > { %6629 = shalt.err (!%p6626_p8)
}
  0x49   : > { %s7129_s7 = smov 192   ;;  %s7130_s20 = smov 12  }
  0x4a   : > { %s8364_s23 = sld [smem:[#allocation51_spill]]  ;;  %s7131_s1 = smov [#allocation14]  }
  0x4b   : > { %s637_s24 = sshll.u32 %s7131_s1, 4  ;;  %s638_s24 = int_to_ptr.vmem [resolvable:$true] %s637_s24 }
  0x4c   : > { %s6641_s4 = scalar_lea.vmem %s638_s24, 32  ;;  %p6649_p12 = scmp.lt.s32.totalorder %s638_s24, %s638_s24 }
  0x4d   : > { %p6642_p9 = scmp.ne.s32.totalorder %s638_s24, %s6641_s4  ;;  %p6650_p13 = scmp.lt.s32.totalorder %s6641_s4, %s6641_s4 }
  0x4f   : > { %p6644_p11 = pnand %p6642_p9, %p7319_p7  ;;  %p6651_p0 = por %p6650_p13, %p6649_p12 }
  0x50   : > { %5952 = dma.hbm_to_vmem [thread:$0]  (!%p7311_p6), %s8364_s23, 6144, %s7315_s26, [#allocation12], %s7129_s7, %s7129_s7, %s7130_s20  }
  0x51   : > { %p6645_p10 = pneg %p6644_p11 }
  0x53   : > { %p6652_p2 = pnand %p6651_p0, %p6645_p10 }
  0x55   : > { %6655 = shalt.err (!%p6652_p2)
}
  0x56   : > { %s8334_s5 = smov 16   ;;  %s8338_s25 = smov 1  }
  0x57   : > { %s8365_s9 = sld [smem:[#allocation54_spill]]  ;;  %s7134_s21 = smov [#allocation17]  }
  0x58   : > { %s663_s7 = sshll.u32 %s7134_s21, 4  ;;  %s664_s7 = int_to_ptr.vmem [resolvable:$true] %s663_s7 }
  0x59   : > { %s6667_s20 = scalar_lea.vmem %s664_s7, 32  ;;  %p6675_p9 = scmp.lt.s32.totalorder %s664_s7, %s664_s7 }
  0x5a   : > { %p6668_p4 = scmp.ne.s32.totalorder %s664_s7, %s6667_s20  ;;  %p6676_p11 = scmp.lt.s32.totalorder %s6667_s20, %s6667_s20 }
  0x5c   : > { %p6670_p5 = pnand %p6668_p4, %p7319_p7  ;;  %p6677_p10 = por %p6676_p11, %p6675_p9 }
  0x5d   : > { %5958 = dma.hbm_to_vmem [thread:$0]  (!%p7311_p6), %s8365_s9, 32, %s638_s24, [#allocation15], %s8334_s5, %s8334_s5, %s8338_s25  }
  0x5e   : > { %p6671_p8 = pneg %p6670_p5 }
  0x60   : > { %p6678_p12 = pnand %p6677_p10, %p6671_p8 }
  0x62   : > { %6681 = shalt.err (!%p6678_p12)
}
  0x63   : > { %s8366_s11 = sld [smem:[#allocation56_spill]]  ;;  %s7135_s23 = smov [#allocation20]  }
  0x64   : > { %s689_s1 = sshll.u32 %s7135_s23, 4  ;;  %s7136_s24 = smov [#allocation23]   ;;  %s690_s1 = int_to_ptr.vmem [resolvable:$true] %s689_s1 }
  0x65   : > { %s715_s4 = sshll.u32 %s7136_s24, 4  ;;  %s6693_s26 = scalar_lea.vmem %s690_s1, 128  ;;  %s716_s4 = int_to_ptr.vmem [resolvable:$true] %s715_s4 }
  0x66   : > { %p6694_p13 = scmp.ne.s32.totalorder %s690_s1, %s6693_s26  ;;  %p6701_p4 = scmp.lt.s32.totalorder %s690_s1, %s690_s1 }
  0x67   : > { %p6702_p5 = scmp.lt.s32.totalorder %s6693_s26, %s6693_s26 }
  0x68   : > { %p6696_p0 = pnand %p6694_p13, %p7319_p7 }
  0x69   : > { %5964 = dma.hbm_to_vmem [thread:$0]  (!%p7311_p6), %s8366_s11, 32, %s664_s7, [#allocation18], %s8334_s5, %s8334_s5, %s8338_s25  }
  0x6a   : > { %p6697_p2 = pneg %p6696_p0  ;;  %p6703_p8 = por %p6702_p5, %p6701_p4 }
  0x6c   : > { %p6704_p9 = pnand %p6703_p8, %p6697_p2 }
  0x6e   : > { %6707 = shalt.err (!%p6704_p9)
}
  0x6f   : > { %s7137_s27 = smov 64   ;;  %s7138_s21 = smov 4  }
  0x70   : > { %5970 = dma.hbm_to_vmem [thread:$0]  (!%p7311_p6), %s8316_s13, 128, %s690_s1, [#allocation21], %s7137_s27, %s7137_s27, %s7138_s21  }
  0x71   : > { %s6719_s22 = scalar_lea.vmem %s716_s4, 32  ;;  %p6727_p13 = scmp.lt.s32.totalorder %s716_s4, %s716_s4 }
  0x72   : > { %p6720_p11 = scmp.ne.s32.totalorder %s716_s4, %s6719_s22  ;;  %p6728_p0 = scmp.lt.s32.totalorder %s6719_s22, %s6719_s22 }
  0x74   : > { %p6722_p10 = pnand %p6720_p11, %p7319_p7  ;;  %p6729_p2 = por %p6728_p0, %p6727_p13 }
  0x76   : > { %p6723_p12 = pneg %p6722_p10 }
  0x78   : > { %p6730_p4 = pnand %p6729_p2, %p6723_p12 }
  0x7a   : > { %6733 = shalt.err (!%p6730_p4)
}
  0x7b   : > { %5976 = dma.hbm_to_vmem [thread:$0]  (!%p7311_p6), %s8318_s15, 32, %s716_s4, [#allocation24], %s8334_s5, %s8334_s5, %s8338_s25  }
  0x7c   : > { %s7139_s1 = smov [#allocation26]   ;;  %s7140_s26 = smov [#allocation7]  }
  0x7d   : > { %s741_s24 = sshll.u32 %s7139_s1, 4  ;;  %s576_s7 = sshll.u32 %s7140_s26, 4  ;;  %s742_s24 = int_to_ptr.vmem [resolvable:$true] %s741_s24  ;;  %s577_s7 = int_to_ptr.vmem [resolvable:$true] %s576_s7 }
  0x7e   : > { %s6745_s20 = scalar_lea.vmem %s742_s24, 32  ;;  %p6753_p11 = scmp.lt.s32.totalorder %s742_s24, %s742_s24 }
  0x7f   : > { %p6746_p5 = scmp.ne.s32.totalorder %s742_s24, %s6745_s20  ;;  %p6754_p10 = scmp.lt.s32.totalorder %s6745_s20, %s6745_s20 }
  0x81   : > { %p6748_p8 = pnand %p6746_p5, %p7319_p7  ;;  %p6755_p12 = por %p6754_p10, %p6753_p11 }
  0x83   : > { %p6749_p9 = pneg %p6748_p8 }
  0x85   : > { %p6756_p13 = pnand %p6755_p12, %p6749_p9 }
  0x87   : > { %6759 = shalt.err (!%p6756_p13)
}
  0x88   : > { %5982 = dma.hbm_to_vmem [thread:$0]  (!%p7311_p6), %s8320_s17, 32, %s742_s24, [#allocation27], %s8334_s5, %s8334_s5, %s8338_s25  }
  0x89   : > { %s6771_s0 = scalar_lea.vmem %s577_s7, 64  ;;  %p6779_p5 = scmp.lt.s32.totalorder %s577_s7, %s577_s7 }
  0x8a   : > { %p6772_p0 = scmp.ne.s32.totalorder %s577_s7, %s6771_s0  ;;  %p6780_p8 = scmp.lt.s32.totalorder %s6771_s0, %s6771_s0 }
  0x8c   : > { %p6774_p2 = pnand %p6772_p0, %p7319_p7  ;;  %p6781_p9 = por %p6780_p8, %p6779_p5 }
  0x8e   : > { %p6775_p4 = pneg %p6774_p2 }
  0x90   : > { %p6782_p11 = pnand %p6781_p9, %p6775_p4 }
  0x92   : > { %6785 = shalt.err (!%p6782_p11)
}
  0x93   : > { %s8367_s26 = sld [smem:[#allocation48_spill]]  ;;  %s7141_s20 = smov [#allocation10]  }
  0x94   : > { %s598_s24 = sshll.u32 %s7141_s20, 4  ;;  %s7142_s4 = smov [#allocation13]   ;;  %s599_s24 = int_to_ptr.vmem [resolvable:$true] %s598_s24 }
  0x95   : > { %s624_s22 = sshll.u32 %s7142_s4, 4  ;;  %s6797_s5 = scalar_lea.vmem %s599_s24, 16  ;;  %s625_s22 = int_to_ptr.vmem [resolvable:$true] %s624_s22 }
  0x96   : > { %p6798_p10 = scmp.ne.s32.totalorder %s599_s24, %s6797_s5  ;;  %s6804_s0 = scalar_lea.vmem %s599_s24, 32 }
  0x97   : > { %p6805_p0 = scmp.lt.s32.totalorder %s599_s24, %s599_s24  ;;  %p6806_p2 = scmp.lt.s32.totalorder %s6804_s0, %s6797_s5 }
  0x98   : > { %p6800_p12 = pnand %p6798_p10, %p7319_p7 }
  0x99   : > { %5943 = dma.hbm_to_vmem [thread:$0]  (!%p7311_p6), %s8367_s26, 64, %s577_s7, [#allocation6]  }
  0x9a   : > { %p6801_p13 = pneg %p6800_p12  ;;  %p6807_p4 = por %p6806_p2, %p6805_p0 }
  0x9c   : > { %p6808_p5 = pnand %p6807_p4, %p6801_p13 }
  0x9e   : > { %6811 = shalt.err (!%p6808_p5)
}
  0x9f   : > { %s8368_s1 = sld [smem:[#allocation50_spill]]  ;;  %s6823_s26 = scalar_lea.vmem %s625_s22, 2048 }
  0xa0   : > { %p6824_p8 = scmp.ne.s32.totalorder %s625_s22, %s6823_s26  ;;  %p6831_p10 = scmp.lt.s32.totalorder %s625_s22, %s625_s22 }
  0xa1   : > { %p6832_p12 = scmp.lt.s32.totalorder %s6823_s26, %s6823_s26 }
  0xa2   : > { %p6826_p9 = pnand %p6824_p8, %p7319_p7 }
  0xa3   : > { %p6833_p1 = por %p6832_p12, %p6831_p10 }
  0xa4   : > { %p6827_p11 = pneg %p6826_p9 }
  0xa5   : > { %5949 = dma.hbm_to_vmem [thread:$0]  (!%p7311_p6), %s8368_s1, 16, %s599_s24, [#allocation9]  }
  0xa6   : > { %p6834_p3 = pnand %p6833_p1, %p6827_p11 }
  0xa8   : > { %6837 = shalt.err (!%p6834_p3)
}
  0xa9   : > { %s8369_s8 = sld [smem:[#allocation53_spill]]  ;;  %s7143_s24 = smov [#allocation16]  }
  0xaa   : > { %s650_s4 = sshll.u32 %s7143_s24, 4  ;;  %s7144_s0 = smov [#allocation19]   ;;  %s651_s4 = int_to_ptr.vmem [resolvable:$true] %s650_s4 }
  0xab   : > { %s676_s23 = sshll.u32 %s7144_s0, 4  ;;  %s6849_s7 = scalar_lea.vmem %s651_s4, 32  ;;  %s677_s23 = int_to_ptr.vmem [resolvable:$true] %s676_s23 }
  0xac   : > { %p6850_p13 = scmp.ne.s32.totalorder %s651_s4, %s6849_s7  ;;  %p6857_p0 = scmp.lt.s32.totalorder %s651_s4, %s651_s4 }
  0xad   : > { %p6858_p2 = scmp.lt.s32.totalorder %s6849_s7, %s6849_s7 }
  0xae   : > { %p6852_p1 = pnand %p6850_p13, %p7319_p7 }
  0xaf   : > { %5955 = dma.hbm_to_vmem [thread:$0]  (!%p7311_p6), %s8369_s8, 2048, %s625_s22, [#allocation12], %s7137_s27, %s7137_s27, %s7138_s21  }
  0xb0   : > { %p6853_p3 = pneg %p6852_p1  ;;  %p6859_p4 = por %p6858_p2, %p6857_p0 }
  0xb2   : > { %p6860_p5 = pnand %p6859_p4, %p6853_p3 }
  0xb4   : > { %6863 = shalt.err (!%p6860_p5)
}
  0xb5   : > { %s8370_s1 = smov 16   ;;  %s8371_s10 = sld [smem:[#allocation55_spill]] }
  0xb6   : > { %s6875_s5 = scalar_lea.vmem %s677_s23, 8192  ;;  %p6883_p10 = scmp.lt.s32.totalorder %s677_s23, %s677_s23 }
  0xb7   : > { %p6876_p8 = scmp.ne.s32.totalorder %s677_s23, %s6875_s5  ;;  %p6884_p12 = scmp.lt.s32.totalorder %s6875_s5, %s6875_s5 }
  0xb9   : > { %p6878_p9 = pnand %p6876_p8, %p7319_p7  ;;  %p6885_p13 = por %p6884_p12, %p6883_p10 }
  0xbb   : > { %5961 = dma.hbm_to_vmem [thread:$0]  (!%p7311_p6), %s8371_s10, 32, %s651_s4, [#allocation15], %s8370_s1, %s8370_s1, %s8338_s25  }
  0xbc   : > { %p6879_p11 = pneg %p6878_p9 }
  0xbe   : > { %p6886_p1 = pnand %p6885_p13, %p6879_p11 }
  0xc0   : > { %6889 = shalt.err (!%p6886_p1)
}
  0xc1   : > { %s7145_s20 = smov 256   ;;  %s8372_s12 = sld [smem:[#allocation57_spill]] }
  0xc2   : > { %s7146_s4 = smov [#allocation22]   ;;  %s7147_s22 = smov [#allocation25]  }
  0xc3   : > { %s702_s7 = sshll.u32 %s7146_s4, 4  ;;  %s728_s26 = sshll.u32 %s7147_s22, 4  ;;  %s703_s7 = int_to_ptr.vmem [resolvable:$true] %s702_s7  ;;  %s729_s26 = int_to_ptr.vmem [resolvable:$true] %s728_s26 }
  0xc4   : > { %s6901_s25 = scalar_lea.vmem %s703_s7, 8192  ;;  %p6909_p4 = scmp.lt.s32.totalorder %s703_s7, %s703_s7 }
  0xc5   : > { %p6902_p3 = scmp.ne.s32.totalorder %s703_s7, %s6901_s25  ;;  %p6910_p5 = scmp.lt.s32.totalorder %s6901_s25, %s6901_s25 }
  0xc7   : > { %5967 = dma.hbm_to_vmem [thread:$0]  (!%p7311_p6), %s8372_s12, 8192, %s677_s23, [#allocation18], %s7145_s20, %s7145_s20, %s8370_s1  }
  0xc8   : > { %p6904_p0 = pnand %p6902_p3, %p7319_p7  ;;  %p6911_p8 = por %p6910_p5, %p6909_p4 }
  0xca   : > { %p6905_p2 = pneg %p6904_p0 }
  0xcc   : > { %p6912_p9 = pnand %p6911_p8, %p6905_p2 }
  0xce   : > { %6915 = shalt.err (!%p6912_p9)
}
  0xcf   : > { %5973 = dma.hbm_to_vmem [thread:$0]  (!%p7311_p6), %s8317_s14, 8192, %s703_s7, [#allocation21], %s7137_s27, %s7137_s27, %s7138_s21  }
  0xd0   : > { %s6927_s20 = scalar_lea.vmem %s729_s26, 32  ;;  %p6935_p13 = scmp.lt.s32.totalorder %s729_s26, %s729_s26 }
  0xd1   : > { %p6928_p11 = scmp.ne.s32.totalorder %s729_s26, %s6927_s20  ;;  %p6936_p1 = scmp.lt.s32.totalorder %s6927_s20, %s6927_s20 }
  0xd3   : > { %p6930_p10 = pnand %p6928_p11, %p7319_p7  ;;  %p6937_p3 = por %p6936_p1, %p6935_p13 }
  0xd5   : > { %p6931_p12 = pneg %p6930_p10 }
  0xd7   : > { %p6938_p0 = pnand %p6937_p3, %p6931_p12 }
  0xd9   : > { %6941 = shalt.err (!%p6938_p0)
}
  0xda   : > { %s8373_s25 = smov 1   ;;  %s7148_s27 = smov [#allocation28]  }
  0xdb   : > { %5979 = dma.hbm_to_vmem [thread:$0]  (!%p7311_p6), %s8319_s16, 32, %s729_s26, [#allocation24], %s8370_s1, %s8370_s1, %s8373_s25  }
  0xdc   : > { %s755_s21 = sshll.u32 %s7148_s27, 4  ;;  %s7149_s4 = smov [#allocation29]   ;;  %s756_s21 = int_to_ptr.vmem [resolvable:$true] %s755_s21 }
  0xdd   : > { %s766_s7 = sshll.u32 %s7149_s4, 4  ;;  %s6953_s22 = scalar_lea.vmem %s756_s21, 16  ;;  %s767_s7 = int_to_ptr.vmem [resolvable:$true] %s766_s7 }
  0xde   : > { %p6954_p2 = scmp.ne.s32.totalorder %s756_s21, %s6953_s22  ;;  %s6960_s23 = scalar_lea.vmem %s756_s21, 32 }
  0xdf   : > { %p6961_p8 = scmp.lt.s32.totalorder %s756_s21, %s756_s21  ;;  %p6962_p9 = scmp.lt.s32.totalorder %s6960_s23, %s6953_s22 }
  0xe0   : > { %p6956_p4 = pnand %p6954_p2, %p7319_p7 }
  0xe1   : > { %p6963_p11 = por %p6962_p9, %p6961_p8 }
  0xe2   : > { %p6957_p5 = pneg %p6956_p4 }
  0xe4   : > { %p6964_p10 = pnand %p6963_p11, %p6957_p5 }
  0xe6   : > { %6967 = shalt.err (!%p6964_p10)
}
  0xe7   : > { %5985 = dma.hbm_to_vmem [thread:$0]  (!%p7311_p6), %s8321_s18, 16, %s756_s21, [#allocation27]  }
  0xe8   : > { %s6979_s5 = scalar_lea.vmem %s767_s7, 16  ;;  %s6986_s20 = scalar_lea.vmem %s767_s7, 32 }
  0xe9   : > { %p6980_p12 = scmp.ne.s32.totalorder %s767_s7, %s6979_s5  ;;  %p6987_p3 = scmp.lt.s32.totalorder %s767_s7, %s767_s7 }
  0xea   : > { %p6988_p0 = scmp.lt.s32.totalorder %s6986_s20, %s6979_s5 }
  0xeb   : > { %p6982_p13 = pnand %p6980_p12, %p7319_p7 }
  0xec   : > { %p6989_p2 = por %p6988_p0, %p6987_p3 }
  0xed   : > { %p6983_p1 = pneg %p6982_p13 }
  0xef   : > { %p6990_p4 = pnand %p6989_p2, %p6983_p1 }
  0xf1   : > { %6993 = shalt.err (!%p6990_p4)
}
  0xf2   : > { %s8374_s2 = sld [smem:[#allocation43_spill]]  ;;  %s5212_s0 = sadd.s32 4294967294, %s7122_s30  }
  0xf3   : > { %5988 = dma.hbm_to_vmem [thread:$0]  (!%p7311_p6), %s8322_s19, 16, %s767_s7, [#allocation30]  }
  0xf4   : > { %s7477_s6 = sadd.s32 1, %s7122_s30   ;;  %s80_s21 = sadd.s32 1, %s7118_s29 }
  0xf5   : > { %s77_s27 = ssub.s32 %s7122_s30, %s7477_s6  ;;  %p87_p5 = scmp.ne.s32.totalorder %s7118_s29, %s7114_s28 }
  0xf6   : > { %p78_p7 = scmp.eq.s32.totalorder %s77_s27, 0  ;;  %p88_p8 = scmp.eq.s32.totalorder %s7122_s30, 0 }
  0xf7   : > { %p93_p9 = scmp.ne.s32.totalorder %s7114_s28, %s7110_s3  ;;  %p543_p13 = scmp.eq.s32.totalorder %s5212_s0, 1 }
  0xf8   : > { %s7488_s4 = scalar_select %p78_p7, %s7118_s29, %s80_s21  }
  0xf9   : > { %p7490_p11 = por %p88_p8, %p87_p5  ;;  %p8376_p10 = scmp.eq.s32.totalorder %s8374_s2, 0 }
  0xfa   : > { %p537_p12 = scmp.eq.s32.totalorder %s8374_s2, 1  ;;  %p6014_p1 = scmp.lt.s32.totalorder %s7122_s30, 2 }
  0xfb   : > { %p7496_p6 = por %p8376_p10, %p93_p9  ;;  %s791_s23 = sand.u32 1, %s7118_s29  }
  0xfc   : > { %p7503_p3 = por %p537_p12, %p87_p5  ;;  %p7507_p0 = por %p543_p13, %p93_p9 }
  0xfd   : > { %s8377_s7 = scalar_select %p7496_p6, 1, 0 }
  0xfe   : > { %s8378_s1 = scalar_select %p7503_p3, 1, 0 }
  0xff   : > { %s8379_s26 = scalar_select %p7507_p0, 1, 0 }
 0x100   : > { %s5232_s5 = sshll.u32 %s7122_s30, 4  ;;  %s794_s20 = scalar_lea.vmem [#allocation2], %s791_s23 }
 0x101   : > { %s801_s25 = sshll.u32 %s794_s20, 4  ;;  %s8380_s21 = sld [smem:[#allocation46_spill]]  ;;  %s802_s25 = int_to_ptr.vmem [resolvable:$true] %s801_s25 }
 0x102   : > { %p7519_p2 = pnand %p6014_p1, %p7490_p11  ;;  %s792_s0 = scalar_lea.sflag [#allocation3], %s791_s23 }
 0x104   : > { %p6996_p7 = pneg %p7519_p2 }
 0x107   : > { %s7515_s8 = scalar_lea.hbm %s8380_s21, %s5232_s5  ;;  %s6999_s24 = scalar_lea.hbm %s8380_s21, 32 }
 0x108   : > { %s6994_s9 = scalar_lea.hbm %s7515_s8, 16  ;;  %p7000_p9 = scmp.lt.s32.totalorder %s7515_s8, %s8380_s21 }
 0x109   : > { %p6995_p4 = scmp.ne.s32.totalorder %s7515_s8, %s6994_s9  ;;  %p7001_p11 = scmp.lt.s32.totalorder %s6999_s24, %s6994_s9 }
 0x10b   : > { %p6997_p5 = pnand %p6996_p7, %p6995_p4  ;;  %p7002_p10 = por %p7001_p11, %p7000_p9 }
 0x10d   : > { %p6998_p8 = pneg %p6997_p5 }
 0x10f   : > { %p7003_p12 = pnand %p7002_p10, %p6998_p8 }
 0x111   : > { %7006 = shalt.err (!%p7003_p12)
}
 0x112   : > { %s7007_s22 = scalar_lea.vmem %s802_s25, 16  ;;  %s7150_s23 = smov [#allocation2]  }
 0x113   : > { %p7008_p13 = scmp.ne.s32.totalorder %s802_s25, %s7007_s22  ;;  %s7012_s11 = sshll.u32 %s7150_s23, 4  ;;  %s7013_s11 = int_to_ptr.vmem [resolvable:$false] %s7012_s11 }
 0x114   : > { %s7014_s12 = scalar_lea.vmem %s7013_s11, 32  ;;  %p7015_p4 = scmp.lt.s32.totalorder %s802_s25, %s7013_s11 }
 0x115   : > { %p7010_p1 = pnand %p7008_p13, %p6996_p7  ;;  %p7016_p5 = scmp.lt.s32.totalorder %s7014_s12, %s7007_s22 }
 0x117   : > { %p7011_p0 = pneg %p7010_p1  ;;  %p7017_p3 = por %p7016_p5, %p7015_p4 }
 0x119   : > { %p7018_p6 = pnand %p7017_p3, %p7011_p0 }
 0x11b   : > { %7021 = shalt.err (!%p7018_p6)
}
 0x11c   : > { %5992 = dma.hbm_to_vmem [thread:$0]  (!%p7519_p2), %s7515_s8, 16, %s802_s25, %s792_s0  }
 0x11d   : > { %s8382_s9 = sld [smem:[#allocation44_spill]] }
 0x123   : > { %p8383_p8 = scmp.ne.s32.totalorder %s8382_s9, 0 }
 0x124   : > { %s7540_s10 = sand.u32 (!%p8383_p8), 1, %s7114_s28   ;;  %p8384_p7 = scmp.ne.s32.totalorder (!%p8383_p8), %s8377_s7, 0 }
 0x125   : > { %810 = sbr.rel (%p8383_p8) target bundleno = 6648 (0x19f8), region = 108  ;;  %s813_s20 = scalar_lea.sflag (!%p8383_p8), [#allocation3], %s7540_s10 }
 0x126   : > { %s815_s5 = scalar_lea.vmem (!%p8383_p8), [#allocation2], %s7540_s10 }
 0x12a   : > { %7065 = dma.done.wait (%p8384_p7), %s813_s20, 16  }
 0x12b   : > { %7067 = vsyncadd (%p8384_p7), %s813_s20, 4294967280  ;;  %s8385_s11 = sld [smem:[#allocation43_spill]] }
 0x131   : > { %p8386_p6 = scmp.eq.s32.totalorder %s8385_s11, 0 }
 0x133   : > { %7069 = dma.done.wait (%p8386_p6), [#allocation6], 320   ;;  %p8387_p3 = pmov %p8386_p6 }
 0x135   : > { %7071 = vsyncadd (%p8387_p3), [#allocation6], 4294966976  ;;  %p8388_p0 = pmov %p8387_p3 }
 0x137   : > { %7073 = dma.done.wait (%p8388_p0), [#allocation9], 32   ;;  %p8389_p2 = pmov %p8388_p0 }
 0x138   : > { %p8390_p9 = pmov %p8388_p0 }
 0x139   : > { %7075 = vsyncadd (%p8389_p2), [#allocation9], 4294967264 }
 0x13a   : > { %7077 = dma.done.wait (%p8390_p9), [#allocation12], 8192   ;;  %p8391_p11 = pmov %p8388_p0 }
 0x13b   : > { %p8392_p10 = pmov %p8388_p0 }
 0x13c   : > { %7079 = vsyncadd (%p8391_p11), [#allocation12], 4294959104 }
 0x13d   : > { %7081 = dma.done.wait (%p8392_p10), [#allocation15], 64   ;;  %p8393_p12 = pmov %p8388_p0 }
 0x13e   : > { %p8394_p13 = pmov %p8388_p0 }
 0x13f   : > { %7083 = vsyncadd (%p8393_p12), [#allocation15], 4294967232 }
 0x140   : > { %7085 = dma.done.wait (%p8394_p13), [#allocation18], 8224   ;;  %p8395_p1 = pmov %p8388_p0 }
 0x141   : > { %p8396_p4 = pmov %p8388_p0 }
 0x142   : > { %7087 = vsyncadd (%p8395_p1), [#allocation18], 4294959072 }
 0x143   : > { %7089 = dma.done.wait (%p8396_p4), [#allocation21], 8320   ;;  %p8397_p5 = pmov %p8388_p0 }
 0x144   : > { %p8398_p8 = pmov %p8388_p0 }
 0x145   : > { %7091 = vsyncadd (%p8397_p5), [#allocation21], 4294958976 }
 0x146   : > { %7093 = dma.done.wait (%p8398_p8), [#allocation24], 64   ;;  %p8399_p7 = pmov %p8388_p0 }
 0x147   : > { %p8400_p6 = pmov %p8388_p0 }
 0x148   : > { %7095 = vsyncadd (%p8399_p7), [#allocation24], 4294967232 }
 0x149   : > { %7097 = dma.done.wait (%p8400_p6), [#allocation27], 48   ;;  %p8401_p3 = pmov %p8388_p0 }
 0x14b   : > { %7099 = vsyncadd (%p8401_p3), [#allocation27], 4294967248 }
 0x14c   : > { %7101 = dma.done.wait (%p8388_p0), [#allocation30], 16   ;;  %p8402_p2 = pmov %p8388_p0 }
 0x14d   : > { %p948_p9 = scmp.lt.s32.totalorder %s8385_s11, 1  ;;  %v7151_v0 = vmov 0   ;;  %v7152_v1 = vmov 0.0   ;;  %s8403_s2 = sld [smem:[#allocation45_spill]]  ;;  %v973_v16 = vlaneseq  ;;  %v956_v19 = vld [vmem:[#allocation7] sm:$0xf] }
 0x14e   : > { %7103 = vsyncadd (%p8402_p2), [#allocation30], 4294967280  ;;  %6111 = vset.pattern.permute.xlu1 %v7151_v0  ;;  %6100 = vset.pattern.permute.xlu0 %v7151_v0  ;;  %v1054_v51 = vld [vmem:[#allocation5 + $0x8] sm:$0xff]  ;;  %v1053_v52 = vld [vmem:[#allocation5] sm:$0xff]  ;;  %vm7153_vm8 = vmmov 0   ;;  %s8404_s22 = sld [smem:[#allocation52_spill]] }
 0x14f   : > { %s949_s8 = scalar_select %p948_p9, %s8385_s11, 1  ;;  %5669 = vmatprep.subr.bf16.mxu1 %v7152_v1  ;;  %1311 = vmatprep.mubr.bf16.mxu0 %v7151_v0  ;;  %v974_v17 = vshrl.u32 %v973_v16, 7  ;;  %v6152_v57 = vld [vmem:[#allocation11 + $0xac] ss:$12 sps:$4 sm:$0xff]   ;;  %v6154_v58 = vld [vmem:[#allocation11 + $0xa8] ss:$12 sps:$4 sm:$0xff]  }
 0x150   : > { %v6155_v59 = vld [vmem:[#allocation11 + $0xb0] ss:$12 sps:$4 sm:$0xff]   ;;  %1279 = vmatprep.subr.bf16.mxu0 %v6152_v57  ;;  %v6170_v16 = vld [vmem:[#allocation11 + $0x48] ss:$12 sps:$4 sm:$0xff]   ;;  %5685 = vmatprep.mubr.msk.bf16.mxu1 %vm7153_vm8, %v7152_v1  ;;  %vm1371_vm9 = vcmask 261120   ;;  %s7154_s23 = smov 96  }
 0x151   : > { %s5502_s12 = sshll.u32 %s949_s8, 4  ;;  %v7601_v18 = vsub.s32 0, %v974_v17  ;;  %v7603_v20 = vsub.s32 1, %v974_v17  ;;  %v7605_v21 = vsub.s32 2, %v974_v17  ;;  %v7608_v27 = vsub.s32 3, %v974_v17  ;;  %5670 = vmatpush3.bf16.msra.mxu1 %v6155_v59  ;;  %1280 = vmatpush1.bf16.msra.mxu0 %v6154_v58  ;;  %s7155_s9 = smov 32  }
 0x152   : > { %5671 = vmatprep.subr.bf16.mxu1 %v7152_v1  ;;  %v6171_v17 = vld [vmem:[#allocation11 + $0x50] ss:$12 sps:$4 sm:$0xff]   ;;  %s7156_s20 = smov 64   ;;  %vm1419_vm10 = vcmask 130048   ;;  %vm1880_vm11 = vcmask 523264   ;;  %vm1883_vm12 = vcmask 785408  }
 0x153   : > { %s952_s0 = scalar_lea.vmem %s8403_s2, %s5502_s12  ;;  %v976_v24 = vrot.slane %v956_v19, %v7601_v18  ;;  %v1000_v28 = vrot.slane %v956_v19, %v7603_v20  ;;  %v1024_v29 = vrot.slane %v956_v19, %v7605_v21  ;;  %v1048_v38 = vrot.slane %v956_v19, %v7608_v27  ;;  %v6172_v19 = vld [vmem:[#allocation11 + $0x34] ss:$12 sps:$4 sm:$0xff]   ;;  %s8405_s25 = sld [smem:[#allocation58_spill]] }
 0x154   : > { %v954_v2 = vld [vmem:[%s952_s0] sm:$0xff]  ;;  %v955_v3 = vld [vmem:[%s952_s0 + $0x8] sm:$0xff]  ;;  %s5251_s27 = sshll.u32 %s7540_s10, 4  ;;  %s5503_s12 = sshll.u32 %s8385_s11, 8 }
 0x155   : > { %vm1005_vm0 = vcmp.eq.s32.totalorder %v954_v2, 2  ;;  %vm1006_vm1 = vcmp.eq.s32.totalorder %v955_v3, 2  ;;  %vm957_vm2 = vcmp.eq.s32.totalorder %v954_v2, 0  ;;  %vm958_vm3 = vcmp.eq.s32.totalorder %v955_v3, 0  ;;  %s8407_s0 = sld [smem:[#allocation60_spill]]  ;;  %p8408_p10 = scmp.ne.s32.totalorder %s8378_s1, 0 }
 0x156   : > { %v5258_v4 = vsel %vm1005_vm0, 1.0, %v7152_v1  ;;  %v5259_v5 = vsel %vm1006_vm1, 1.0, %v7152_v1  ;;  %v5254_v6 = vsel %vm957_vm2, 1.0, %v7152_v1  ;;  %v5255_v7 = vsel %vm958_vm3, 1.0, %v7152_v1  ;;  %s7158_s11 = smov [#allocation31]  }
 0x157   : > { %v6112_v8 = vpack.i.bf16 %v5259_v5, %v5258_v4  ;;  %v6101_v9 = vpack.i.bf16 %v5255_v7, %v5254_v6  ;;  %vm1029_vm4 = vcmp.eq.s32.totalorder %v954_v2, 3  ;;  %vm1030_vm5 = vcmp.eq.s32.totalorder %v955_v3, 3  ;;  %v6156_v6 = vld [vmem:[#allocation11 + $0x94] ss:$12 sps:$4 sm:$0xff]   ;;  %v6158_v7 = vld [vmem:[#allocation11 + $0x90] ss:$12 sps:$4 sm:$0xff]  }
 0x158   : > { %v5260_v10 = vsel %vm1029_vm4, 1.0, %v7152_v1  ;;  %v5261_v11 = vsel %vm1030_vm5, 1.0, %v7152_v1  ;;  %vm981_vm6 = vcmp.eq.s32.totalorder %v954_v2, 1  ;;  %vm982_vm7 = vcmp.eq.s32.totalorder %v955_v3, 1  ;;  %1281 = vmatprep.subr.bf16.mxu0 %v6156_v6 }
 0x159   : > { %6113 = vperm.xlu1 %6111, %v6112_v8   ;;  %6102 = vperm.xlu0 %6100, %v6101_v9   ;;  %v6117_v12 = vpack.i.bf16 %v5261_v11, %v5260_v10  ;;  %v5256_v13 = vsel %vm981_vm6, 1.0, %v7152_v1  ;;  %v5257_v14 = vsel %vm982_vm7, 1.0, %v7152_v1  ;;  %v6159_v8 = vld [vmem:[#allocation11 + $0x98] ss:$12 sps:$4 sm:$0xff]   ;;  %v6160_v9 = vld [vmem:[#allocation11 + $0x7c] ss:$12 sps:$4 sm:$0xff]  }
 0x15a   : > { %v6106_v15 = vpack.i.bf16 %v5257_v14, %v5256_v13  ;;  %1282 = vmatpush1.bf16.msra.mxu0 %v6158_v7  ;;  %5672 = vmatpush3.bf16.msra.mxu1 %v6159_v8  ;;  %v6162_v10 = vld [vmem:[#allocation11 + $0x78] ss:$12 sps:$4 sm:$0xff]   ;;  %v6163_v11 = vld [vmem:[#allocation11 + $0x80] ss:$12 sps:$4 sm:$0xff]   ;;  %v6167_v14 = vld [vmem:[#allocation11 + $0x68] ss:$12 sps:$4 sm:$0xff]  }
 0x15b   : > { %5673 = vmatprep.subr.bf16.mxu1 %v7152_v1  ;;  %1283 = vmatprep.subr.bf16.mxu0 %v6160_v9  ;;  %v6166_v13 = vld [vmem:[#allocation11 + $0x60] ss:$12 sps:$4 sm:$0xff]   ;;  %s8260_s24 = scalar_lea.hbm %s8407_s0, %s5503_s12 }
 0x15d   : > { %6118 = vperm.xlu1 %6111, %v6117_v12   ;;  %6107 = vperm.xlu0 %6100, %v6106_v15   ;;  %v6164_v12 = vld [vmem:[#allocation11 + $0x64] ss:$12 sps:$4 sm:$0xff]   ;;  %v6168_v15 = vld [vmem:[#allocation11 + $0x4c] ss:$12 sps:$4 sm:$0xff]  }
 0x15e   : > { %1284 = vmatpush1.bf16.msra.mxu0 %v6162_v10  ;;  %5674 = vmatpush3.bf16.msra.mxu1 %v6163_v11 }
 0x15f   : > { %5675 = vmatprep.subr.bf16.mxu1 %v7152_v1  ;;  %1285 = vmatprep.subr.bf16.mxu0 %v6164_v12 }
 0x162   : > { %1286 = vmatpush1.bf16.msra.mxu0 %v6166_v13  ;;  %5676 = vmatpush3.bf16.msra.mxu1 %v6167_v14 }
 0x163   : > { %1287 = vmatprep.subr.bf16.mxu0 %v6168_v15  ;;  %5677 = vmatprep.subr.bf16.mxu1 %v7152_v1 }
 0x166   : > { %1288 = vmatpush1.bf16.msra.mxu0 %v6170_v16  ;;  %5678 = vmatpush3.bf16.msra.mxu1 %v6171_v17  ;;  %v1098_v17 = vld [vmem:[%s815_s5] sm:$0x1]  ;;  %s947_s5 = scalar_lea.vmem [#allocation31], %s5251_s27 }
 0x167   : > { %1289 = vmatprep.subr.bf16.mxu0 %v6172_v19  ;;  %5679 = vmatprep.subr.bf16.mxu1 %v7152_v1  ;;  %v5264_v19 = vadd.f32 -1.0, %v1098_v17  ;;  %s4968_s8 = sshll.u32 %s947_s5, 4  ;;  %s8255_s8 = int_to_ptr.vmem [resolvable:$true] %s4968_s8 }
 0x1d4   : > { %v6114_v22 = vpop.permute.xlu1 %6113  ;;  %v6103_v23 = vpop.permute.xlu0 %6102 }
 0x1d5   : > { %v6105_v25 = vunpack.i.h.bf16 %v6103_v23  ;;  %v6104_v26 = vunpack.i.l.bf16 %v6103_v23  ;;  %v6116_v32 = vunpack.i.h.bf16 %v6114_v22  ;;  %v6115_v33 = vunpack.i.l.bf16 %v6114_v22  ;;  %v6174_v22 = vld [vmem:[#allocation11 + $0x30] ss:$12 sps:$4 sm:$0xff]   ;;  %v6175_v23 = vld [vmem:[#allocation11 + $0x38] ss:$12 sps:$4 sm:$0xff]  }
 0x1d6   : > { %1290 = vmatpush1.bf16.msra.mxu0 %v6174_v22  ;;  %5680 = vmatpush3.bf16.msra.mxu1 %v6175_v23  ;;  %v1100_v22 = vmul.f32 1e+09, %v5264_v19 }
 0x1d7   : > { %v978_v36 = vmul.f32 %v6105_v25, %v976_v24  ;;  %v977_v37 = vmul.f32 %v6104_v26, %v976_v24  ;;  %v1026_v43 = vmul.f32 %v6116_v32, %v1024_v29  ;;  %v1025_v44 = vmul.f32 %v6115_v33, %v1024_v29  ;;  %v6176_v24 = vld [vmem:[#allocation11 + $0x1c] ss:$12 sps:$4 sm:$0xff]   ;;  %v6178_v25 = vld [vmem:[#allocation11 + $0x18] ss:$12 sps:$4 sm:$0xff]   ;;  %v6179_v26 = vld [vmem:[#allocation11 + $0x20] ss:$12 sps:$4 sm:$0xff]   ;;  %5681 = vmatprep.subr.bf16.mxu1 %v7152_v1 }
 0x1d8   : > { %v6119_v30 = vpop.permute.xlu1 %6118  ;;  %v6108_v31 = vpop.permute.xlu0 %6107  ;;  %1291 = vmatprep.subr.bf16.mxu0 %v6176_v24  ;;  %v6182_v29 = vld [vmem:[#allocation11] ss:$12 sps:$4 sm:$0xff]   ;;  %v7683_v23 = vrot.slane %v1100_v22, %v7601_v18 }
 0x1d9   : > { %v6110_v34 = vunpack.i.h.bf16 %v6108_v31  ;;  %v6109_v35 = vunpack.i.l.bf16 %v6108_v31  ;;  %v6121_v39 = vunpack.i.h.bf16 %v6119_v30  ;;  %v6120_v40 = vunpack.i.l.bf16 %v6119_v30  ;;  %v6183_v30 = vld [vmem:[#allocation11 + $0x8] ss:$12 sps:$4 sm:$0xff]  }
 0x1da   : > { %1292 = vmatpush1.bf16.msra.mxu0 %v6178_v25  ;;  %5682 = vmatpush3.bf16.msra.mxu1 %v6179_v26 }
 0x1db   : > { %v1002_v41 = vmul.f32 %v6110_v34, %v1000_v28  ;;  %v1001_v42 = vmul.f32 %v6109_v35, %v1000_v28  ;;  %v1050_v47 = vmul.f32 %v6121_v39, %v1048_v38  ;;  %v1049_v48 = vmul.f32 %v6120_v40, %v1048_v38  ;;  %v6180_v28 = vld [vmem:[#allocation11 + $0x4] ss:$12 sps:$4 sm:$0xff]   ;;  %5683 = vmatprep.subr.bf16.mxu1 %v7152_v1  ;;  %v5262_v39 = vld [vmem:[#allocation8] ss:$0 sm:$0xff] }
 0x1dc   : > { %1293 = vmatprep.subr.bf16.mxu0 %v6180_v28 }
 0x1dd   : > { %v1003_v45 = vadd.f32 %v1001_v42, %v977_v37  ;;  %v1004_v46 = vadd.f32 %v1002_v41, %v978_v36 }
 0x1de   : > { %1294 = vmatpush1.bf16.msra.mxu0 %v6182_v29  ;;  %5684 = vmatpush3.bf16.msra.mxu1 %v6183_v30 }
 0x1df   : > { %v1028_v49 = vadd.f32 %v1026_v43, %v1004_v46  ;;  %v1027_v50 = vadd.f32 %v1025_v44, %v1003_v45  ;;  %5695 = vmatprep.subr.bf16.mxu1 %v7152_v1  ;;  %5689 = vmatprep.subr.bf16.mxu0 %v7152_v1  ;;  %v5263_v43 = vld [vmem:[#allocation10] ss:$0 sm:$0xff] }
 0x1e1   : > { %v1052_v53 = vadd.f32 %v1050_v47, %v1028_v49  ;;  %v1051_v54 = vadd.f32 %v1049_v48, %v1027_v50  ;;  %v1134_v48 = vld [vmem:[%s8404_s22] sm:$0x7] }
 0x1e3   : > { %v1056_v55 = vadd.f32 %v1054_v51, %v1052_v53  ;;  %v1055_v56 = vadd.f32 %v1053_v52, %v1051_v54  ;;  %v1139_v51 = vrot.slane %v1134_v48, %v7601_v18  ;;  %v1147_v52 = vrot.slane %v1134_v48, %v7605_v21 }
 0x1e5   : > { %1061 = vadd.xlane.f32.xlu1 %v1056_v55  ;;  %1059 = vadd.xlane.f32.xlu0 %v1055_v56 }
 0x26e   : > { %v1062_v60 = vpop.xlane.xlu1 %1061  ;;  %v1060_v61 = vpop.xlane.xlu0 %1059 }
 0x26f   : > { %v1065_v62 = vmul.f32 0.0078125, %v1062_v60  ;;  %v1064_v63 = vmul.f32 0.0078125, %v1060_v61 }
 0x271   : > { %v7614_v2 = vsub.f32 %v1055_v56, %v1064_v63  ;;  %v7616_v3 = vsub.f32 %v1056_v55, %v1065_v62  ;;  %v1143_v55 = vrot.slane %v1134_v48, %v7603_v20 }
 0x273   : > { %v1068_v4 = vmul.f32 %v7614_v2, %v7614_v2  ;;  %v1069_v5 = vmul.f32 %v7616_v3, %v7616_v3 }
 0x275   : > { %1070 = vadd.xlane.f32.xlu0 %v1068_v4 }
 0x279   : > { %1072 = vadd.xlane.f32.xlu0 %v1069_v5 }
 0x2fe   : > { %v1071_v31 = vpop.xlane.xlu0 %1070 }
 0x2ff   : > { %v1074_v32 = vmul.f32 0.0078125, %v1071_v31 }
 0x301   : > { %v1076_v33 = vadd.f32 1e-05, %v1074_v32 }
 0x302   : > { %v1073_v34 = vpop.xlane.xlu0 %1072 }
 0x303   : > { %6400 = vrsqrt.f32 %v1076_v33  ;;  %v1075_v35 = vmul.f32 0.0078125, %v1073_v34 }
 0x305   : > { %v1077_v36 = vadd.f32 1e-05, %v1075_v35 }
 0x307   : > { %6402 = vrsqrt.f32 %v1077_v36 }
 0x310   : > { %v6401_v37 = vpop.eup %6400 }
 0x311   : > { %v1080_v38 = vmul.f32 %v6401_v37, %v7614_v2 }
 0x313   : > { %v1088_v42 = vmul.f32 %v5262_v39, %v1080_v38 }
 0x314   : > { %v6403_v40 = vpop.eup %6402 }
 0x315   : > { %v1081_v41 = vmul.f32 %v6403_v40, %v7616_v3  ;;  %v7634_v45 = vadd.f32 %v5263_v43, %v1088_v42 }
 0x317   : > { %v1089_v44 = vmul.f32 %v5262_v39, %v1081_v41 }
 0x319   : > { %v7636_v46 = vadd.f32 %v5263_v43, %v1089_v44 }
 0x31b   : > { %v1101_v47 = vpack.c.bf16 %v7636_v46, %v7634_v45 }
 0x31d   : > { %1312 = vmatmul.mubr.bf16.vlgmr.msra.gmra.mxu0 %v1101_v47  ;;  %5686 = vmatmul.mubr.bf16.vlgmr.msra.gmra.mxu1 %v1101_v47 }
 0x31e   : > { %5691 = vmatprep.mubr.msk.bf16.mxu0 %vm7153_vm8, %v7152_v1  ;;  %5697 = vmatprep.mubr.msk.bf16.mxu1 %vm7153_vm8, %v7152_v1 }
 0x3dd   : > { %v1313_v49 = vpop.f32.mrf.mxu0  ;;  %v1356_v50 = vpop.f32.mrf.mxu1 }
 0x3de   : > { %v1314_v58 = vadd.f32 %v1313_v49, %v1139_v51  ;;  %v1357_v59 = vadd.f32 %v1356_v50, %v1147_v52 }
 0x3df   : > { %v1315_v53 = vpop.f32.mrf.mxu0  ;;  %v5687_v54 = vpop.f32.mrf.mxu1 }
 0x3e0   : > { %v1316_v2 = vadd.f32 %v1315_v53, %v1143_v55 }
 0x3e1   : > { %v1317_v56 = vpop.f32.mrf.mxu0  ;;  %v1359_v57 = vpop.f32.mrf.mxu1 }
 0x3e2   : > { %v1318_v60 = vadd.f32 %v1317_v56, %v1139_v51  ;;  %v1360_v61 = vadd.f32 %v1359_v57, %v1147_v52 }
 0x3e3   : > { %v1319_v62 = vpop.f32.mrf.mxu0  ;;  %v5688_v63 = vpop.f32.mrf.mxu1 }
 0x3e4   : > { %v1363_v3 = vpack.c.bf16 %v1318_v60, %v1314_v58  ;;  %v7650_v4 = vpack.c.bf16 %v1360_v61, %v1357_v59  ;;  %v1320_v5 = vadd.f32 %v1319_v62, %v1143_v55 }
 0x3e6   : > { %v1364_v6 = vpack.c.bf16 %v1320_v5, %v1316_v2  ;;  %5696 = vmatpush3.bf16.msra.mxu1 %v7650_v4  ;;  %1489 = vrot.lane.b32.xlu0 %v1363_v3, %s7154_s23 }
 0x3e7   : > { %5707 = vmatprep.subr.bf16.mxu1 %v7152_v1 }
 0x3e8   : > { %1492 = vrot.lane.b32.xlu1 %v1364_v6, %s7154_s23  ;;  %v1376_v7 = vsel %vm1371_vm9, %v1364_v6, 0 }
 0x3e9   : > { %5690 = vmatpush3.bf16.xpose.msra.mxu0 %v1376_v7 }
 0x3ea   : > { %1735 = vrot.lane.b32.xlu0 %v1364_v6, %s7155_s9  ;;  %5701 = vmatprep.subr.bf16.mxu0 %v7152_v1 }
 0x3ec   : > { %1614 = vrot.lane.b32.xlu1 %v1364_v6, %s7156_s20 }
 0x3f0   : > { %1612 = vrot.lane.b32.xlu1 %v1363_v3, %s7156_s20  ;;  %5692 = vmatmul.mubr.msk.bf16.vlgmr.msra.gmra.mxu0 %vm1371_vm9, %v1363_v3 }
 0x3f1   : > { %5703 = vmatprep.mubr.msk.bf16.mxu0 %vm7153_vm8, %v7152_v1 }
 0x3f4   : > { %1733 = vrot.lane.b32.xlu1 %v1363_v3, %s7155_s9 }
 0x458   : > { %v1490_v11 = vpop.permute.xlu0 %1489 }
 0x45a   : > { %v1493_v8 = vpop.permute.xlu1 %1492 }
 0x45b   : > { %v1498_v9 = vsel %vm1371_vm9, %v1493_v8, 0 }
 0x45c   : > { %5702 = vmatpush3.bf16.xpose.msra.mxu0 %v1498_v9  ;;  %v1736_v13 = vpop.permute.xlu0 %1735 }
 0x45d   : > { %5713 = vmatprep.subr.bf16.mxu0 %v7152_v1  ;;  %v1741_v15 = vsel %vm1371_vm9, %v1736_v13, 0 }
 0x45e   : > { %v1615_v10 = vpop.permute.xlu1 %1614 }
 0x45f   : > { %v1620_v12 = vsel %vm1371_vm9, %v1615_v10, 0 }
 0x462   : > { %v1613_v14 = vpop.permute.xlu1 %1612 }
 0x463   : > { %5704 = vmatmul.mubr.msk.bf16.vlgmr.msra.gmra.mxu0 %vm1371_vm9, %v1490_v11 }
 0x464   : > { %5714 = vmatpush3.bf16.xpose.msra.mxu0 %v1620_v12  ;;  %5715 = vmatprep.mubr.msk.bf16.mxu0 %vm7153_vm8, %v7152_v1 }
 0x465   : > { %5725 = vmatprep.subr.bf16.mxu0 %v7152_v1 }
 0x466   : > { %v1734_v16 = vpop.permute.xlu1 %1733 }
 0x46b   : > { %5716 = vmatmul.mubr.msk.bf16.vlgmr.msra.gmra.mxu0 %vm1371_vm9, %v1613_v14 }
 0x46c   : > { %5726 = vmatpush3.bf16.xpose.msra.mxu0 %v1741_v15  ;;  %5727 = vmatprep.mubr.msk.bf16.mxu0 %vm7153_vm8, %v7152_v1 }
 0x46d   : > { %5737 = vmatprep.subr.bf16.mxu0 %v7152_v1 }
 0x473   : > { %5728 = vmatmul.mubr.msk.bf16.vlgmr.msra.gmra.mxu0 %vm1371_vm9, %v1734_v16 }
 0x474   : > { %5753 = vmatprep.mubr.msk.bf16.mxu0 %vm7153_vm8, %v7152_v1 }
 0x4b0   : > { %v1412_v24 = vpop.f32.mrf.mxu0 }
 0x4b1   : > { %v1413_v25 = vadd.f32 %v1412_v24, %v7683_v23 }
 0x4b2   : > { %v5693_v26 = vpop.f32.mrf.mxu0 }
 0x4b3   : > { %v1420_v28 = vsel %vm1419_vm10, %v1413_v25, -inf }
 0x4b4   : > { %1421 = vmax.xlane.f32.xlu0 %v1420_v28  ;;  %v1415_v29 = vpop.f32.mrf.mxu0 }
 0x4b5   : > { %v1416_v30 = vadd.f32 %v1415_v29, %v7683_v23 }
 0x4b6   : > { %v5694_v31 = vpop.f32.mrf.mxu0 }
 0x4b7   : > { %v1423_v32 = vsel %vm1419_vm10, %v1416_v30, -inf }
 0x4b8   : > { %1424 = vmax.xlane.f32.xlu1 %v1423_v32 }
 0x523   : > { %v1534_v33 = vpop.f32.mrf.mxu0 }
 0x524   : > { %v1535_v34 = vadd.f32 %v1534_v33, %v7683_v23 }
 0x525   : > { %v5705_v35 = vpop.f32.mrf.mxu0 }
 0x526   : > { %v1541_v36 = vsel %vm1419_vm10, %v1535_v34, -inf }
 0x527   : > { %1542 = vmax.xlane.f32.xlu0 %v1541_v36  ;;  %v1537_v37 = vpop.f32.mrf.mxu0 }
 0x528   : > { %v1538_v38 = vadd.f32 %v1537_v37, %v7683_v23 }
 0x529   : > { %v5706_v39 = vpop.f32.mrf.mxu0 }
 0x52a   : > { %v1544_v40 = vsel %vm1419_vm10, %v1538_v38, -inf }
 0x52b   : > { %1545 = vmax.xlane.f32.xlu0 %v1544_v40  ;;  %v1656_v41 = vpop.f32.mrf.mxu0 }
 0x52c   : > { %v1657_v42 = vadd.f32 %v1656_v41, %v7683_v23 }
 0x52d   : > { %v5717_v43 = vpop.f32.mrf.mxu0 }
 0x52e   : > { %v1663_v44 = vsel %vm1419_vm10, %v1657_v42, -inf }
 0x52f   : > { %1664 = vmax.xlane.f32.xlu1 %v1663_v44  ;;  %v1659_v47 = vpop.f32.mrf.mxu0 }
 0x530   : > { %v1660_v48 = vadd.f32 %v1659_v47, %v7683_v23 }
 0x531   : > { %v5718_v49 = vpop.f32.mrf.mxu0 }
 0x532   : > { %v1666_v50 = vsel %vm1419_vm10, %v1660_v48, -inf }
 0x533   : > { %1667 = vmax.xlane.f32.xlu0 %v1666_v50  ;;  %v1777_v51 = vpop.f32.mrf.mxu0 }
 0x534   : > { %v1778_v52 = vadd.f32 %v1777_v51, %v7683_v23 }
 0x535   : > { %v5729_v53 = vpop.f32.mrf.mxu0 }
 0x536   : > { %v1784_v54 = vsel %vm1419_vm10, %v1778_v52, -inf }
 0x537   : > { %1785 = vmax.xlane.f32.xlu1 %v1784_v54  ;;  %v1780_v55 = vpop.f32.mrf.mxu0 }
 0x538   : > { %v1781_v56 = vadd.f32 %v1780_v55, %v7683_v23 }
 0x539   : > { %v5730_v57 = vpop.f32.mrf.mxu0 }
 0x53a   : > { %v1787_v58 = vsel %vm1419_vm10, %v1781_v56, -inf }
 0x53b   : > { %1788 = vmax.xlane.f32.xlu0 %v1787_v58 }
 0x53d   : > { %v1422_v59 = vpop.xlane.xlu0 %1421 }
 0x53e   : > { %v1426_v60 = vsub.f32 %v1413_v25, %v1422_v59 }
 0x540   : > { %v1428_v61 = vmul.f32 1.442695, %v1426_v60 }
 0x541   : > { %v1425_v62 = vpop.xlane.xlu1 %1424 }
 0x542   : > { %6404 = vpow2.f32 %v1428_v61  ;;  %v1427_v63 = vsub.f32 %v1416_v30, %v1425_v62 }
 0x544   : > { %v1430_v2 = vmul.f32 1.442695, %v1427_v63 }
 0x546   : > { %6406 = vpow2.f32 %v1430_v2 }
 0x54f   : > { %v6405_v3 = vpop.eup %6404 }
 0x550   : > { %v1432_v5 = vsel %vm1419_vm10, %v6405_v3, 0.0 }
 0x551   : > { %1433 = vadd.xlane.f32.xlu1 %v1432_v5 }
 0x553   : > { %v6407_v6 = vpop.eup %6406 }
 0x554   : > { %v1435_v7 = vsel %vm1419_vm10, %v6407_v6, 0.0 }
 0x555   : > { %1436 = vadd.xlane.f32.xlu0 %v1435_v7 }
 0x562   : > { %1565 = vrot.lane.b32.xlu1 %v7650_v4, %s7154_s23 }
 0x5b0   : > { %v1543_v8 = vpop.xlane.xlu0 %1542 }
 0x5b1   : > { %v1547_v9 = vsub.f32 %v1535_v34, %v1543_v8 }
 0x5b3   : > { %v1549_v10 = vmul.f32 1.442695, %v1547_v9 }
 0x5b4   : > { %v1546_v11 = vpop.xlane.xlu0 %1545 }
 0x5b5   : > { %6408 = vpow2.f32 %v1549_v10  ;;  %v1548_v12 = vsub.f32 %v1538_v38, %v1546_v11 }
 0x5b7   : > { %v1551_v13 = vmul.f32 1.442695, %v1548_v12 }
 0x5b8   : > { %v1665_v14 = vpop.xlane.xlu1 %1664 }
 0x5b9   : > { %6410 = vpow2.f32 %v1551_v13  ;;  %v1669_v15 = vsub.f32 %v1657_v42, %v1665_v14 }
 0x5bb   : > { %v1671_v16 = vmul.f32 1.442695, %v1669_v15 }
 0x5bc   : > { %v1668_v17 = vpop.xlane.xlu0 %1667 }
 0x5bd   : > { %6412 = vpow2.f32 %v1671_v16  ;;  %v1670_v19 = vsub.f32 %v1660_v48, %v1668_v17 }
 0x5bf   : > { %v1673_v22 = vmul.f32 1.442695, %v1670_v19  ;;  %v6184_v19 = vld [vmem:[#allocation13 + $0x38] sm:$0xff]  }
 0x5c0   : > { %v1786_v24 = vpop.xlane.xlu1 %1785  ;;  %5738 = vmatpush3.bf16.msra.mxu0 %v6184_v19 }
 0x5c1   : > { %6414 = vpow2.f32 %v1673_v22  ;;  %v1790_v25 = vsub.f32 %v1778_v52, %v1786_v24  ;;  %v6185_v22 = vld [vmem:[#allocation13 + $0x30] sm:$0xff]   ;;  %5739 = vmatprep.subr.bf16.mxu0 %v7152_v1  ;;  %v6186_v24 = vld [vmem:[#allocation13 + $0x28] sm:$0xff]  }
 0x5c2   : > { %v6409_v26 = vpop.eup %6408 }
 0x5c3   : > { %v1792_v28 = vmul.f32 1.442695, %v1790_v25  ;;  %v1553_v29 = vsel %vm1419_vm10, %v6409_v26, 0.0  ;;  %v6187_v25 = vld [vmem:[#allocation13 + $0x20] sm:$0xff]  }
 0x5c4   : > { %1554 = vadd.xlane.f32.xlu1 %v1553_v29  ;;  %v1789_v30 = vpop.xlane.xlu0 %1788  ;;  %5740 = vmatpush3.bf16.msra.mxu0 %v6185_v22 }
 0x5c5   : > { %6416 = vpow2.f32 %v1792_v28  ;;  %v1791_v31 = vsub.f32 %v1781_v56, %v1789_v30  ;;  %5741 = vmatprep.subr.bf16.mxu0 %v7152_v1  ;;  %v6189_v30 = vld [vmem:[#allocation13 + $0x10] sm:$0xff]  }
 0x5c6   : > { %v6411_v32 = vpop.eup %6410 }
 0x5c7   : > { %v1794_v33 = vmul.f32 1.442695, %v1791_v31  ;;  %v1556_v34 = vsel %vm1419_vm10, %v6411_v32, 0.0 }
 0x5c8   : > { %1557 = vadd.xlane.f32.xlu0 %v1556_v34  ;;  %5742 = vmatpush3.bf16.msra.mxu0 %v6186_v24 }
 0x5c9   : > { %6418 = vpow2.f32 %v1794_v33  ;;  %5743 = vmatprep.subr.bf16.mxu0 %v7152_v1  ;;  %v6190_v33 = vld [vmem:[#allocation13 + $0x8] sm:$0xff]  }
 0x5ca   : > { %v6413_v35 = vpop.eup %6412 }
 0x5cb   : > { %v1675_v36 = vsel %vm1419_vm10, %v6413_v35, 0.0 }
 0x5cc   : > { %1676 = vadd.xlane.f32.xlu1 %v1675_v36  ;;  %5744 = vmatpush3.bf16.msra.mxu0 %v6187_v25  ;;  %v6200_v25 = vld [vmem:[#allocation19 + $0xc4] ss:$16 sps:$4 sm:$0xff]  }
 0x5cd   : > { %5745 = vmatprep.subr.bf16.mxu0 %v7152_v1 }
 0x5ce   : > { %v6415_v37 = vpop.eup %6414 }
 0x5cf   : > { %v1678_v38 = vsel %vm1419_vm10, %v6415_v37, 0.0 }
 0x5d0   : > { %1679 = vadd.xlane.f32.xlu0 %v1678_v38 }
 0x5d2   : > { %v6417_v39 = vpop.eup %6416 }
 0x5d3   : > { %v1796_v40 = vsel %vm1419_vm10, %v6417_v39, 0.0 }
 0x5d4   : > { %1797 = vadd.xlane.f32.xlu1 %v1796_v40 }
 0x5d6   : > { %v6419_v41 = vpop.eup %6418 }
 0x5d7   : > { %v1799_v42 = vsel %vm1419_vm10, %v6419_v41, 0.0 }
 0x5d8   : > { %1800 = vadd.xlane.f32.xlu0 %v1799_v42 }
 0x5da   : > { %v1434_v43 = vpop.xlane.xlu1 %1433 }
 0x5db   : > { %6420 = vrcp.f32 %v1434_v43 }
 0x5de   : > { %v1437_v44 = vpop.xlane.xlu0 %1436  ;;  %v1566_v52 = vpop.permute.xlu1 %1565 }
 0x5df   : > { %6422 = vrcp.f32 %v1437_v44 }
 0x5e5   : > { %1807 = vrot.lane.b32.xlu1 %v7650_v4, %s7155_s9 }
 0x5e8   : > { %v6421_v47 = vpop.eup %6420 }
 0x5e9   : > { %v1440_v49 = vmul.f32 %v6421_v47, %v6405_v3 }
 0x5ec   : > { %v6423_v48 = vpop.eup %6422 }
 0x5ed   : > { %v1441_v50 = vmul.f32 %v6423_v48, %v6407_v6 }
 0x5ee   : > { %1686 = vrot.lane.b32.xlu0 %v7650_v4, %s7156_s20 }
 0x5ef   : > { %v1442_v51 = vpack.c.bf16 %v1441_v50, %v1440_v49 }
 0x5f1   : > { %5698 = vmatmul.mubr.msk.bf16.vlgmr.msra.gmra.mxu1 %vm1419_vm10, %v1442_v51 }
 0x5f2   : > { %5708 = vmatpush3.bf16.msra.mxu1 %v1566_v52  ;;  %5709 = vmatprep.mubr.msk.bf16.mxu1 %vm7153_vm8, %v7152_v1 }
 0x5f3   : > { %5719 = vmatprep.subr.bf16.mxu1 %v7152_v1 }
 0x64d   : > { %v1555_v53 = vpop.xlane.xlu1 %1554 }
 0x64e   : > { %6424 = vrcp.f32 %v1555_v53 }
 0x651   : > { %v1558_v54 = vpop.xlane.xlu0 %1557 }
 0x652   : > { %6426 = vrcp.f32 %v1558_v54 }
 0x655   : > { %v1677_v55 = vpop.xlane.xlu1 %1676 }
 0x656   : > { %6428 = vrcp.f32 %v1677_v55 }
 0x659   : > { %v1680_v56 = vpop.xlane.xlu0 %1679 }
 0x65a   : > { %6430 = vrcp.f32 %v1680_v56 }
 0x65b   : > { %v6425_v57 = vpop.eup %6424 }
 0x65c   : > { %v1561_v59 = vmul.f32 %v6425_v57, %v6409_v26  ;;  %v6188_v26 = vld [vmem:[#allocation13 + $0x18] sm:$0xff]  }
 0x65d   : > { %v1798_v4 = vpop.xlane.xlu1 %1797  ;;  %5746 = vmatpush3.bf16.msra.mxu0 %v6188_v26  ;;  %v6203_v26 = vld [vmem:[#allocation19 + $0xcc] ss:$16 sps:$4 sm:$0xff]  }
 0x65e   : > { %6432 = vrcp.f32 %v1798_v4  ;;  %5747 = vmatprep.subr.bf16.mxu0 %v7152_v1 }
 0x65f   : > { %v6427_v58 = vpop.eup %6426 }
 0x660   : > { %v1562_v60 = vmul.f32 %v6427_v58, %v6411_v32 }
 0x661   : > { %v1801_v61 = vpop.xlane.xlu0 %1800  ;;  %v1808_v8 = vpop.permute.xlu1 %1807  ;;  %5748 = vmatpush3.bf16.msra.mxu0 %v6189_v30  ;;  %v6206_v30 = vld [vmem:[#allocation19 + $0xa4] ss:$16 sps:$4 sm:$0xff]  }
 0x662   : > { %6434 = vrcp.f32 %v1801_v61  ;;  %v1563_v62 = vpack.c.bf16 %v1562_v60, %v1561_v59  ;;  %5749 = vmatprep.subr.bf16.mxu0 %v7152_v1 }
 0x663   : > { %v6429_v63 = vpop.eup %6428 }
 0x664   : > { %5710 = vmatmul.mubr.msk.bf16.vlgmr.msra.gmra.mxu1 %vm1419_vm10, %v1563_v62  ;;  %v1683_v5 = vmul.f32 %v6429_v63, %v6413_v35  ;;  %v5297_v63 = vld [vmem:[#allocation14] ss:$0 sm:$0xff] }
 0x665   : > { %v1687_v2 = vpop.permute.xlu0 %1686  ;;  %5721 = vmatprep.mubr.msk.bf16.mxu1 %vm7153_vm8, %v7152_v1  ;;  %5750 = vmatpush3.bf16.msra.mxu0 %v6190_v33  ;;  %v6207_v33 = vld [vmem:[#allocation19 + $0xa8] ss:$16 sps:$4 sm:$0xff]  }
 0x666   : > { %5720 = vmatpush3.bf16.msra.mxu1 %v1687_v2  ;;  %5751 = vmatprep.subr.bf16.mxu0 %v7152_v1 }
 0x667   : > { %v6431_v3 = vpop.eup %6430  ;;  %5731 = vmatprep.subr.bf16.mxu1 %v7152_v1 }
 0x668   : > { %v1684_v6 = vmul.f32 %v6431_v3, %v6415_v37  ;;  %v6191_v37 = vld [vmem:[#allocation13] sm:$0xff]  }
 0x669   : > { %5752 = vmatpush3.bf16.msra.mxu0 %v6191_v37  ;;  %v6215_v37 = vld [vmem:[#allocation19 + $0x8c] ss:$16 sps:$4 sm:$0xff]  }
 0x66a   : > { %v1685_v7 = vpack.c.bf16 %v1684_v6, %v1683_v5 }
 0x66b   : > { %v6433_v9 = vpop.eup %6432 }
 0x66c   : > { %5722 = vmatmul.mubr.msk.bf16.vlgmr.msra.gmra.mxu1 %vm1419_vm10, %v1685_v7  ;;  %v1804_v11 = vmul.f32 %v6433_v9, %v6417_v39 }
 0x66d   : > { %5732 = vmatpush3.bf16.msra.mxu1 %v1808_v8  ;;  %5733 = vmatprep.mubr.msk.bf16.mxu1 %vm7153_vm8, %v7152_v1 }
 0x66f   : > { %v6435_v10 = vpop.eup %6434 }
 0x670   : > { %v1805_v12 = vmul.f32 %v6435_v10, %v6419_v41 }
 0x672   : > { %v1806_v13 = vpack.c.bf16 %v1805_v12, %v1804_v11  ;;  %v6192_v11 = vld [vmem:[#allocation19 + $0xe0] ss:$16 sps:$4 sm:$0xff]   ;;  %v6194_v12 = vld [vmem:[#allocation19 + $0xe4] ss:$16 sps:$4 sm:$0xff]  }
 0x673   : > { %2256 = vmatprep.subr.bf16.mxu1 %v6194_v12  ;;  %v6241_v12 = vld [vmem:[#allocation22 + $0xf8] sm:$0xff]  }
 0x674   : > { %5734 = vmatmul.mubr.msk.bf16.vlgmr.msra.gmra.mxu1 %vm1419_vm10, %v1806_v13  ;;  %v6195_v13 = vld [vmem:[#allocation19 + $0xe8] ss:$16 sps:$4 sm:$0xff]  }
 0x675   : > { %2288 = vmatprep.mubr.bf16.mxu1 %v7151_v0  ;;  %2257 = vmatpush1.bf16.msra.mxu1 %v6192_v11  ;;  %v6240_v11 = vld [vmem:[#allocation22 + $0x78] sm:$0xff]  }
 0x676   : > { %2258 = vmatprep.subr.bf16.mxu1 %v6200_v25  ;;  %v6252_v25 = vld [vmem:[#allocation22 + $0x60] sm:$0xff]  }
 0x6b1   : > { %v1481_v14 = vpop.f32.mrf.mxu1 }
 0x6b3   : > { %v5699_v15 = vpop.f32.mrf.mxu1 }
 0x6b5   : > { %v1484_v16 = vpop.f32.mrf.mxu1 }
 0x6b7   : > { %v5700_v17 = vpop.f32.mrf.mxu1 }
 0x724   : > { %v1605_v28 = vpop.f32.mrf.mxu1 }
 0x726   : > { %v5711_v29 = vpop.f32.mrf.mxu1 }
 0x727   : > { %v6201_v29 = vld [vmem:[#allocation19 + $0xc8] ss:$16 sps:$4 sm:$0xff]  }
 0x728   : > { %v1608_v31 = vpop.f32.mrf.mxu1 }
 0x729   : > { %v6122_v32 = vpack.i.bf16 %v1608_v31, %v1605_v28  ;;  %v6198_v28 = vld [vmem:[#allocation19 + $0xc0] ss:$16 sps:$4 sm:$0xff]   ;;  %v6209_v31 = vld [vmem:[#allocation19 + $0xac] ss:$16 sps:$4 sm:$0xff]  }
 0x72a   : > { %v5712_v34 = vpop.f32.mrf.mxu1  ;;  %2259 = vmatpush1.bf16.msra.mxu1 %v6198_v28  ;;  %v6254_v28 = vld [vmem:[#allocation22 + $0x20] sm:$0xff]  }
 0x72b   : > { %6123 = vrot.lane.b32.xlu1 %v6122_v32, %s7155_s9  ;;  %v6204_v32 = vld [vmem:[#allocation19 + $0xa0] ss:$16 sps:$4 sm:$0xff]   ;;  %2260 = vmatprep.subr.bf16.mxu1 %v6206_v30 }
 0x72c   : > { %v1726_v35 = vpop.f32.mrf.mxu1  ;;  %v6210_v34 = vld [vmem:[#allocation19 + $0x80] ss:$16 sps:$4 sm:$0xff]  }
 0x72d   : > { %v6256_v30 = vld [vmem:[#allocation22 + $0x58] sm:$0xff]  }
 0x72e   : > { %v5723_v36 = vpop.f32.mrf.mxu1  ;;  %2261 = vmatpush1.bf16.msra.mxu1 %v6204_v32  ;;  %v6258_v32 = vld [vmem:[#allocation22 + $0x18] sm:$0xff]  }
 0x72f   : > { %v6213_v36 = vld [vmem:[#allocation19 + $0x88] ss:$16 sps:$4 sm:$0xff]  }
 0x730   : > { %v1729_v38 = vpop.f32.mrf.mxu1 }
 0x731   : > { %v6127_v39 = vpack.i.bf16 %v1729_v38, %v1726_v35  ;;  %v6212_v35 = vld [vmem:[#allocation19 + $0x84] ss:$16 sps:$4 sm:$0xff]  }
 0x732   : > { %v5724_v40 = vpop.f32.mrf.mxu1  ;;  %v6218_v38 = vld [vmem:[#allocation19 + $0x64] ss:$16 sps:$4 sm:$0xff]   ;;  %2262 = vmatprep.subr.bf16.mxu1 %v6212_v35  ;;  %v6261_v35 = vld [vmem:[#allocation22 + $0xd0] sm:$0xff]  }
 0x733   : > { %6128 = vrot.lane.b32.xlu0 %v6127_v39, %s7156_s20  ;;  %v6221_v39 = vld [vmem:[#allocation19 + $0x6c] ss:$16 sps:$4 sm:$0xff]   ;;  %2263 = vmatpush1.bf16.msra.mxu1 %v6210_v34  ;;  %v6216_v40 = vld [vmem:[#allocation19 + $0x60] ss:$16 sps:$4 sm:$0xff]  }
 0x734   : > { %v1847_v41 = vpop.f32.mrf.mxu1  ;;  %2264 = vmatprep.subr.bf16.mxu1 %v6218_v38  ;;  %v6260_v34 = vld [vmem:[#allocation22 + $0x50] sm:$0xff]   ;;  %v6264_v38 = vld [vmem:[#allocation22 + $0x48] sm:$0xff]  }
 0x736   : > { %v5735_v42 = vpop.f32.mrf.mxu1 }
 0x737   : > { %v6224_v42 = vld [vmem:[#allocation19 + $0x44] ss:$16 sps:$4 sm:$0xff]   ;;  %2265 = vmatpush1.bf16.msra.mxu1 %v6216_v40 }
 0x738   : > { %v1850_v43 = vpop.f32.mrf.mxu1  ;;  %2266 = vmatprep.subr.bf16.mxu1 %v6224_v42  ;;  %v6266_v40 = vld [vmem:[#allocation22 + $0x8] sm:$0xff]   ;;  %v6268_v42 = vld [vmem:[#allocation22 + $0x40] sm:$0xff]  }
 0x739   : > { %v6132_v44 = vpack.i.bf16 %v1850_v43, %v1847_v41  ;;  %v6219_v41 = vld [vmem:[#allocation19 + $0x68] ss:$16 sps:$4 sm:$0xff]   ;;  %v6227_v43 = vld [vmem:[#allocation19 + $0x4c] ss:$16 sps:$4 sm:$0xff]  }
 0x73a   : > { %v5736_v47 = vpop.f32.mrf.mxu1 }
 0x73b   : > { %6133 = vrot.lane.b32.xlu1 %v6132_v44, %s7154_s23  ;;  %v6222_v44 = vld [vmem:[#allocation19 + $0x40] ss:$16 sps:$4 sm:$0xff]   ;;  %v6225_v47 = vld [vmem:[#allocation19 + $0x48] ss:$16 sps:$4 sm:$0xff]  }
 0x73c   : > { %2267 = vmatpush1.bf16.msra.mxu1 %v6222_v44  ;;  %v6270_v44 = vld [vmem:[#allocation22] sm:$0xff]  }
 0x79d   : > { %v6124_v48 = vpop.permute.xlu1 %6123 }
 0x79e   : > { %v6126_v50 = vunpack.i.h.bf16 %v6124_v48  ;;  %v6125_v51 = vunpack.i.l.bf16 %v6124_v48  ;;  %v6230_v48 = vld [vmem:[#allocation19 + $0x24] ss:$16 sps:$4 sm:$0xff]  }
 0x79f   : > { %2268 = vmatprep.subr.bf16.mxu1 %v6230_v48  ;;  %v2074_v48 = vld [vmem:[#allocation20] sm:$0xf] }
 0x7a0   : > { %v1879_v55 = vsel %vm1371_vm9, %v1484_v16, %v6126_v50  ;;  %v1878_v56 = vsel %vm1371_vm9, %v1481_v14, %v6125_v51  ;;  %v6197_v14 = vld [vmem:[#allocation19 + $0xec] ss:$16 sps:$4 sm:$0xff]   ;;  %v6228_v50 = vld [vmem:[#allocation19 + $0x20] ss:$16 sps:$4 sm:$0xff]   ;;  %v6231_v51 = vld [vmem:[#allocation19 + $0x28] ss:$16 sps:$4 sm:$0xff]  }
 0x7a1   : > { %2299 = vmatprep.subr.bf16.mxu0 %v6197_v14  ;;  %2269 = vmatpush1.bf16.msra.mxu1 %v6228_v50  ;;  %v6243_v14 = vld [vmem:[#allocation22 + $0xb8] sm:$0xff]   ;;  %v2087_v50 = vrot.slane %v2074_v48, %v7605_v21 }
 0x7a5   : > { %v6129_v49 = vpop.permute.xlu0 %6128 }
 0x7a6   : > { %v6131_v52 = vunpack.i.h.bf16 %v6129_v49  ;;  %v6130_v53 = vunpack.i.l.bf16 %v6129_v49  ;;  %v6233_v49 = vld [vmem:[#allocation19 + $0x2c] ss:$16 sps:$4 sm:$0xff]  }
 0x7a8   : > { %v1882_v58 = vsel %vm1880_vm11, %v1879_v55, %v6131_v52  ;;  %v1881_v59 = vsel %vm1880_vm11, %v1878_v56, %v6130_v53  ;;  %v6236_v52 = vld [vmem:[#allocation19 + $0x4] ss:$16 sps:$4 sm:$0xff]   ;;  %v6239_v53 = vld [vmem:[#allocation19 + $0xc] ss:$16 sps:$4 sm:$0xff]   ;;  %v6237_v55 = vld [vmem:[#allocation19 + $0x8] ss:$16 sps:$4 sm:$0xff]  }
 0x7a9   : > { %2270 = vmatprep.subr.bf16.mxu1 %v6236_v52 }
 0x7ad   : > { %v6134_v54 = vpop.permute.xlu1 %6133 }
 0x7ae   : > { %v6136_v57 = vunpack.i.h.bf16 %v6134_v54  ;;  %v6135_v4 = vunpack.i.l.bf16 %v6134_v54  ;;  %v6234_v54 = vld [vmem:[#allocation19] ss:$16 sps:$4 sm:$0xff]  }
 0x7af   : > { %2271 = vmatpush1.bf16.msra.mxu1 %v6234_v54  ;;  %v2091_v54 = vrot.slane %v2074_v48, %v7608_v27 }
 0x7b0   : > { %v1885_v60 = vsel %vm1883_vm12, %v1882_v58, %v6136_v57  ;;  %v1884_v61 = vsel %vm1883_vm12, %v1881_v59, %v6135_v4  ;;  %5538 = vmatprep.subr.bf16.mxu1 %v6240_v11 }
 0x7b1   : > { %v1886_v62 = vpack.c.bf16 %v1885_v60, %v1884_v61 }
 0x7b3   : > { %5754 = vmatmul.mubr.bf16.vlgmr.msra.gmra.mxu0 %v1886_v62 }
 0x7b4   : > { %2331 = vmatprep.mubr.bf16.mxu0 %v7151_v0  ;;  %2300 = vmatpush1.bf16.msra.mxu0 %v6195_v13  ;;  %v6242_v13 = vld [vmem:[#allocation22 + $0x38] sm:$0xff]  }
 0x7b5   : > { %2301 = vmatprep.subr.bf16.mxu0 %v6203_v26  ;;  %v6253_v26 = vld [vmem:[#allocation22 + $0xe0] sm:$0xff]  }
 0x7b8   : > { %2302 = vmatpush1.bf16.msra.mxu0 %v6201_v29  ;;  %v6255_v29 = vld [vmem:[#allocation22 + $0xa0] sm:$0xff]  }
 0x7b9   : > { %2303 = vmatprep.subr.bf16.mxu0 %v6209_v31  ;;  %v6257_v31 = vld [vmem:[#allocation22 + $0xd8] sm:$0xff]  }
 0x7bc   : > { %2304 = vmatpush1.bf16.msra.mxu0 %v6207_v33  ;;  %v6259_v33 = vld [vmem:[#allocation22 + $0x98] sm:$0xff]  }
 0x7bd   : > { %2305 = vmatprep.subr.bf16.mxu0 %v6215_v37  ;;  %v6263_v37 = vld [vmem:[#allocation22 + $0x90] sm:$0xff]  }
 0x7c0   : > { %2306 = vmatpush1.bf16.msra.mxu0 %v6213_v36  ;;  %v6262_v36 = vld [vmem:[#allocation22 + $0x10] sm:$0xff]  }
 0x7c1   : > { %2307 = vmatprep.subr.bf16.mxu0 %v6221_v39  ;;  %v6265_v39 = vld [vmem:[#allocation22 + $0xc8] sm:$0xff]  }
 0x7c4   : > { %2308 = vmatpush1.bf16.msra.mxu0 %v6219_v41  ;;  %v6267_v41 = vld [vmem:[#allocation22 + $0x88] sm:$0xff]  }
 0x7c5   : > { %2309 = vmatprep.subr.bf16.mxu0 %v6227_v43  ;;  %v6269_v43 = vld [vmem:[#allocation22 + $0xc0] sm:$0xff]  }
 0x7c8   : > { %2310 = vmatpush1.bf16.msra.mxu0 %v6225_v47  ;;  %v6271_v47 = vld [vmem:[#allocation22 + $0x80] sm:$0xff]  }
 0x7c9   : > { %2311 = vmatprep.subr.bf16.mxu0 %v6233_v49  ;;  %v2079_v49 = vrot.slane %v2074_v48, %v7601_v18 }
 0x7cc   : > { %2312 = vmatpush1.bf16.msra.mxu0 %v6231_v51 }
 0x7cd   : > { %2313 = vmatprep.subr.bf16.mxu0 %v6239_v53  ;;  %v2083_v53 = vrot.slane %v2074_v48, %v7603_v20 }
 0x7d0   : > { %2314 = vmatpush1.bf16.msra.mxu0 %v6237_v55 }
 0x7d1   : > { %5560 = vmatprep.subr.bf16.mxu0 %v6241_v12 }
 0x873   : > { %v1992_v2 = vpop.f32.mrf.mxu0 }
 0x874   : > { %v1993_v3 = vadd.f32 %v5297_v63, %v1992_v2 }
 0x875   : > { %v5755_v5 = vpop.f32.mrf.mxu0 }
 0x876   : > { %v1999_v6 = vadd.f32 %v1993_v3, %v7634_v45 }
 0x877   : > { %v1995_v7 = vpop.f32.mrf.mxu0 }
 0x878   : > { %v1996_v8 = vadd.f32 %v5297_v63, %v1995_v7  ;;  %2003 = vadd.xlane.f32.xlu0 %v1999_v6  ;;  %v5306_v63 = vld [vmem:[#allocation16] ss:$0 sm:$0xff] }
 0x879   : > { %v5756_v9 = vpop.f32.mrf.mxu0 }
 0x87a   : > { %v2000_v10 = vadd.f32 %v1996_v8, %v7636_v46 }
 0x87c   : > { %2005 = vadd.xlane.f32.xlu1 %v2000_v10 }
 0x901   : > { %v2004_v15 = vpop.xlane.xlu0 %2003 }
 0x902   : > { %v2007_v16 = vmul.f32 0.0078125, %v2004_v15  ;;  %v6244_v15 = vld [vmem:[#allocation22 + $0x70] sm:$0xff]  }
 0x904   : > { %v7747_v17 = vsub.f32 %v1999_v6, %v2007_v16  ;;  %v5307_v6 = vld [vmem:[#allocation17] ss:$0 sm:$0xff] }
 0x905   : > { %v2006_v45 = vpop.xlane.xlu1 %2005  ;;  %v6245_v16 = vld [vmem:[#allocation22 + $0xf0] sm:$0xff]  }
 0x906   : > { %v2008_v19 = vmul.f32 0.0078125, %v2006_v45  ;;  %v2011_v22 = vmul.f32 %v7747_v17, %v7747_v17  ;;  %v6247_v45 = vld [vmem:[#allocation22 + $0xb0] sm:$0xff]  }
 0x908   : > { %v7751_v24 = vsub.f32 %v2000_v10, %v2008_v19  ;;  %2013 = vadd.xlane.f32.xlu0 %v2011_v22  ;;  %v6248_v19 = vld [vmem:[#allocation22 + $0x68] sm:$0xff]  }
 0x909   : > { %v6249_v22 = vld [vmem:[#allocation22 + $0xe8] sm:$0xff]  }
 0x90a   : > { %v2012_v46 = vmul.f32 %v7751_v24, %v7751_v24 }
 0x90c   : > { %2015 = vadd.xlane.f32.xlu0 %v2012_v46  ;;  %v6251_v46 = vld [vmem:[#allocation22 + $0xa8] sm:$0xff]  }
 0x991   : > { %v2014_v56 = vpop.xlane.xlu0 %2013 }
 0x992   : > { %v2017_v57 = vmul.f32 0.0078125, %v2014_v56 }
 0x994   : > { %v2019_v4 = vadd.f32 1e-05, %v2017_v57 }
 0x995   : > { %v2016_v58 = vpop.xlane.xlu0 %2015 }
 0x996   : > { %6436 = vrsqrt.f32 %v2019_v4  ;;  %v2018_v59 = vmul.f32 0.0078125, %v2016_v58 }
 0x998   : > { %v2020_v60 = vadd.f32 1e-05, %v2018_v59 }
 0x99a   : > { %6438 = vrsqrt.f32 %v2020_v60 }
 0x9a3   : > { %v6437_v61 = vpop.eup %6436 }
 0x9a4   : > { %v2023_v62 = vmul.f32 %v6437_v61, %v7747_v17  ;;  %v6246_v17 = vld [vmem:[#allocation22 + $0x30] sm:$0xff]  }
 0x9a6   : > { %v2031_v5 = vmul.f32 %v5306_v63, %v2023_v62 }
 0x9a7   : > { %v6439_v2 = vpop.eup %6438 }
 0x9a8   : > { %v2024_v3 = vmul.f32 %v6439_v2, %v7751_v24  ;;  %v7757_v8 = vadd.f32 %v5307_v6, %v2031_v5  ;;  %v6250_v24 = vld [vmem:[#allocation22 + $0x28] sm:$0xff]  }
 0x9aa   : > { %v2032_v7 = vmul.f32 %v5306_v63, %v2024_v3 }
 0x9ac   : > { %v7759_v9 = vadd.f32 %v5307_v6, %v2032_v7 }
 0x9ae   : > { %v2041_v10 = vpack.c.bf16 %v7759_v9, %v7757_v8 }
 0x9b0   : > { %2289 = vmatmul.mubr.bf16.vlgmr.msra.gmra.mxu1 %v2041_v10  ;;  %2332 = vmatmul.mubr.bf16.vlgmr.msra.gmra.mxu0 %v2041_v10 }
 0x9b1   : > { %5539 = vmatpush3.bf16.msra.mxu1 %v6242_v13  ;;  %5561 = vmatpush3.bf16.msra.mxu0 %v6243_v14 }
 0x9b2   : > { %5540 = vmatprep.subr.bf16.mxu1 %v6244_v15  ;;  %5562 = vmatprep.subr.bf16.mxu0 %v6245_v16 }
 0x9b5   : > { %5541 = vmatpush3.bf16.msra.mxu1 %v6246_v17  ;;  %5563 = vmatpush3.bf16.msra.mxu0 %v6247_v45 }
 0x9b6   : > { %5542 = vmatprep.subr.bf16.mxu1 %v6248_v19  ;;  %5564 = vmatprep.subr.bf16.mxu0 %v6249_v22 }
 0x9b9   : > { %5543 = vmatpush3.bf16.msra.mxu1 %v6250_v24  ;;  %5565 = vmatpush3.bf16.msra.mxu0 %v6251_v46 }
 0x9ba   : > { %5544 = vmatprep.subr.bf16.mxu1 %v6252_v25  ;;  %5566 = vmatprep.subr.bf16.mxu0 %v6253_v26 }
 0x9bd   : > { %5545 = vmatpush3.bf16.msra.mxu1 %v6254_v28  ;;  %5567 = vmatpush3.bf16.msra.mxu0 %v6255_v29 }
 0x9be   : > { %5546 = vmatprep.subr.bf16.mxu1 %v6256_v30  ;;  %5568 = vmatprep.subr.bf16.mxu0 %v6257_v31 }
 0x9c1   : > { %5547 = vmatpush3.bf16.msra.mxu1 %v6258_v32  ;;  %5569 = vmatpush3.bf16.msra.mxu0 %v6259_v33 }
 0x9c2   : > { %5548 = vmatprep.subr.bf16.mxu1 %v6260_v34  ;;  %5570 = vmatprep.subr.bf16.mxu0 %v6261_v35 }
 0x9c5   : > { %5549 = vmatpush3.bf16.msra.mxu1 %v6262_v36  ;;  %5571 = vmatpush3.bf16.msra.mxu0 %v6263_v37 }
 0x9c6   : > { %5550 = vmatprep.subr.bf16.mxu1 %v6264_v38  ;;  %5572 = vmatprep.subr.bf16.mxu0 %v6265_v39 }
 0x9c9   : > { %5551 = vmatpush3.bf16.msra.mxu1 %v6266_v40  ;;  %5573 = vmatpush3.bf16.msra.mxu0 %v6267_v41 }
 0x9ca   : > { %5552 = vmatprep.subr.bf16.mxu1 %v6268_v42  ;;  %5574 = vmatprep.subr.bf16.mxu0 %v6269_v43 }
 0x9cd   : > { %5553 = vmatpush3.bf16.msra.mxu1 %v6270_v44  ;;  %5575 = vmatpush3.bf16.msra.mxu0 %v6271_v47 }
 0x9ce   : > { %5757 = vmatprep.subr.bf16.mxu0 %v7152_v1 }
 0xa70   : > { %v2290_v51 = vpop.f32.mrf.mxu1  ;;  %v2333_v52 = vpop.f32.mrf.mxu0 }
 0xa71   : > { %v7768_v55 = vadd.f32 %v2290_v51, %v2079_v49  ;;  %v7770_v56 = vadd.f32 %v2333_v52, %v2087_v50 }
 0xa72   : > { %v2292_v57 = vpop.f32.mrf.mxu1  ;;  %v2335_v4 = vpop.f32.mrf.mxu0 }
 0xa73   : > { %v7773_v58 = vmul.f32 0.70710677, %v7768_v55  ;;  %v7776_v59 = vmul.f32 0.70710677, %v7770_v56  ;;  %v7778_v60 = vadd.f32 %v2292_v57, %v2083_v53  ;;  %v7780_v61 = vadd.f32 %v2335_v4, %v2091_v54 }
 0xa74   : > { %v2294_v3 = vpop.f32.mrf.mxu1  ;;  %v2337_v14 = vpop.f32.mrf.mxu0 }
 0xa75   : > { %v2374_v62 = vand.u32 2147483647, %v7773_v58  ;;  %v7784_v63 = vand.u32 2147483647, %v7776_v59  ;;  %v7787_v2 = vmul.f32 0.70710677, %v7778_v60  ;;  %v7795_v45 = vadd.f32 %v2294_v3, %v2079_v49 }
 0xa76   : > { %v7792_v10 = vmul.f32 0.70710677, %v7780_v61  ;;  %v2296_v15 = vpop.f32.mrf.mxu1  ;;  %v7797_v19 = vadd.f32 %v2337_v14, %v2087_v50  ;;  %v2339_v30 = vpop.f32.mrf.mxu0  ;;  %vm2358_vm13 = vcmp.ge.f32.partialorder %v7773_v58, 0.0  ;;  %vm2360_vm15 = vcmp.ge.f32.partialorder %v7776_v59, 0.0 }
 0xa77   : > { %v2382_v5 = vmul.f32 0.3275911, %v2374_v62  ;;  %v2384_v6 = vmul.f32 0.3275911, %v7784_v63  ;;  %v2375_v7 = vand.u32 2147483647, %v7787_v2  ;;  %v7799_v22 = vadd.f32 %v2296_v15, %v2083_v53 }
 0xa78   : > { %v2377_v17 = vand.u32 2147483647, %v7792_v10  ;;  %v7802_v46 = vmul.f32 0.70710677, %v7795_v45  ;;  %v7805_v26 = vmul.f32 0.70710677, %v7797_v19  ;;  %v7813_v34 = vadd.f32 %v2339_v30, %v2091_v54 }
 0xa79   : > { %v2390_v11 = vadd.f32 1.0, %v2382_v5  ;;  %v2392_v12 = vadd.f32 1.0, %v2384_v6  ;;  %v2383_v13 = vmul.f32 0.3275911, %v2375_v7  ;;  %v7809_v29 = vmul.f32 0.70710677, %v7799_v22 }
 0xa7a   : > { %v2385_v24 = vmul.f32 0.3275911, %v2377_v17  ;;  %v2378_v28 = vand.u32 2147483647, %v7802_v46  ;;  %v2380_v32 = vand.u32 2147483647, %v7805_v26 }
 0xa7b   : > { %6440 = vrcp.f32 %v2390_v11  ;;  %v2391_v16 = vadd.f32 1.0, %v2383_v13  ;;  %v2379_v33 = vand.u32 2147483647, %v7809_v29  ;;  %v2486_v40 = vsub.f32 0.0, %v2374_v62 }
 0xa7c   : > { %6442 = vrcp.f32 %v2392_v12  ;;  %v2393_v25 = vadd.f32 1.0, %v2385_v24  ;;  %v2386_v31 = vmul.f32 0.3275911, %v2378_v28  ;;  %v2388_v36 = vmul.f32 0.3275911, %v2380_v32 }
 0xa7d   : > { %6444 = vrcp.f32 %v2391_v16  ;;  %v2387_v37 = vmul.f32 0.3275911, %v2379_v33  ;;  %v7818_v42 = vmul.f32 0.70710677, %v7813_v34  ;;  %v2487_v48 = vsub.f32 0.0, %v2375_v7 }
 0xa7e   : > { %6446 = vrcp.f32 %v2393_v25  ;;  %v2394_v35 = vadd.f32 1.0, %v2386_v31  ;;  %v2396_v38 = vadd.f32 1.0, %v2388_v36  ;;  %v2490_v50 = vsub.f32 0.0, %v2378_v28 }
 0xa7f   : > { %v2395_v41 = vadd.f32 1.0, %v2387_v37  ;;  %v7825_v51 = vand.u32 2147483647, %v7818_v42  ;;  %v2494_v53 = vmul.f32 %v2486_v40, %v2374_v62  ;;  %v2488_v6 = vsub.f32 0.0, %v7784_v63 }
 0xa80   : > { %6448 = vrcp.f32 %v2394_v35  ;;  %v2495_v11 = vmul.f32 %v2487_v48, %v2375_v7  ;;  %v2489_v12 = vsub.f32 0.0, %v2377_v17  ;;  %v2498_v16 = vmul.f32 %v2490_v50, %v2378_v28 }
 0xa81   : > { %6450 = vrcp.f32 %v2396_v38  ;;  %v2389_v3 = vmul.f32 0.3275911, %v7825_v51  ;;  %v2502_v24 = vmul.f32 1.442695, %v2494_v53  ;;  %v2492_v30 = vsub.f32 0.0, %v2380_v32 }
 0xa82   : > { %6452 = vrcp.f32 %v2395_v41  ;;  %v2491_v31 = vsub.f32 0.0, %v2379_v33  ;;  %v2496_v7 = vmul.f32 %v2488_v6, %v7784_v63  ;;  %v2504_v38 = vmul.f32 1.442695, %v2495_v11 }
 0xa83   : > { %v2397_v62 = vadd.f32 1.0, %v2389_v3  ;;  %v2497_v41 = vmul.f32 %v2489_v12, %v2377_v17  ;;  %v2493_v12 = vsub.f32 0.0, %v7825_v51  ;;  %vm2359_vm14 = vcmp.ge.f32.partialorder %v7787_v2, 0.0 }
 0xa84   : > { %v2499_v50 = vmul.f32 %v2491_v31, %v2379_v33  ;;  %v2506_v63 = vmul.f32 1.442695, %v2496_v7  ;;  %vm2362_vm0 = vcmp.ge.f32.partialorder %v7802_v46, 0.0  ;;  %vm2361_vm1 = vcmp.ge.f32.partialorder %v7792_v10, 0.0 }
 0xa85   : > { %6454 = vrcp.f32 %v2397_v62  ;;  %v2508_v17 = vmul.f32 1.442695, %v2497_v41  ;;  %v2501_v7 = vmul.f32 %v2493_v12, %v7825_v51  ;;  %vm2364_vm2 = vcmp.ge.f32.partialorder %v7805_v26, 0.0 }
 0xa86   : > { %6456 = vpow2.f32 %v2502_v24  ;;  %vm2363_vm3 = vcmp.ge.f32.partialorder %v7809_v29, 0.0  ;;  %vm2365_vm4 = vcmp.ge.f32.partialorder %v7818_v42, 0.0 }
 0xa87   : > { %6458 = vpow2.f32 %v2504_v38 }
 0xa88   : > { %v7815_v39 = vpop.eup %6440 }
 0xa89   : > { %v7820_v43 = vpop.eup %6442  ;;  %v2414_v44 = vmul.f32 1.0614054, %v7815_v39 }
 0xa8a   : > { %v2416_v47 = vmul.f32 1.0614054, %v7820_v43  ;;  %v7827_v52 = vpop.eup %6444 }
 0xa8b   : > { %v2422_v49 = vadd.f32 -1.4531521, %v2414_v44  ;;  %v2415_v4 = vmul.f32 1.0614054, %v7827_v52  ;;  %v7834_v13 = vpop.eup %6446 }
 0xa8c   : > { %v2424_v54 = vadd.f32 -1.4531521, %v2416_v47  ;;  %v2417_v25 = vmul.f32 1.0614054, %v7834_v13  ;;  %v2510_v47 = vmul.f32 1.442695, %v2498_v16 }
 0xa8d   : > { %v2430_v57 = vmul.f32 %v7815_v39, %v2422_v49  ;;  %v2423_v15 = vadd.f32 -1.4531521, %v2415_v4  ;;  %v7840_v28 = vpop.eup %6448  ;;  %v2500_v49 = vmul.f32 %v2492_v30, %v2380_v32 }
 0xa8e   : > { %v2432_v5 = vmul.f32 %v7820_v43, %v2424_v54  ;;  %v2425_v40 = vadd.f32 -1.4531521, %v2417_v25  ;;  %v2418_v4 = vmul.f32 1.0614054, %v7840_v28  ;;  %6460 = vpow2.f32 %v2510_v47 }
 0xa8f   : > { %v2438_v14 = vadd.f32 1.4214138, %v2430_v57  ;;  %v2431_v37 = vmul.f32 %v7827_v52, %v2423_v15  ;;  %v2512_v15 = vmul.f32 1.442695, %v2499_v50  ;;  %6462 = vpow2.f32 %v2506_v63 }
 0xa90   : > { %v2440_v36 = vadd.f32 1.4214138, %v2432_v5  ;;  %v2433_v48 = vmul.f32 %v7834_v13, %v2425_v40  ;;  %v7846_v5 = vpop.eup %6450  ;;  %v2426_v11 = vadd.f32 -1.4531521, %v2418_v4  ;;  %6464 = vpow2.f32 %v2508_v17 }
 0xa91   : > { %v2446_v35 = vmul.f32 %v7815_v39, %v2438_v14  ;;  %v2439_v44 = vadd.f32 1.4214138, %v2431_v37  ;;  %v2420_v33 = vmul.f32 1.0614054, %v7846_v5  ;;  %v2514_v14 = vmul.f32 1.442695, %v2500_v49  ;;  %v7851_v16 = vpop.eup %6452 }
 0xa92   : > { %v2448_v54 = vmul.f32 %v7820_v43, %v2440_v36  ;;  %v2441_v3 = vadd.f32 1.4214138, %v2433_v48  ;;  %v2434_v30 = vmul.f32 %v7840_v28, %v2426_v11  ;;  %v2419_v36 = vmul.f32 1.0614054, %v7851_v16  ;;  %v7861_v49 = vpop.eup %6454 }
 0xa93   : > { %v2454_v53 = vadd.f32 -0.28449672, %v2446_v35  ;;  %v2447_v57 = vmul.f32 %v7827_v52, %v2439_v44  ;;  %v2428_v35 = vadd.f32 -1.4531521, %v2420_v33  ;;  %6466 = vpow2.f32 %v2514_v14 }
 0xa94   : > { %v2449_v32 = vmul.f32 %v7834_v13, %v2441_v3  ;;  %v2456_v24 = vadd.f32 -0.28449672, %v2448_v54  ;;  %v2442_v37 = vadd.f32 1.4214138, %v2434_v30  ;;  %v2427_v41 = vadd.f32 -1.4531521, %v2419_v36 }
 0xa95   : > { %v2455_v6 = vadd.f32 -0.28449672, %v2447_v57  ;;  %v2462_v62 = vmul.f32 %v7815_v39, %v2454_v53  ;;  %v2436_v40 = vmul.f32 %v7846_v5, %v2428_v35  ;;  %6468 = vpow2.f32 %v2512_v15 }
 0xa96   : > { %v2457_v31 = vadd.f32 -0.28449672, %v2449_v32  ;;  %v2450_v48 = vmul.f32 %v7840_v28, %v2442_v37  ;;  %v2464_v50 = vmul.f32 %v7820_v43, %v2456_v24  ;;  %v2435_v54 = vmul.f32 %v7851_v16, %v2427_v41 }
 0xa97   : > { %v2463_v25 = vmul.f32 %v7827_v52, %v2455_v6  ;;  %v2470_v44 = vadd.f32 0.2548296, %v2462_v62  ;;  %v2444_v53 = vadd.f32 1.4214138, %v2436_v40  ;;  %v2421_v51 = vmul.f32 1.0614054, %v7861_v49  ;;  %v6457_v6 = vpop.eup %6456 }
 0xa98   : > { %v2465_v47 = vmul.f32 %v7834_v13, %v2457_v31  ;;  %v2458_v57 = vadd.f32 -0.28449672, %v2450_v48  ;;  %v2516_v4 = vmul.f32 1.442695, %v2501_v7  ;;  %v2443_v17 = vadd.f32 1.4214138, %v2435_v54  ;;  %v6459_v24 = vpop.eup %6458 }
 0xa99   : > { %v2471_v38 = vadd.f32 0.2548296, %v2463_v25  ;;  %v2452_v3 = vmul.f32 %v7846_v5, %v2444_v53  ;;  %v2478_v11 = vmul.f32 %v7815_v39, %v2470_v44  ;;  %v2429_v33 = vadd.f32 -1.4531521, %v2421_v51 }
 0xa9a   : > { %v2473_v12 = vadd.f32 0.2548296, %v2465_v47  ;;  %v2466_v32 = vmul.f32 %v7840_v28, %v2458_v57  ;;  %v2472_v14 = vadd.f32 0.2548296, %v2464_v50  ;;  %v2451_v15 = vmul.f32 %v7851_v16, %v2443_v17 }
 0xa9b   : > { %v2479_v63 = vmul.f32 %v7827_v52, %v2471_v38  ;;  %v2460_v62 = vadd.f32 -0.28449672, %v2452_v3  ;;  %v2437_v52 = vmul.f32 %v7861_v49, %v2429_v33  ;;  %6470 = vpow2.f32 %v2516_v4  ;;  %v6461_v30 = vpop.eup %6460 }
 0xa9c   : > { %v2474_v25 = vadd.f32 0.2548296, %v2466_v32  ;;  %v2459_v35 = vadd.f32 -0.28449672, %v2451_v15  ;;  %v2518_v36 = vmul.f32 %v6457_v6, %v2478_v11  ;;  %v2481_v37 = vmul.f32 %v7834_v13, %v2473_v12  ;;  %v6463_v47 = vpop.eup %6462 }
 0xa9d   : > { %v2519_v31 = vmul.f32 %v6459_v24, %v2479_v63  ;;  %v2468_v39 = vmul.f32 %v7846_v5, %v2460_v62  ;;  %v2445_v38 = vadd.f32 1.4214138, %v2437_v52  ;;  %v2480_v40 = vmul.f32 %v7820_v43, %v2472_v14 }
 0xa9e   : > { %v2482_v7 = vmul.f32 %v7840_v28, %v2474_v25  ;;  %v2467_v44 = vmul.f32 %v7851_v16, %v2459_v35  ;;  %v7157_v48 = vmov -1.0   ;;  %v6465_v28 = vpop.eup %6464  ;;  %v2526_v63 = vsub.f32 1.0, %v2518_v36 }
 0xa9f   : > { %v2476_v41 = vadd.f32 0.2548296, %v2468_v39  ;;  %v2366_v50 = vsel %vm2358_vm13, 1.0, %v7157_v48  ;;  %v2453_v13 = vmul.f32 %v7861_v49, %v2445_v38  ;;  %v2367_v54 = vsel %vm2359_vm14, 1.0, %v7157_v48 }
 0xaa0   : > { %v2522_v53 = vmul.f32 %v6461_v30, %v2482_v7  ;;  %v2527_v43 = vsub.f32 1.0, %v2519_v31  ;;  %v2475_v51 = vadd.f32 0.2548296, %v2467_v44  ;;  %v6467_v4 = vpop.eup %6466  ;;  %v2521_v3 = vmul.f32 %v6465_v28, %v2481_v37 }
 0xaa1   : > { %v2484_v57 = vmul.f32 %v7846_v5, %v2476_v41  ;;  %v2461_v58 = vadd.f32 -0.28449672, %v2453_v13  ;;  %v2520_v6 = vmul.f32 %v6463_v47, %v2480_v40  ;;  %v2370_v46 = vsel %vm2362_vm0, 1.0, %v7157_v48 }
 0xaa2   : > { %v2530_v17 = vsub.f32 1.0, %v2522_v53  ;;  %v2483_v12 = vmul.f32 %v7851_v16, %v2475_v51  ;;  %v6469_v32 = vpop.eup %6468  ;;  %v2535_v33 = vmul.f32 %v2527_v43, %v2367_v54  ;;  %v2534_v15 = vmul.f32 %v2526_v63, %v2366_v50 }
 0xaa3   : > { %v2524_v11 = vmul.f32 %v6467_v4, %v2484_v57  ;;  %v2469_v5 = vmul.f32 %v7861_v49, %v2461_v58  ;;  %v2529_v24 = vsub.f32 1.0, %v2521_v3  ;;  %v2368_v16 = vsel %vm2360_vm15, 1.0, %v7157_v48 }
 0xaa4   : > { %v2538_v2 = vmul.f32 %v2530_v17, %v2370_v46  ;;  %v2523_v62 = vmul.f32 %v6469_v32, %v2483_v12  ;;  %v2528_v52 = vsub.f32 1.0, %v2520_v6  ;;  %v2369_v10 = vsel %vm2361_vm1, 1.0, %v7157_v48 }
 0xaa5   : > { %v2532_v14 = vsub.f32 1.0, %v2524_v11  ;;  %v2477_v25 = vadd.f32 0.2548296, %v2469_v5  ;;  %v2372_v26 = vsel %vm2364_vm2, 1.0, %v7157_v48  ;;  %v2371_v39 = vsel %vm2363_vm3, 1.0, %v7157_v48 }
 0xaa6   : > { %v2531_v30 = vsub.f32 1.0, %v2523_v62  ;;  %v2546_v31 = vadd.f32 1.0, %v2538_v2  ;;  %v2543_v36 = vadd.f32 1.0, %v2535_v33  ;;  %v2346_v37 = vmul.f32 0.5, %v7795_v45 }
 0xaa7   : > { %v2485_v35 = vmul.f32 %v7861_v49, %v2477_v25  ;;  %v2540_v7 = vmul.f32 %v2532_v14, %v2372_v26  ;;  %v2542_v40 = vadd.f32 1.0, %v2534_v15  ;;  %v2537_v59 = vmul.f32 %v2529_v24, %v2369_v10 }
 0xaa8   : > { %v6471_v29 = vpop.eup %6470  ;;  %v2539_v38 = vmul.f32 %v2531_v30, %v2371_v39  ;;  %v2536_v44 = vmul.f32 %v2528_v52, %v2368_v16  ;;  %v2343_v47 = vmul.f32 0.5, %v7778_v60  ;;  %v2347_v50 = vmul.f32 0.5, %v7799_v22 }
 0xaa9   : > { %v2525_v41 = vmul.f32 %v6471_v29, %v2485_v35  ;;  %v2342_v13 = vmul.f32 0.5, %v7768_v55  ;;  %v2554_v49 = vmul.f32 %v2546_v31, %v2346_v37  ;;  %v2548_v43 = vadd.f32 1.0, %v2540_v7  ;;  %v6274_v37 = vld [vmem:[#allocation11 + $0x16c] ss:$12 sps:$4 sm:$0xff]   ;;  %v6275_v7 = vld [vmem:[#allocation11 + $0x170] ss:$12 sps:$4 sm:$0xff]  }
 0xaaa   : > { %v2547_v53 = vadd.f32 1.0, %v2539_v38  ;;  %v2551_v54 = vmul.f32 %v2543_v36, %v2343_v47  ;;  %v2373_v57 = vsel %vm2365_vm4, 1.0, %v7157_v48  ;;  %v2545_v4 = vadd.f32 1.0, %v2537_v59  ;;  %v6272_v36 = vld [vmem:[#allocation11 + $0x168] ss:$12 sps:$4 sm:$0xff]   ;;  %3129 = vmatprep.subr.bf16.mxu1 %v6274_v37 }
 0xaab   : > { %v2533_v28 = vsub.f32 1.0, %v2525_v41  ;;  %v2550_v51 = vmul.f32 %v2542_v40, %v2342_v13  ;;  %v2544_v42 = vadd.f32 1.0, %v2536_v44  ;;  %v2348_v3 = vmul.f32 0.5, %v7797_v19  ;;  %v6279_v13 = vld [vmem:[#allocation11 + $0x158] ss:$12 sps:$4 sm:$0xff]  }
 0xaac   : > { %v2555_v45 = vmul.f32 %v2547_v53, %v2347_v50  ;;  %v2345_v60 = vmul.f32 0.5, %v7780_v61  ;;  %v2349_v58 = vmul.f32 0.5, %v7813_v34  ;;  %v2344_v6 = vmul.f32 0.5, %v7770_v56  ;;  %v5340_v34 = vld [vmem:[#allocation23] ss:$0 sm:$0xff] }
 0xaad   : > { %v2541_v63 = vmul.f32 %v2533_v28, %v2373_v57  ;;  %v2558_v22 = vpack.c.bf16 %v2554_v49, %v2550_v51  ;;  %v2556_v46 = vmul.f32 %v2548_v43, %v2348_v3  ;;  %v6278_v50 = vld [vmem:[#allocation11 + $0x154] ss:$12 sps:$4 sm:$0xff]   ;;  %v6276_v53 = vld [vmem:[#allocation11 + $0x150] ss:$12 sps:$4 sm:$0xff]   ;;  %v6280_v28 = vld [vmem:[#allocation11 + $0x138] ss:$12 sps:$4 sm:$0xff]  }
 0xaae   : > { %v2559_v17 = vpack.c.bf16 %v2555_v45, %v2551_v54  ;;  %v2553_v11 = vmul.f32 %v2545_v4, %v2345_v60  ;;  %v2552_v32 = vmul.f32 %v2544_v42, %v2344_v6  ;;  %v6282_v49 = vld [vmem:[#allocation11 + $0x13c] ss:$12 sps:$4 sm:$0xff]   ;;  %v6283_v54 = vld [vmem:[#allocation11 + $0x140] ss:$12 sps:$4 sm:$0xff]   ;;  %v6286_v43 = vld [vmem:[#allocation11 + $0x124] ss:$12 sps:$4 sm:$0xff]  }
 0xaaf   : > { %v2549_v55 = vadd.f32 1.0, %v2541_v63  ;;  %v6284_v45 = vld [vmem:[#allocation11 + $0x120] ss:$12 sps:$4 sm:$0xff]   ;;  %v6287_v57 = vld [vmem:[#allocation11 + $0x128] ss:$12 sps:$4 sm:$0xff]  }
 0xab0   : > { %2857 = vmatprep.mubr.bf16.mxu1 %v2559_v17  ;;  %v2560_v5 = vpack.c.bf16 %v2556_v46, %v2552_v32  ;;  %v6290_v51 = vld [vmem:[#allocation11 + $0x10c] ss:$12 sps:$4 sm:$0xff]   ;;  %v6288_v4 = vld [vmem:[#allocation11 + $0x108] ss:$12 sps:$4 sm:$0xff]   ;;  %v6291_v63 = vld [vmem:[#allocation11 + $0x110] ss:$12 sps:$4 sm:$0xff]  }
 0xab1   : > { %v2557_v12 = vmul.f32 %v2549_v55, %v2349_v58  ;;  %2858 = vmatmul.mubr.bf16.vlgmr.msra.gmra.mxu1 %v2558_v22  ;;  %v6294_v42 = vld [vmem:[#allocation11 + $0xf4] ss:$12 sps:$4 sm:$0xff]   ;;  %v6292_v3 = vld [vmem:[#allocation11 + $0xf0] ss:$12 sps:$4 sm:$0xff]   ;;  %v6295_v17 = vld [vmem:[#allocation11 + $0xf8] ss:$12 sps:$4 sm:$0xff]  }
 0xab2   : > { %3161 = vmatprep.mubr.bf16.mxu1 %v7151_v0  ;;  %3130 = vmatpush1.bf16.msra.mxu1 %v6272_v36  ;;  %v6298_v60 = vld [vmem:[#allocation11 + $0xdc] ss:$12 sps:$4 sm:$0xff]   ;;  %v6296_v22 = vld [vmem:[#allocation11 + $0xd8] ss:$12 sps:$4 sm:$0xff]   ;;  %v6299_v58 = vld [vmem:[#allocation11 + $0xe0] ss:$12 sps:$4 sm:$0xff]  }
 0xab3   : > { %v2561_v2 = vpack.c.bf16 %v2557_v12, %v2553_v11  ;;  %3131 = vmatprep.subr.bf16.mxu1 %v6278_v50  ;;  %v6302_v55 = vld [vmem:[#allocation11 + $0xc4] ss:$12 sps:$4 sm:$0xff]   ;;  %v6300_v6 = vld [vmem:[#allocation11 + $0xc0] ss:$12 sps:$4 sm:$0xff]   ;;  %v6303_v46 = vld [vmem:[#allocation11 + $0xc8] ss:$12 sps:$4 sm:$0xff]  }
 0xab5   : > { %2898 = vmatprep.mubr.bf16.mxu0 %v2561_v2 }
 0xab6   : > { %2899 = vmatmul.mubr.bf16.vlgmr.msra.gmra.mxu0 %v2560_v5  ;;  %3132 = vmatpush1.bf16.msra.mxu1 %v6276_v53 }
 0xab7   : > { %5773 = vmatprep.mubr.msk.bf16.mxu0 %vm7153_vm8, %v7152_v1  ;;  %5758 = vmatpush3.bf16.msra.mxu0 %v6275_v7 }
 0xab8   : > { %5759 = vmatprep.subr.bf16.mxu0 %v7152_v1  ;;  %3133 = vmatprep.subr.bf16.mxu1 %v6282_v49 }
 0xaba   : > { %3134 = vmatpush1.bf16.msra.mxu1 %v6280_v28 }
 0xabb   : > { %5760 = vmatpush3.bf16.msra.mxu0 %v6279_v13  ;;  %3135 = vmatprep.subr.bf16.mxu1 %v6286_v43 }
 0xabc   : > { %5761 = vmatprep.subr.bf16.mxu0 %v7152_v1 }
 0xabe   : > { %3136 = vmatpush1.bf16.msra.mxu1 %v6284_v45 }
 0xabf   : > { %5762 = vmatpush3.bf16.msra.mxu0 %v6283_v54  ;;  %3137 = vmatprep.subr.bf16.mxu1 %v6290_v51 }
 0xac0   : > { %5763 = vmatprep.subr.bf16.mxu0 %v7152_v1 }
 0xac2   : > { %3138 = vmatpush1.bf16.msra.mxu1 %v6288_v4 }
 0xac3   : > { %5764 = vmatpush3.bf16.msra.mxu0 %v6287_v57  ;;  %3139 = vmatprep.subr.bf16.mxu1 %v6294_v42 }
 0xac4   : > { %5765 = vmatprep.subr.bf16.mxu0 %v7152_v1 }
 0xac6   : > { %3140 = vmatpush1.bf16.msra.mxu1 %v6292_v3 }
 0xac7   : > { %5766 = vmatpush3.bf16.msra.mxu0 %v6291_v63  ;;  %3141 = vmatprep.subr.bf16.mxu1 %v6298_v60 }
 0xac8   : > { %5767 = vmatprep.subr.bf16.mxu0 %v7152_v1 }
 0xaca   : > { %3142 = vmatpush1.bf16.msra.mxu1 %v6296_v22 }
 0xacb   : > { %5768 = vmatpush3.bf16.msra.mxu0 %v6295_v17  ;;  %3143 = vmatprep.subr.bf16.mxu1 %v6302_v55 }
 0xacc   : > { %5769 = vmatprep.subr.bf16.mxu0 %v7152_v1 }
 0xace   : > { %3144 = vmatpush1.bf16.msra.mxu1 %v6300_v6 }
 0xacf   : > { %5770 = vmatpush3.bf16.msra.mxu0 %v6299_v58  ;;  %5777 = vmatprep.subr.bf16.mxu1 %v7152_v1 }
 0xad0   : > { %5771 = vmatprep.subr.bf16.mxu0 %v7152_v1 }
 0xad3   : > { %5772 = vmatpush3.bf16.msra.mxu0 %v6303_v46 }
 0xad4   : > { %5801 = vmatprep.subr.bf16.mxu0 %v7152_v1 }
 0xb71   : > { %v5554_v61 = vpop.f32.mrf.mxu1 }
 0xb73   : > { %v5555_v19 = vpop.f32.mrf.mxu1 }
 0xb74   : > { %v5556_v33 = vadd.f32 %v5555_v19, %v5554_v61 }
 0xb75   : > { %v5557_v56 = vpop.f32.mrf.mxu1 }
 0xb76   : > { %v5576_v14 = vpop.f32.mrf.mxu0  ;;  %v2860_v62 = vadd.f32 %v5556_v33, %v5340_v34  ;;  %v5373_v33 = vld [vmem:[#allocation25] ss:$0 sm:$0xff] }
 0xb77   : > { %v5558_v15 = vpop.f32.mrf.mxu1 }
 0xb78   : > { %v5577_v24 = vpop.f32.mrf.mxu0  ;;  %v5559_v25 = vadd.f32 %v5558_v15, %v5557_v56  ;;  %v5374_v15 = vld [vmem:[#allocation26] ss:$0 sm:$0xff] }
 0xb79   : > { %v5578_v16 = vadd.f32 %v5577_v24, %v5576_v14 }
 0xb7a   : > { %v5579_v52 = vpop.f32.mrf.mxu0  ;;  %v2863_v30 = vadd.f32 %v5559_v25, %v5340_v34 }
 0xb7b   : > { %v2901_v10 = vadd.f32 %v5578_v16, %v2860_v62 }
 0xb7c   : > { %v5580_v31 = vpop.f32.mrf.mxu0 }
 0xb7d   : > { %v5581_v26 = vadd.f32 %v5580_v31, %v5579_v52  ;;  %v2907_v39 = vadd.f32 %v2901_v10, %v7757_v8  ;;  %v5375_v31 = vld [vmem:[%s8404_s22 + $0x3] sm:$0x7] }
 0xb7f   : > { %v2904_v35 = vadd.f32 %v5581_v26, %v2863_v30  ;;  %2911 = vadd.xlane.f32.xlu1 %v2907_v39 }
 0xb81   : > { %v2908_v29 = vadd.f32 %v2904_v35, %v7759_v9  ;;  %v2993_v35 = vrot.slane %v5375_v31, %v7603_v20 }
 0xb83   : > { %2913 = vadd.xlane.f32.xlu0 %v2908_v29 }
 0xc08   : > { %v2912_v38 = vpop.xlane.xlu1 %2911 }
 0xc09   : > { %v2915_v40 = vmul.f32 0.0078125, %v2912_v38 }
 0xc0b   : > { %v7918_v59 = vsub.f32 %v2907_v39, %v2915_v40 }
 0xc0c   : > { %v2914_v41 = vpop.xlane.xlu0 %2913 }
 0xc0d   : > { %v2916_v44 = vmul.f32 0.0078125, %v2914_v41  ;;  %v2919_v8 = vmul.f32 %v7918_v59, %v7918_v59  ;;  %v2989_v41 = vrot.slane %v5375_v31, %v7601_v18 }
 0xc0f   : > { %v7922_v47 = vsub.f32 %v2908_v29, %v2916_v44  ;;  %2921 = vadd.xlane.f32.xlu1 %v2919_v8  ;;  %v2997_v8 = vrot.slane %v5375_v31, %v7605_v21 }
 0xc11   : > { %v2920_v9 = vmul.f32 %v7922_v47, %v7922_v47 }
 0xc13   : > { %2923 = vadd.xlane.f32.xlu0 %v2920_v9 }
 0xc98   : > { %v2922_v11 = vpop.xlane.xlu1 %2921 }
 0xc99   : > { %v2925_v12 = vmul.f32 0.0078125, %v2922_v11 }
 0xc9b   : > { %v2927_v32 = vadd.f32 1e-05, %v2925_v12 }
 0xc9c   : > { %v2924_v2 = vpop.xlane.xlu0 %2923 }
 0xc9d   : > { %6472 = vrsqrt.f32 %v2927_v32  ;;  %v2926_v5 = vmul.f32 0.0078125, %v2924_v2 }
 0xc9f   : > { %v2928_v61 = vadd.f32 1e-05, %v2926_v5 }
 0xca1   : > { %6474 = vrsqrt.f32 %v2928_v61 }
 0xcaa   : > { %v6473_v19 = vpop.eup %6472 }
 0xcab   : > { %v2931_v34 = vmul.f32 %v6473_v19, %v7918_v59 }
 0xcad   : > { %v2939_v62 = vmul.f32 %v5373_v33, %v2931_v34 }
 0xcae   : > { %v6475_v56 = vpop.eup %6474 }
 0xcaf   : > { %v2932_v14 = vmul.f32 %v6475_v56, %v7922_v47  ;;  %v7936_v25 = vadd.f32 %v5374_v15, %v2939_v62 }
 0xcb1   : > { %v2940_v24 = vmul.f32 %v5373_v33, %v2932_v14 }
 0xcb3   : > { %v7938_v16 = vadd.f32 %v5374_v15, %v2940_v24 }
 0xcb5   : > { %v2949_v52 = vpack.c.bf16 %v7938_v16, %v7936_v25 }
 0xcb7   : > { %3162 = vmatmul.mubr.bf16.vlgmr.msra.gmra.mxu1 %v2949_v52  ;;  %5774 = vmatmul.mubr.bf16.vlgmr.msra.gmra.mxu0 %v2949_v52 }
 0xcb8   : > { %5779 = vmatprep.mubr.msk.bf16.mxu1 %vm7153_vm8, %v7152_v1  ;;  %5803 = vmatprep.mubr.msk.bf16.mxu0 %vm7153_vm8, %v7152_v1 }
 0xd77   : > { %v3163_v10 = vpop.f32.mrf.mxu1  ;;  %v3206_v30 = vpop.f32.mrf.mxu0 }
 0xd78   : > { %v3164_v50 = vadd.f32 %v3163_v10, %v2989_v41  ;;  %v3207_v53 = vadd.f32 %v3206_v30, %v2997_v8 }
 0xd79   : > { %v3165_v26 = vpop.f32.mrf.mxu1  ;;  %v5775_v39 = vpop.f32.mrf.mxu0 }
 0xd7a   : > { %v3166_v38 = vadd.f32 %v3165_v26, %v2993_v35 }
 0xd7b   : > { %v3167_v29 = vpop.f32.mrf.mxu1  ;;  %v3209_v36 = vpop.f32.mrf.mxu0 }
 0xd7c   : > { %v3168_v47 = vadd.f32 %v3167_v29, %v2989_v41  ;;  %v3210_v9 = vadd.f32 %v3209_v36, %v2997_v8 }
 0xd7d   : > { %v3169_v37 = vpop.f32.mrf.mxu1  ;;  %v5776_v7 = vpop.f32.mrf.mxu0 }
 0xd7e   : > { %v3170_v40 = vadd.f32 %v3169_v37, %v2993_v35  ;;  %v3213_v13 = vpack.c.bf16 %v3168_v47, %v3164_v50  ;;  %v7954_v49 = vpack.c.bf16 %v3210_v9, %v3207_v53 }
 0xd80   : > { %v3214_v59 = vpack.c.bf16 %v3170_v40, %v3166_v38 }
 0xd82   : > { %v3219_v44 = vsel %vm1371_vm9, %v3214_v59, 0 }
 0xd83   : > { %5778 = vmatpush3.bf16.xpose.msra.mxu1 %v3219_v44 }
 0xd84   : > { %5783 = vmatprep.subr.bf16.mxu1 %v7152_v1 }
 0xd8a   : > { %5780 = vmatmul.mubr.msk.bf16.vlgmr.msra.gmra.mxu1 %vm1371_vm9, %v3213_v13 }
 0xd8b   : > { %5784 = vmatpush3.bf16.msra.mxu1 %v7954_v49  ;;  %5785 = vmatprep.mubr.msk.bf16.mxu1 %vm7153_vm8, %v7152_v1 }
 0xd8c   : > { %5789 = vmatprep.subr.bf16.mxu1 %v7152_v1 }
 0xe4a   : > { %v3255_v28 = vpop.f32.mrf.mxu1 }
 0xe4b   : > { %v3256_v54 = vadd.f32 %v3255_v28, %v7683_v23 }
 0xe4c   : > { %v5781_v43 = vpop.f32.mrf.mxu1 }
 0xe4d   : > { %v3262_v45 = vsel %vm1419_vm10, %v3256_v54, -inf }
 0xe4e   : > { %3263 = vmax.xlane.f32.xlu1 %v3262_v45  ;;  %v3258_v57 = vpop.f32.mrf.mxu1 }
 0xe4f   : > { %v3259_v51 = vadd.f32 %v3258_v57, %v7683_v23 }
 0xe50   : > { %v5782_v4 = vpop.f32.mrf.mxu1 }
 0xe51   : > { %v3265_v63 = vsel %vm1419_vm10, %v3259_v51, -inf }
 0xe52   : > { %3266 = vmax.xlane.f32.xlu0 %v3265_v63 }
 0xed7   : > { %v3264_v42 = vpop.xlane.xlu1 %3263 }
 0xed8   : > { %v3268_v3 = vsub.f32 %v3256_v54, %v3264_v42 }
 0xeda   : > { %v3270_v17 = vmul.f32 1.442695, %v3268_v3 }
 0xedb   : > { %v3267_v60 = vpop.xlane.xlu0 %3266 }
 0xedc   : > { %6476 = vpow2.f32 %v3270_v17  ;;  %v3269_v22 = vsub.f32 %v3259_v51, %v3267_v60 }
 0xede   : > { %v3272_v58 = vmul.f32 1.442695, %v3269_v22 }
 0xee0   : > { %6478 = vpow2.f32 %v3272_v58 }
 0xee9   : > { %v6477_v55 = vpop.eup %6476 }
 0xeea   : > { %v3274_v6 = vsel %vm1419_vm10, %v6477_v55, 0.0 }
 0xeeb   : > { %3275 = vadd.xlane.f32.xlu1 %v3274_v6 }
 0xeed   : > { %v6479_v46 = vpop.eup %6478 }
 0xeee   : > { %v3277_v11 = vsel %vm1419_vm10, %v6479_v46, 0.0 }
 0xeef   : > { %3278 = vadd.xlane.f32.xlu0 %v3277_v11 }
 0xefc   : > { %3334 = vrot.lane.b32.xlu1 %v3214_v59, %s7154_s23 }
 0xf00   : > { %3456 = vrot.lane.b32.xlu1 %v3214_v59, %s7156_s20 }
 0xf04   : > { %3454 = vrot.lane.b32.xlu1 %v3213_v13, %s7156_s20 }
 0xf05   : > { %3331 = vrot.lane.b32.xlu0 %v3213_v13, %s7154_s23 }
 0xf08   : > { %3575 = vrot.lane.b32.xlu1 %v3213_v13, %s7155_s9 }
 0xf09   : > { %3577 = vrot.lane.b32.xlu0 %v3214_v59, %s7155_s9 }
 0xf74   : > { %v3276_v12 = vpop.xlane.xlu1 %3275 }
 0xf75   : > { %6480 = vrcp.f32 %v3276_v12 }
 0xf78   : > { %v3335_v32 = vpop.permute.xlu1 %3334  ;;  %v3279_v2 = vpop.xlane.xlu0 %3278 }
 0xf79   : > { %6482 = vrcp.f32 %v3279_v2  ;;  %v3340_v10 = vsel %vm1371_vm9, %v3335_v32, 0 }
 0xf7c   : > { %v3457_v5 = vpop.permute.xlu1 %3456  ;;  %v3332_v61 = vpop.permute.xlu0 %3331 }
 0xf7d   : > { %v3462_v19 = vsel %vm1371_vm9, %v3457_v5, 0 }
 0xf7e   : > { %5802 = vmatpush3.bf16.xpose.msra.mxu0 %v3462_v19 }
 0xf7f   : > { %5813 = vmatprep.subr.bf16.mxu0 %v7152_v1 }
 0xf80   : > { %v3578_v34 = vpop.permute.xlu0 %3577  ;;  %v3455_v56 = vpop.permute.xlu1 %3454 }
 0xf81   : > { %v3583_v14 = vsel %vm1371_vm9, %v3578_v34, 0 }
 0xf82   : > { %v6481_v33 = vpop.eup %6480 }
 0xf83   : > { %v3282_v15 = vmul.f32 %v6481_v33, %v6477_v55 }
 0xf84   : > { %v3576_v30 = vpop.permute.xlu1 %3575 }
 0xf85   : > { %5804 = vmatmul.mubr.msk.bf16.vlgmr.msra.gmra.mxu0 %vm1371_vm9, %v3455_v56 }
 0xf86   : > { %v6483_v62 = vpop.eup %6482  ;;  %5814 = vmatpush3.bf16.xpose.msra.mxu0 %v3583_v14  ;;  %5815 = vmatprep.mubr.msk.bf16.mxu0 %vm7153_vm8, %v7152_v1 }
 0xf87   : > { %v3283_v24 = vmul.f32 %v6483_v62, %v6479_v46  ;;  %5825 = vmatprep.subr.bf16.mxu0 %v7152_v1 }
 0xf89   : > { %v3284_v52 = vpack.c.bf16 %v3283_v24, %v3282_v15 }
 0xf8b   : > { %5786 = vmatmul.mubr.msk.bf16.vlgmr.msra.gmra.mxu1 %vm1419_vm10, %v3284_v52 }
 0xf8c   : > { %5790 = vmatpush3.bf16.xpose.msra.mxu1 %v3340_v10  ;;  %5791 = vmatprep.mubr.msk.bf16.mxu1 %vm7153_vm8, %v7152_v1 }
 0xf8d   : > { %5816 = vmatmul.mubr.msk.bf16.vlgmr.msra.gmra.mxu0 %vm1371_vm9, %v3576_v30  ;;  %5795 = vmatprep.subr.bf16.mxu1 %v7152_v1 }
 0xf8e   : > { %5841 = vmatprep.mubr.msk.bf16.mxu0 %vm7153_vm8, %v7152_v1 }
 0xf93   : > { %5792 = vmatmul.mubr.msk.bf16.vlgmr.msra.gmra.mxu1 %vm1371_vm9, %v3332_v61 }
 0xf94   : > { %5797 = vmatprep.mubr.msk.bf16.mxu1 %vm7153_vm8, %v7152_v1 }
0x1045   : > { %v3498_v31 = vpop.f32.mrf.mxu0 }
0x1046   : > { %v3499_v9 = vadd.f32 %v3498_v31, %v7683_v23 }
0x1047   : > { %v5805_v26 = vpop.f32.mrf.mxu0 }
0x1048   : > { %v3505_v45 = vsel %vm1419_vm10, %v3499_v9, -inf }
0x1049   : > { %v3501_v39 = vpop.f32.mrf.mxu0 }
0x104a   : > { %v3502_v54 = vadd.f32 %v3501_v39, %v7683_v23 }
0x104b   : > { %v7991_v35 = vpop.f32.mrf.mxu1  ;;  %v5806_v29 = vpop.f32.mrf.mxu0 }
0x104c   : > { %v3508_v4 = vsel %vm1419_vm10, %v3502_v54, -inf }
0x104d   : > { %v5787_v36 = vpop.f32.mrf.mxu1  ;;  %v3619_v37 = vpop.f32.mrf.mxu0 }
0x104e   : > { %v3620_v43 = vadd.f32 %v3619_v37, %v7683_v23 }
0x104f   : > { %v7993_v7 = vpop.f32.mrf.mxu1  ;;  %v5817_v38 = vpop.f32.mrf.mxu0 }
0x1050   : > { %v3626_v63 = vsel %vm1419_vm10, %v3620_v43, -inf }
0x1051   : > { %v5788_v40 = vpop.f32.mrf.mxu1  ;;  %v3622_v59 = vpop.f32.mrf.mxu0 }
0x1052   : > { %v3623_v51 = vadd.f32 %v3622_v59, %v7683_v23 }
0x1053   : > { %v3376_v41 = vpop.f32.mrf.mxu1  ;;  %v5818_v44 = vpop.f32.mrf.mxu0 }
0x1054   : > { %v3377_v8 = vadd.f32 %v3376_v41, %v7683_v23  ;;  %v3629_v42 = vsel %vm1419_vm10, %v3623_v51, -inf }
0x1055   : > { %v5793_v47 = vpop.f32.mrf.mxu1 }
0x1056   : > { %v3383_v50 = vsel %vm1419_vm10, %v3377_v8, -inf }
0x1057   : > { %3384 = vmax.xlane.f32.xlu0 %v3383_v50  ;;  %v3379_v53 = vpop.f32.mrf.mxu1 }
0x1058   : > { %v3380_v13 = vadd.f32 %v3379_v53, %v7683_v23 }
0x1059   : > { %v5794_v28 = vpop.f32.mrf.mxu1 }
0x105a   : > { %v3386_v57 = vsel %vm1419_vm10, %v3380_v13, -inf }
0x105b   : > { %3506 = vmax.xlane.f32.xlu0 %v3505_v45  ;;  %3387 = vmax.xlane.f32.xlu1 %v3386_v57 }
0x105f   : > { %3509 = vmax.xlane.f32.xlu0 %v3508_v4  ;;  %3627 = vmax.xlane.f32.xlu1 %v3626_v63 }
0x1063   : > { %3630 = vmax.xlane.f32.xlu0 %v3629_v42 }
0x10e0   : > { %v3385_v3 = vpop.xlane.xlu0 %3384 }
0x10e1   : > { %v3389_v6 = vsub.f32 %v3377_v8, %v3385_v3 }
0x10e3   : > { %v3391_v61 = vmul.f32 1.442695, %v3389_v6 }
0x10e4   : > { %v3507_v17 = vpop.xlane.xlu0 %3506  ;;  %v3388_v60 = vpop.xlane.xlu1 %3387 }
0x10e5   : > { %v3511_v22 = vsub.f32 %v3499_v9, %v3507_v17  ;;  %v3390_v55 = vsub.f32 %v3380_v13, %v3388_v60  ;;  %v6304_v17 = vld [vmem:[#allocation13 + $0x78] sm:$0xff]   ;;  %v6305_v60 = vld [vmem:[#allocation13 + $0x70] sm:$0xff]  }
0x10e6   : > { %5826 = vmatpush3.bf16.msra.mxu0 %v6304_v17 }
0x10e7   : > { %v3513_v58 = vmul.f32 1.442695, %v3511_v22  ;;  %v3393_v32 = vmul.f32 1.442695, %v3390_v55  ;;  %5827 = vmatprep.subr.bf16.mxu0 %v7152_v1  ;;  %v6306_v22 = vld [vmem:[#allocation13 + $0x68] sm:$0xff]   ;;  %v6308_v55 = vld [vmem:[#allocation13 + $0x58] sm:$0xff]  }
0x10e8   : > { %v3510_v46 = vpop.xlane.xlu0 %3509  ;;  %v3628_v11 = vpop.xlane.xlu1 %3627 }
0x10e9   : > { %6484 = vpow2.f32 %v3513_v58  ;;  %v3512_v23 = vsub.f32 %v3502_v54, %v3510_v46  ;;  %v3632_v12 = vsub.f32 %v3620_v43, %v3628_v11  ;;  %v6307_v58 = vld [vmem:[#allocation13 + $0x60] sm:$0xff]  }
0x10ea   : > { %5828 = vmatpush3.bf16.msra.mxu0 %v6305_v60 }
0x10eb   : > { %v3515_v2 = vmul.f32 1.442695, %v3512_v23  ;;  %v3634_v5 = vmul.f32 1.442695, %v3632_v12  ;;  %5829 = vmatprep.subr.bf16.mxu0 %v7152_v1  ;;  %v6309_v23 = vld [vmem:[#allocation13 + $0x50] sm:$0xff]  }
0x10ec   : > { %v3631_v19 = vpop.xlane.xlu0 %3630 }
0x10ed   : > { %6486 = vpow2.f32 %v3515_v2  ;;  %v3633_v34 = vsub.f32 %v3623_v51, %v3631_v19  ;;  %v6310_v2 = vld [vmem:[#allocation13 + $0x48] sm:$0xff]  }
0x10ee   : > { %6488 = vpow2.f32 %v3634_v5  ;;  %5830 = vmatpush3.bf16.msra.mxu0 %v6306_v22  ;;  %v6320_v22 = vld [vmem:[#allocation19 + $0x1c4] ss:$16 sps:$4 sm:$0xff]  }
0x10ef   : > { %6490 = vpow2.f32 %v3393_v32  ;;  %v3636_v33 = vmul.f32 1.442695, %v3633_v34  ;;  %5831 = vmatprep.subr.bf16.mxu0 %v7152_v1  ;;  %v6311_v34 = vld [vmem:[#allocation13 + $0x40] sm:$0xff]  }
0x10f0   : > { %6492 = vpow2.f32 %v3391_v61 }
0x10f1   : > { %6494 = vpow2.f32 %v3636_v33 }
0x10f2   : > { %5832 = vmatpush3.bf16.msra.mxu0 %v6307_v58  ;;  %v6323_v58 = vld [vmem:[#allocation19 + $0x1cc] ss:$16 sps:$4 sm:$0xff]  }
0x10f3   : > { %5833 = vmatprep.subr.bf16.mxu0 %v7152_v1 }
0x10f6   : > { %v6485_v56 = vpop.eup %6484  ;;  %5834 = vmatpush3.bf16.msra.mxu0 %v6308_v55  ;;  %v6318_v55 = vld [vmem:[#allocation19 + $0x1c0] ss:$16 sps:$4 sm:$0xff]  }
0x10f7   : > { %v3517_v14 = vsel %vm1419_vm10, %v6485_v56, 0.0  ;;  %5835 = vmatprep.subr.bf16.mxu0 %v7152_v1 }
0x10f8   : > { %3518 = vadd.xlane.f32.xlu1 %v3517_v14 }
0x10fa   : > { %v6487_v62 = vpop.eup %6486  ;;  %5836 = vmatpush3.bf16.msra.mxu0 %v6309_v23  ;;  %v6324_v23 = vld [vmem:[#allocation19 + $0x1a0] ss:$16 sps:$4 sm:$0xff]  }
0x10fb   : > { %v6489_v15 = vpop.eup %6488  ;;  %v3520_v24 = vsel %vm1419_vm10, %v6487_v62, 0.0  ;;  %5837 = vmatprep.subr.bf16.mxu0 %v7152_v1 }
0x10fc   : > { %v6491_v52 = vpop.eup %6490  ;;  %3521 = vadd.xlane.f32.xlu0 %v3520_v24  ;;  %v3638_v10 = vsel %vm1419_vm10, %v6489_v15, 0.0 }
0x10fd   : > { %v6493_v30 = vpop.eup %6492  ;;  %3639 = vadd.xlane.f32.xlu1 %v3638_v10  ;;  %v3398_v31 = vsel %vm1419_vm10, %v6491_v52, 0.0 }
0x10fe   : > { %v6495_v26 = vpop.eup %6494  ;;  %v3395_v39 = vsel %vm1419_vm10, %v6493_v30, 0.0  ;;  %5838 = vmatpush3.bf16.msra.mxu0 %v6310_v2  ;;  %v6330_v2 = vld [vmem:[#allocation19 + $0x180] ss:$16 sps:$4 sm:$0xff]  }
0x10ff   : > { %v3641_v29 = vsel %vm1419_vm10, %v6495_v26, 0.0  ;;  %5839 = vmatprep.subr.bf16.mxu0 %v7152_v1 }
0x1100   : > { %3399 = vadd.xlane.f32.xlu0 %v3398_v31 }
0x1101   : > { %3396 = vadd.xlane.f32.xlu1 %v3395_v39 }
0x1102   : > { %5840 = vmatpush3.bf16.msra.mxu0 %v6311_v34  ;;  %v6341_v34 = vld [vmem:[#allocation19 + $0x16c] ss:$16 sps:$4 sm:$0xff]  }
0x1104   : > { %3642 = vadd.xlane.f32.xlu0 %v3641_v29 }
0x1112   : > { %3407 = vrot.lane.b32.xlu1 %v7954_v49, %s7154_s23 }
0x1116   : > { %3649 = vrot.lane.b32.xlu1 %v7954_v49, %s7155_s9 }
0x111a   : > { %3528 = vrot.lane.b32.xlu0 %v7954_v49, %s7156_s20 }
0x1181   : > { %v3519_v36 = vpop.xlane.xlu1 %3518 }
0x1185   : > { %v3522_v37 = vpop.xlane.xlu0 %3521 }
0x1186   : > { %v3640_v38 = vpop.xlane.xlu1 %3639 }
0x1189   : > { %v3400_v40 = vpop.xlane.xlu0 %3399 }
0x118a   : > { %6496 = vrcp.f32 %v3400_v40  ;;  %v3397_v59 = vpop.xlane.xlu1 %3396 }
0x118b   : > { %6498 = vrcp.f32 %v3397_v59 }
0x118c   : > { %6500 = vrcp.f32 %v3522_v37 }
0x118d   : > { %6502 = vrcp.f32 %v3519_v36  ;;  %v3643_v44 = vpop.xlane.xlu0 %3642 }
0x118e   : > { %v3408_v41 = vpop.permute.xlu1 %3407  ;;  %6504 = vrcp.f32 %v3643_v44 }
0x118f   : > { %5796 = vmatpush3.bf16.msra.mxu1 %v3408_v41  ;;  %6506 = vrcp.f32 %v3640_v38 }
0x1190   : > { %5807 = vmatprep.subr.bf16.mxu1 %v7152_v1 }
0x1191   : > { %v3529_v13 = vpop.permute.xlu0 %3528 }
0x1192   : > { %v3650_v51 = vpop.permute.xlu1 %3649 }
0x1197   : > { %v6497_v8 = vpop.eup %6496 }
0x1198   : > { %v6499_v47 = vpop.eup %6498  ;;  %v3404_v9 = vmul.f32 %v6497_v8, %v6491_v52 }
0x1199   : > { %v3403_v49 = vmul.f32 %v6499_v47, %v6493_v30  ;;  %v6501_v53 = vpop.eup %6500 }
0x119a   : > { %v6503_v28 = vpop.eup %6502  ;;  %v3526_v54 = vmul.f32 %v6501_v53, %v6487_v62 }
0x119b   : > { %v3405_v50 = vpack.c.bf16 %v3404_v9, %v3403_v49  ;;  %v3525_v43 = vmul.f32 %v6503_v28, %v6485_v56  ;;  %v6505_v57 = vpop.eup %6504  ;;  %v5408_v49 = vld [vmem:[#allocation14 + $0x1] ss:$0 sm:$0xff] }
0x119c   : > { %v6507_v4 = vpop.eup %6506  ;;  %v3647_v63 = vmul.f32 %v6505_v57, %v6495_v26  ;;  %v6314_v57 = vld [vmem:[#allocation19 + $0x1e4] ss:$16 sps:$4 sm:$0xff]  }
0x119d   : > { %5798 = vmatmul.mubr.msk.bf16.vlgmr.msra.gmra.mxu1 %vm1419_vm10, %v3405_v50  ;;  %v3527_v45 = vpack.c.bf16 %v3526_v54, %v3525_v43  ;;  %v3646_v42 = vmul.f32 %v6507_v4, %v6489_v15  ;;  %v6317_v4 = vld [vmem:[#allocation19 + $0x1ec] ss:$16 sps:$4 sm:$0xff]  }
0x119e   : > { %5808 = vmatpush3.bf16.msra.mxu1 %v3529_v13  ;;  %5809 = vmatprep.mubr.msk.bf16.mxu1 %vm7153_vm8, %v7152_v1 }
0x119f   : > { %5819 = vmatprep.subr.bf16.mxu1 %v7152_v1  ;;  %v3648_v3 = vpack.c.bf16 %v3647_v63, %v3646_v42  ;;  %4145 = vmatprep.subr.bf16.mxu0 %v6317_v4  ;;  %v6364_v4 = vld [vmem:[#allocation22 + $0x170] sm:$0xff]  }
0x11a5   : > { %5810 = vmatmul.mubr.msk.bf16.vlgmr.msra.gmra.mxu1 %vm1419_vm10, %v3527_v45  ;;  %v6312_v45 = vld [vmem:[#allocation19 + $0x1e0] ss:$16 sps:$4 sm:$0xff]  }
0x11a6   : > { %5820 = vmatpush3.bf16.msra.mxu1 %v3650_v51  ;;  %5821 = vmatprep.mubr.msk.bf16.mxu1 %vm7153_vm8, %v7152_v1  ;;  %v6315_v51 = vld [vmem:[#allocation19 + $0x1e8] ss:$16 sps:$4 sm:$0xff]  }
0x11a7   : > { %4102 = vmatprep.subr.bf16.mxu1 %v6314_v57  ;;  %v6362_v57 = vld [vmem:[#allocation22 + $0x138] sm:$0xff]  }
0x11ad   : > { %5822 = vmatmul.mubr.msk.bf16.vlgmr.msra.gmra.mxu1 %vm1419_vm10, %v3648_v3 }
0x11ae   : > { %4134 = vmatprep.mubr.bf16.mxu1 %v7151_v0  ;;  %4103 = vmatpush1.bf16.msra.mxu1 %v6312_v45  ;;  %v6361_v45 = vld [vmem:[#allocation22 + $0x1f8] sm:$0xff]  }
0x11af   : > { %4104 = vmatprep.subr.bf16.mxu1 %v6320_v22  ;;  %v6373_v22 = vld [vmem:[#allocation22 + $0x1e0] sm:$0xff]  }
0x11b2   : > { %4105 = vmatpush1.bf16.msra.mxu1 %v6318_v55  ;;  %v6375_v55 = vld [vmem:[#allocation22 + $0x1a0] sm:$0xff]  }
0x125d   : > { %v3447_v6 = vpop.f32.mrf.mxu1 }
0x125f   : > { %v5799_v46 = vpop.f32.mrf.mxu1 }
0x1260   : > { %v6326_v46 = vld [vmem:[#allocation19 + $0x1a4] ss:$16 sps:$4 sm:$0xff]  }
0x1261   : > { %v3450_v11 = vpop.f32.mrf.mxu1  ;;  %4106 = vmatprep.subr.bf16.mxu1 %v6326_v46  ;;  %v6377_v46 = vld [vmem:[#allocation22 + $0x1d8] sm:$0xff]  }
0x1262   : > { %v6137_v12 = vpack.i.bf16 %v3450_v11, %v3447_v6  ;;  %v6321_v6 = vld [vmem:[#allocation19 + $0x1c8] ss:$16 sps:$4 sm:$0xff]   ;;  %v6329_v11 = vld [vmem:[#allocation19 + $0x1ac] ss:$16 sps:$4 sm:$0xff]   ;;  %4107 = vmatpush1.bf16.msra.mxu1 %v6324_v23  ;;  %v6379_v23 = vld [vmem:[#allocation22 + $0x198] sm:$0xff]  }
0x1263   : > { %v5800_v32 = vpop.f32.mrf.mxu1 }
0x1264   : > { %6138 = vrot.lane.b32.xlu1 %v6137_v12, %s7155_s9  ;;  %v6327_v12 = vld [vmem:[#allocation19 + $0x1a8] ss:$16 sps:$4 sm:$0xff]   ;;  %v6332_v32 = vld [vmem:[#allocation19 + $0x184] ss:$16 sps:$4 sm:$0xff]   ;;  %s7026_s9 = sshll.u32 %s7158_s11, 4  ;;  %s7027_s9 = int_to_ptr.vmem [resolvable:$false] %s7026_s9 }
0x1265   : > { %v3568_v5 = vpop.f32.mrf.mxu1  ;;  %4108 = vmatprep.subr.bf16.mxu1 %v6332_v32  ;;  %v6381_v32 = vld [vmem:[#allocation22 + $0x1d0] sm:$0xff]   ;;  %p7029_p1 = scmp.lt.s32.totalorder %s8255_s8, %s7027_s9 }
0x1266   : > { %4109 = vmatpush1.bf16.msra.mxu1 %v6330_v2  ;;  %v6382_v2 = vld [vmem:[#allocation22 + $0x110] sm:$0xff]  }
0x1267   : > { %v5811_v61 = vpop.f32.mrf.mxu1 }
0x1268   : > { %v6335_v61 = vld [vmem:[#allocation19 + $0x18c] ss:$16 sps:$4 sm:$0xff]  }
0x1269   : > { %v3571_v19 = vpop.f32.mrf.mxu1 }
0x126a   : > { %v6142_v33 = vpack.i.bf16 %v3571_v19, %v3568_v5  ;;  %v6333_v5 = vld [vmem:[#allocation19 + $0x188] ss:$16 sps:$4 sm:$0xff]   ;;  %v6338_v19 = vld [vmem:[#allocation19 + $0x164] ss:$16 sps:$4 sm:$0xff]  }
0x126b   : > { %v5812_v56 = vpop.f32.mrf.mxu1  ;;  %4110 = vmatprep.subr.bf16.mxu1 %v6338_v19  ;;  %v6385_v19 = vld [vmem:[#allocation22 + $0x1c8] sm:$0xff]  }
0x126c   : > { %6143 = vrot.lane.b32.xlu0 %v6142_v33, %s7156_s20  ;;  %v6336_v33 = vld [vmem:[#allocation19 + $0x160] ss:$16 sps:$4 sm:$0xff]   ;;  %v6339_v56 = vld [vmem:[#allocation19 + $0x168] ss:$16 sps:$4 sm:$0xff]   ;;  %s8406_s20 = sld [smem:[#allocation59_spill]] }
0x126d   : > { %v3689_v14 = vpop.f32.mrf.mxu1  ;;  %4111 = vmatpush1.bf16.msra.mxu1 %v6336_v33  ;;  %v6387_v33 = vld [vmem:[#allocation22 + $0x188] sm:$0xff]  }
0x126f   : > { %v5823_v62 = vpop.f32.mrf.mxu1 }
0x1270   : > { %v6347_v62 = vld [vmem:[#allocation19 + $0x14c] ss:$16 sps:$4 sm:$0xff]  }
0x1271   : > { %v3692_v15 = vpop.f32.mrf.mxu1 }
0x1272   : > { %v6147_v24 = vpack.i.bf16 %v3692_v15, %v3689_v14  ;;  %v6344_v14 = vld [vmem:[#allocation19 + $0x144] ss:$16 sps:$4 sm:$0xff]   ;;  %v6342_v15 = vld [vmem:[#allocation19 + $0x140] ss:$16 sps:$4 sm:$0xff]  }
0x1273   : > { %v5824_v52 = vpop.f32.mrf.mxu1  ;;  %4112 = vmatprep.subr.bf16.mxu1 %v6344_v14  ;;  %v6389_v14 = vld [vmem:[#allocation22 + $0x1c0] sm:$0xff]  }
0x1274   : > { %6148 = vrot.lane.b32.xlu1 %v6147_v24, %s7154_s23  ;;  %v6345_v24 = vld [vmem:[#allocation19 + $0x148] ss:$16 sps:$4 sm:$0xff]   ;;  %v6350_v52 = vld [vmem:[#allocation19 + $0x124] ss:$16 sps:$4 sm:$0xff]   ;;  %4113 = vmatpush1.bf16.msra.mxu1 %v6342_v15  ;;  %s7022_s23 = scalar_lea.vmem %s8255_s8, 256 }
0x1275   : > { %4114 = vmatprep.subr.bf16.mxu1 %v6350_v52  ;;  %v6391_v15 = vld [vmem:[#allocation22 + $0x180] sm:$0xff]   ;;  %p7023_p11 = scmp.ne.s32.totalorder %s8255_s8, %s7022_s23 }
0x1277   : > { %p7024_p12 = pnand %p7023_p11, %p8408_p10 }
0x1279   : > { %p7025_p13 = pneg %p7024_p12 }
0x12d6   : > { %v6139_v10 = vpop.permute.xlu1 %6138 }
0x12d7   : > { %v6141_v31 = vunpack.i.h.bf16 %v6139_v10  ;;  %v6140_v26 = vunpack.i.l.bf16 %v6139_v10  ;;  %v6353_v10 = vld [vmem:[#allocation19 + $0x12c] ss:$16 sps:$4 sm:$0xff]  }
0x12d9   : > { %v3721_v37 = vsel %vm1371_vm9, %v7993_v7, %v6141_v31  ;;  %v3720_v38 = vsel %vm1371_vm9, %v7991_v35, %v6140_v26  ;;  %v6351_v31 = vld [vmem:[#allocation19 + $0x128] ss:$16 sps:$4 sm:$0xff]   ;;  %v6356_v26 = vld [vmem:[#allocation19 + $0x104] ss:$16 sps:$4 sm:$0xff]  }
0x12de   : > { %v6144_v30 = vpop.permute.xlu0 %6143 }
0x12df   : > { %v6146_v39 = vunpack.i.h.bf16 %v6144_v30  ;;  %v6145_v29 = vunpack.i.l.bf16 %v6144_v30  ;;  %v6348_v30 = vld [vmem:[#allocation19 + $0x120] ss:$16 sps:$4 sm:$0xff]  }
0x12e0   : > { %4115 = vmatpush1.bf16.msra.mxu1 %v6348_v30 }
0x12e1   : > { %v3723_v41 = vsel %vm1880_vm11, %v3721_v37, %v6146_v39  ;;  %v3722_v44 = vsel %vm1880_vm11, %v3720_v38, %v6145_v29  ;;  %v6359_v39 = vld [vmem:[#allocation19 + $0x10c] ss:$16 sps:$4 sm:$0xff]   ;;  %v6354_v29 = vld [vmem:[#allocation19 + $0x100] ss:$16 sps:$4 sm:$0xff]   ;;  %4116 = vmatprep.subr.bf16.mxu1 %v6356_v26 }
0x12e4   : > { %4117 = vmatpush1.bf16.msra.mxu1 %v6354_v29 }
0x12e6   : > { %v6149_v36 = vpop.permute.xlu1 %6148 }
0x12e7   : > { %v6151_v40 = vunpack.i.h.bf16 %v6149_v36  ;;  %v6150_v59 = vunpack.i.l.bf16 %v6149_v36  ;;  %v6357_v36 = vld [vmem:[#allocation19 + $0x108] ss:$16 sps:$4 sm:$0xff]  }
0x12e9   : > { %v3725_v8 = vsel %vm1883_vm12, %v3723_v41, %v6151_v40  ;;  %v3724_v47 = vsel %vm1883_vm12, %v3722_v44, %v6150_v59 }
0x12ea   : > { %v3726_v9 = vpack.c.bf16 %v3725_v8, %v3724_v47 }
0x12ec   : > { %5842 = vmatmul.mubr.bf16.vlgmr.msra.gmra.mxu0 %v3726_v9  ;;  %v5417_v9 = vld [vmem:[#allocation16 + $0x1] ss:$0 sm:$0xff] }
0x12ed   : > { %4177 = vmatprep.mubr.bf16.mxu0 %v7151_v0  ;;  %4146 = vmatpush1.bf16.msra.mxu0 %v6315_v51  ;;  %v6363_v51 = vld [vmem:[#allocation22 + $0x1b8] sm:$0xff]  }
0x12ee   : > { %4147 = vmatprep.subr.bf16.mxu0 %v6323_v58  ;;  %v6374_v58 = vld [vmem:[#allocation22 + $0x120] sm:$0xff]  }
0x12f1   : > { %4148 = vmatpush1.bf16.msra.mxu0 %v6321_v6  ;;  %v6376_v6 = vld [vmem:[#allocation22 + $0x158] sm:$0xff]  }
0x12f2   : > { %4149 = vmatprep.subr.bf16.mxu0 %v6329_v11  ;;  %v6378_v11 = vld [vmem:[#allocation22 + $0x118] sm:$0xff]  }
0x12f5   : > { %4150 = vmatpush1.bf16.msra.mxu0 %v6327_v12  ;;  %v6380_v12 = vld [vmem:[#allocation22 + $0x150] sm:$0xff]  }
0x12f6   : > { %4151 = vmatprep.subr.bf16.mxu0 %v6335_v61  ;;  %v6384_v61 = vld [vmem:[#allocation22 + $0x148] sm:$0xff]  }
0x12f9   : > { %4152 = vmatpush1.bf16.msra.mxu0 %v6333_v5  ;;  %v6383_v5 = vld [vmem:[#allocation22 + $0x190] sm:$0xff]  }
0x12fa   : > { %4153 = vmatprep.subr.bf16.mxu0 %v6341_v34  ;;  %v6386_v34 = vld [vmem:[#allocation22 + $0x108] sm:$0xff]  }
0x12fd   : > { %4154 = vmatpush1.bf16.msra.mxu0 %v6339_v56  ;;  %v6388_v56 = vld [vmem:[#allocation22 + $0x140] sm:$0xff]  }
0x12fe   : > { %4155 = vmatprep.subr.bf16.mxu0 %v6347_v62  ;;  %v6390_v62 = vld [vmem:[#allocation22 + $0x100] sm:$0xff]  }
0x1301   : > { %4156 = vmatpush1.bf16.msra.mxu0 %v6345_v24  ;;  %v3920_v24 = vld [vmem:[#allocation20 + $0x4] sm:$0xf] }
0x1302   : > { %4157 = vmatprep.subr.bf16.mxu0 %v6353_v10  ;;  %v3925_v52 = vrot.slane %v3920_v24, %v7601_v18  ;;  %v3933_v10 = vrot.slane %v3920_v24, %v7605_v21  ;;  %v3929_v26 = vrot.slane %v3920_v24, %v7603_v20 }
0x1305   : > { %4158 = vmatpush1.bf16.msra.mxu0 %v6351_v31 }
0x1306   : > { %4159 = vmatprep.subr.bf16.mxu0 %v6359_v39  ;;  %v3937_v39 = vrot.slane %v3920_v24, %v7608_v27 }
0x1309   : > { %4160 = vmatpush1.bf16.msra.mxu0 %v6357_v36 }
0x130a   : > { %5638 = vmatprep.subr.bf16.mxu0 %v6361_v45 }
0x13ac   : > { %v3834_v50 = vpop.f32.mrf.mxu0 }
0x13ad   : > { %v3835_v7 = vadd.f32 %v5408_v49, %v3834_v50 }
0x13ae   : > { %v5843_v53 = vpop.f32.mrf.mxu0 }
0x13af   : > { %v3841_v35 = vadd.f32 %v3835_v7, %v7936_v25  ;;  %v5418_v53 = vld [vmem:[#allocation17 + $0x1] ss:$0 sm:$0xff] }
0x13b0   : > { %v3837_v13 = vpop.f32.mrf.mxu0 }
0x13b1   : > { %v3838_v28 = vadd.f32 %v5408_v49, %v3837_v13  ;;  %3847 = vadd.xlane.f32.xlu0 %v3841_v35 }
0x13b2   : > { %v5844_v54 = vpop.f32.mrf.mxu0 }
0x13b3   : > { %v3842_v43 = vadd.f32 %v3838_v28, %v7938_v16 }
0x13b5   : > { %3849 = vadd.xlane.f32.xlu1 %v3842_v43 }
0x143a   : > { %v3848_v0 = vpop.xlane.xlu0 %3847 }
0x143b   : > { %v3851_v63 = vmul.f32 0.0078125, %v3848_v0  ;;  %v6365_v0 = vld [vmem:[#allocation22 + $0x1f0] sm:$0xff]  }
0x143d   : > { %v8050_v42 = vsub.f32 %v3841_v35, %v3851_v63  ;;  %v6366_v63 = vld [vmem:[#allocation22 + $0x130] sm:$0xff]  }
0x143e   : > { %v3850_v25 = vpop.xlane.xlu1 %3849 }
0x143f   : > { %v3852_v3 = vmul.f32 0.0078125, %v3850_v25  ;;  %v3855_v17 = vmul.f32 %v8050_v42, %v8050_v42  ;;  %v6368_v25 = vld [vmem:[#allocation22 + $0x168] sm:$0xff]  }
0x1441   : > { %v8054_v60 = vsub.f32 %v3842_v43, %v3852_v3  ;;  %3857 = vadd.xlane.f32.xlu0 %v3855_v17  ;;  %v6360_v43 = vld [vmem:[#allocation22 + $0x178] sm:$0xff]   ;;  %v6369_v3 = vld [vmem:[#allocation22 + $0x1e8] sm:$0xff]  }
0x1442   : > { %5616 = vmatprep.subr.bf16.mxu1 %v6360_v43  ;;  %v6370_v17 = vld [vmem:[#allocation22 + $0x128] sm:$0xff]  }
0x1443   : > { %v3856_v16 = vmul.f32 %v8054_v60, %v8054_v60 }
0x1445   : > { %3859 = vadd.xlane.f32.xlu0 %v3856_v16  ;;  %v6372_v16 = vld [vmem:[#allocation22 + $0x160] sm:$0xff]  }
0x14ca   : > { %v3858_v37 = vpop.xlane.xlu0 %3857 }
0x14cb   : > { %v3861_v38 = vmul.f32 0.0078125, %v3858_v37 }
0x14cd   : > { %v3863_v40 = vadd.f32 1e-05, %v3861_v38 }
0x14ce   : > { %v3860_v59 = vpop.xlane.xlu0 %3859 }
0x14cf   : > { %6508 = vrsqrt.f32 %v3863_v40  ;;  %v3862_v41 = vmul.f32 0.0078125, %v3860_v59 }
0x14d1   : > { %v3864_v44 = vadd.f32 1e-05, %v3862_v41 }
0x14d3   : > { %6510 = vrsqrt.f32 %v3864_v44 }
0x14dc   : > { %v6509_v8 = vpop.eup %6508 }
0x14dd   : > { %v3867_v47 = vmul.f32 %v6509_v8, %v8050_v42  ;;  %v6367_v42 = vld [vmem:[#allocation22 + $0x1b0] sm:$0xff]  }
0x14df   : > { %v3875_v7 = vmul.f32 %v5417_v9, %v3867_v47 }
0x14e0   : > { %v6511_v49 = vpop.eup %6510 }
0x14e1   : > { %v3868_v50 = vmul.f32 %v6511_v49, %v8054_v60  ;;  %v8060_v13 = vadd.f32 %v5418_v53, %v3875_v7  ;;  %v6371_v60 = vld [vmem:[#allocation22 + $0x1a8] sm:$0xff]  }
0x14e3   : > { %v3876_v35 = vmul.f32 %v5417_v9, %v3868_v50 }
0x14e5   : > { %v8062_v28 = vadd.f32 %v5418_v53, %v3876_v35 }
0x14e7   : > { %v3885_v54 = vpack.c.bf16 %v8062_v28, %v8060_v13 }
0x14e9   : > { %4135 = vmatmul.mubr.bf16.vlgmr.msra.gmra.mxu1 %v3885_v54  ;;  %4178 = vmatmul.mubr.bf16.vlgmr.msra.gmra.mxu0 %v3885_v54 }
0x14ea   : > { %5617 = vmatpush3.bf16.msra.mxu1 %v6362_v57  ;;  %5639 = vmatpush3.bf16.msra.mxu0 %v6363_v51 }
0x14eb   : > { %5618 = vmatprep.subr.bf16.mxu1 %v6364_v4  ;;  %5640 = vmatprep.subr.bf16.mxu0 %v6365_v0 }
0x14ee   : > { %5619 = vmatpush3.bf16.msra.mxu1 %v6366_v63  ;;  %5641 = vmatpush3.bf16.msra.mxu0 %v6367_v42 }
0x14ef   : > { %5620 = vmatprep.subr.bf16.mxu1 %v6368_v25  ;;  %5642 = vmatprep.subr.bf16.mxu0 %v6369_v3 }
0x14f2   : > { %5621 = vmatpush3.bf16.msra.mxu1 %v6370_v17  ;;  %5643 = vmatpush3.bf16.msra.mxu0 %v6371_v60 }
0x14f3   : > { %5622 = vmatprep.subr.bf16.mxu1 %v6372_v16  ;;  %5644 = vmatprep.subr.bf16.mxu0 %v6373_v22 }
0x14f6   : > { %5623 = vmatpush3.bf16.msra.mxu1 %v6374_v58  ;;  %5645 = vmatpush3.bf16.msra.mxu0 %v6375_v55 }
0x14f7   : > { %5624 = vmatprep.subr.bf16.mxu1 %v6376_v6  ;;  %5646 = vmatprep.subr.bf16.mxu0 %v6377_v46 }
0x14fa   : > { %5625 = vmatpush3.bf16.msra.mxu1 %v6378_v11  ;;  %5647 = vmatpush3.bf16.msra.mxu0 %v6379_v23 }
0x14fb   : > { %5626 = vmatprep.subr.bf16.mxu1 %v6380_v12  ;;  %5648 = vmatprep.subr.bf16.mxu0 %v6381_v32 }
0x14fe   : > { %5627 = vmatpush3.bf16.msra.mxu1 %v6382_v2  ;;  %5649 = vmatpush3.bf16.msra.mxu0 %v6383_v5 }
0x14ff   : > { %5628 = vmatprep.subr.bf16.mxu1 %v6384_v61  ;;  %5650 = vmatprep.subr.bf16.mxu0 %v6385_v19 }
0x1502   : > { %5629 = vmatpush3.bf16.msra.mxu1 %v6386_v34  ;;  %5651 = vmatpush3.bf16.msra.mxu0 %v6387_v33 }
0x1503   : > { %5630 = vmatprep.subr.bf16.mxu1 %v6388_v56  ;;  %5652 = vmatprep.subr.bf16.mxu0 %v6389_v14 }
0x1506   : > { %5631 = vmatpush3.bf16.msra.mxu1 %v6390_v62  ;;  %5653 = vmatpush3.bf16.msra.mxu0 %v6391_v15 }
0x1507   : > { %5845 = vmatprep.subr.bf16.mxu1 %v7152_v1 }
0x15a9   : > { %v4136_v30 = vpop.f32.mrf.mxu1  ;;  %v4179_v31 = vpop.f32.mrf.mxu0 }
0x15aa   : > { %v8071_v29 = vadd.f32 %v4136_v30, %v3925_v52  ;;  %v8073_v36 = vadd.f32 %v4179_v31, %v3933_v10 }
0x15ab   : > { %v4138_v37 = vpop.f32.mrf.mxu1  ;;  %v4181_v38 = vpop.f32.mrf.mxu0 }
0x15ac   : > { %v8076_v40 = vmul.f32 0.70710677, %v8071_v29  ;;  %v8079_v59 = vmul.f32 0.70710677, %v8073_v36  ;;  %v8081_v18 = vadd.f32 %v4138_v37, %v3929_v26  ;;  %v8083_v21 = vadd.f32 %v4181_v38, %v3937_v39 }
0x15ad   : > { %v4140_v44 = vpop.f32.mrf.mxu1  ;;  %v4183_v35 = vpop.f32.mrf.mxu0 }
0x15ae   : > { %v4220_v20 = vand.u32 2147483647, %v8076_v40  ;;  %v8087_v27 = vand.u32 2147483647, %v8079_v59  ;;  %v8090_v41 = vmul.f32 0.70710677, %v8081_v18  ;;  %v8098_v57 = vadd.f32 %v4140_v44, %v3925_v52 }
0x15af   : > { %v8095_v49 = vmul.f32 0.70710677, %v8083_v21  ;;  %v4142_v54 = vpop.f32.mrf.mxu1  ;;  %v8100_v51 = vadd.f32 %v4183_v35, %v3933_v10  ;;  %v4185_v60 = vpop.f32.mrf.mxu0  ;;  %vm4204_vm5 = vcmp.ge.f32.partialorder %v8076_v40, 0.0  ;;  %vm4206_vm7 = vcmp.ge.f32.partialorder %v8079_v59, 0.0 }
0x15b0   : > { %v4228_v8 = vmul.f32 0.3275911, %v4220_v20  ;;  %v4230_v47 = vmul.f32 0.3275911, %v8087_v27  ;;  %v4221_v9 = vand.u32 2147483647, %v8090_v41  ;;  %v8102_v4 = vadd.f32 %v4142_v54, %v3929_v26 }
0x15b1   : > { %v4223_v45 = vand.u32 2147483647, %v8095_v49  ;;  %v8105_v63 = vmul.f32 0.70710677, %v8098_v57  ;;  %v8108_v25 = vmul.f32 0.70710677, %v8100_v51  ;;  %v8116_v55 = vadd.f32 %v4185_v60, %v3937_v39 }
0x15b2   : > { %v4236_v50 = vadd.f32 1.0, %v4228_v8  ;;  %v4238_v7 = vadd.f32 1.0, %v4230_v47  ;;  %v4229_v53 = vmul.f32 0.3275911, %v4221_v9  ;;  %v8112_v17 = vmul.f32 0.70710677, %v8102_v4 }
0x15b3   : > { %v4231_v0 = vmul.f32 0.3275911, %v4223_v45  ;;  %v4224_v3 = vand.u32 2147483647, %v8105_v63  ;;  %v4226_v22 = vand.u32 2147483647, %v8108_v25 }
0x15b4   : > { %6512 = vrcp.f32 %v4236_v50  ;;  %v4237_v43 = vadd.f32 1.0, %v4229_v53  ;;  %v4225_v58 = vand.u32 2147483647, %v8112_v17  ;;  %v4332_v32 = vsub.f32 0.0, %v4220_v20 }
0x15b5   : > { %6514 = vrcp.f32 %v4238_v7  ;;  %v4239_v42 = vadd.f32 1.0, %v4231_v0  ;;  %v4232_v16 = vmul.f32 0.3275911, %v4224_v3  ;;  %v4234_v46 = vmul.f32 0.3275911, %v4226_v22 }
0x15b6   : > { %6516 = vrcp.f32 %v4237_v43  ;;  %v4233_v11 = vmul.f32 0.3275911, %v4225_v58  ;;  %v8121_v5 = vmul.f32 0.70710677, %v8116_v55  ;;  %v4333_v33 = vsub.f32 0.0, %v4221_v9 }
0x15b7   : > { %6518 = vrcp.f32 %v4239_v42  ;;  %v4240_v6 = vadd.f32 1.0, %v4232_v16  ;;  %v4242_v23 = vadd.f32 1.0, %v4234_v46  ;;  %v4336_v14 = vsub.f32 0.0, %v4224_v3 }
0x15b8   : > { %v4241_v2 = vadd.f32 1.0, %v4233_v11  ;;  %v8128_v62 = vand.u32 2147483647, %v8121_v5  ;;  %v4340_v24 = vmul.f32 %v4332_v32, %v4220_v20  ;;  %v4334_v39 = vsub.f32 0.0, %v8087_v27 }
0x15b9   : > { %6520 = vrcp.f32 %v4240_v6  ;;  %v4341_v37 = vmul.f32 %v4333_v33, %v4221_v9  ;;  %v4335_v38 = vsub.f32 0.0, %v4223_v45  ;;  %v4344_v50 = vmul.f32 %v4336_v14, %v4224_v3 }
0x15ba   : > { %6522 = vrcp.f32 %v4242_v23  ;;  %v4235_v31 = vmul.f32 0.3275911, %v8128_v62  ;;  %v4348_v7 = vmul.f32 1.442695, %v4340_v24  ;;  %v4338_v35 = vsub.f32 0.0, %v4226_v22 }
0x15bb   : > { %6524 = vrcp.f32 %v4241_v2  ;;  %v4337_v54 = vsub.f32 0.0, %v4225_v58  ;;  %v4342_v9 = vmul.f32 %v4334_v39, %v8087_v27  ;;  %v4350_v60 = vmul.f32 1.442695, %v4341_v37 }
0x15bc   : > { %v4243_v20 = vadd.f32 1.0, %v4235_v31  ;;  %v4343_v6 = vmul.f32 %v4335_v38, %v4223_v45  ;;  %v4356_v11 = vmul.f32 1.442695, %v4344_v50  ;;  %v4346_v32 = vmul.f32 %v4338_v35, %v4226_v22 }
0x15bd   : > { %v4345_v2 = vmul.f32 %v4337_v54, %v4225_v58  ;;  %v4352_v27 = vmul.f32 1.442695, %v4342_v9  ;;  %vm4205_vm6 = vcmp.ge.f32.partialorder %v8090_v41, 0.0  ;;  %vm4208_vm9 = vcmp.ge.f32.partialorder %v8105_v63, 0.0 }
0x15be   : > { %6526 = vrcp.f32 %v4243_v20  ;;  %v4354_v45 = vmul.f32 1.442695, %v4343_v6  ;;  %v4360_v31 = vmul.f32 1.442695, %v4346_v32  ;;  %v4216_v63 = vsel %vm4208_vm9, 1.0, %v7157_v48 }
0x15bf   : > { %6528 = vpow2.f32 %v4348_v7  ;;  %vm4207_vm10 = vcmp.ge.f32.partialorder %v8095_v49, 0.0  ;;  %vm4210_vm11 = vcmp.ge.f32.partialorder %v8108_v25, 0.0  ;;  %vm4209_vm12 = vcmp.ge.f32.partialorder %v8112_v17, 0.0 }
0x15c0   : > { %6530 = vpow2.f32 %v4350_v60  ;;  %v4215_v49 = vsel %vm4207_vm10, 1.0, %v7157_v48  ;;  %v4218_v25 = vsel %vm4210_vm11, 1.0, %v7157_v48  ;;  %vm4211_vm13 = vcmp.ge.f32.partialorder %v8121_v5, 0.0 }
0x15c1   : > { %v8118_v12 = vpop.eup %6512  ;;  %6532 = vpow2.f32 %v4356_v11 }
0x15c2   : > { %v8123_v61 = vpop.eup %6514  ;;  %v4260_v19 = vmul.f32 1.0614054, %v8118_v12  ;;  %6534 = vpow2.f32 %v4352_v27 }
0x15c3   : > { %v4262_v34 = vmul.f32 1.0614054, %v8123_v61  ;;  %v8130_v15 = vpop.eup %6516  ;;  %6536 = vpow2.f32 %v4354_v45 }
0x15c4   : > { %v4268_v56 = vadd.f32 -1.4531521, %v4260_v19  ;;  %v4261_v30 = vmul.f32 1.0614054, %v8130_v15  ;;  %v8137_v44 = vpop.eup %6518  ;;  %6538 = vpow2.f32 %v4360_v31 }
0x15c5   : > { %v4270_v52 = vadd.f32 -1.4531521, %v4262_v34  ;;  %v4263_v53 = vmul.f32 1.0614054, %v8137_v44 }
0x15c6   : > { %v4276_v10 = vmul.f32 %v8118_v12, %v4268_v56  ;;  %v4269_v47 = vadd.f32 -1.4531521, %v4261_v30  ;;  %v8143_v3 = vpop.eup %6520  ;;  %v4339_v30 = vsub.f32 0.0, %v8128_v62 }
0x15c7   : > { %v4278_v26 = vmul.f32 %v8123_v61, %v4270_v52  ;;  %v4271_v16 = vadd.f32 -1.4531521, %v4263_v53  ;;  %v4264_v56 = vmul.f32 1.0614054, %v8143_v3  ;;  %v8149_v24 = vpop.eup %6522 }
0x15c8   : > { %v4284_v8 = vadd.f32 1.4214138, %v4276_v10  ;;  %v4277_v42 = vmul.f32 %v8130_v15, %v4269_v47  ;;  %v4266_v58 = vmul.f32 1.0614054, %v8149_v24  ;;  %v8154_v39 = vpop.eup %6524  ;;  %v4347_v35 = vmul.f32 %v4339_v30, %v8128_v62 }
0x15c9   : > { %v4286_v0 = vadd.f32 1.4214138, %v4278_v26  ;;  %v4279_v23 = vmul.f32 %v8137_v44, %v4271_v16  ;;  %v4272_v10 = vadd.f32 -1.4531521, %v4264_v56  ;;  %v4358_v26 = vmul.f32 1.442695, %v4345_v2 }
0x15ca   : > { %v4292_v43 = vmul.f32 %v8118_v12, %v4284_v8  ;;  %v4285_v46 = vadd.f32 1.4214138, %v4277_v42  ;;  %v4274_v20 = vadd.f32 -1.4531521, %v4266_v58  ;;  %v4265_v7 = vmul.f32 1.0614054, %v8154_v39 }
0x15cb   : > { %v4294_v34 = vmul.f32 %v8123_v61, %v4286_v0  ;;  %v4287_v14 = vadd.f32 1.4214138, %v4279_v23  ;;  %v4280_v47 = vmul.f32 %v8143_v3, %v4272_v10  ;;  %v8164_v16 = vpop.eup %6526  ;;  %6540 = vpow2.f32 %v4358_v26 }
0x15cc   : > { %v4300_v19 = vadd.f32 -0.28449672, %v4292_v43  ;;  %v4293_v33 = vmul.f32 %v8130_v15, %v4285_v46  ;;  %v4282_v43 = vmul.f32 %v8149_v24, %v4274_v20  ;;  %v4273_v0 = vadd.f32 -1.4531521, %v4265_v7 }
0x15cd   : > { %v4295_v22 = vmul.f32 %v8137_v44, %v4287_v14  ;;  %v4302_v38 = vadd.f32 -0.28449672, %v4294_v34  ;;  %v4288_v53 = vadd.f32 1.4214138, %v4280_v47  ;;  %v4267_v62 = vmul.f32 1.0614054, %v8164_v16 }
0x15ce   : > { %v4301_v52 = vadd.f32 -0.28449672, %v4293_v33  ;;  %v4308_v37 = vmul.f32 %v8118_v12, %v4300_v19  ;;  %v4290_v46 = vadd.f32 1.4214138, %v4282_v43  ;;  %v4281_v11 = vmul.f32 %v8154_v39, %v4273_v0  ;;  %v6529_v33 = vpop.eup %6528 }
0x15cf   : > { %v4303_v50 = vadd.f32 -0.28449672, %v4295_v22  ;;  %v4296_v60 = vmul.f32 %v8143_v3, %v4288_v53  ;;  %v4310_v6 = vmul.f32 %v8123_v61, %v4302_v38  ;;  %v4362_v32 = vmul.f32 1.442695, %v4347_v35  ;;  %v6531_v22 = vpop.eup %6530 }
0x15d0   : > { %v4309_v8 = vmul.f32 %v8130_v15, %v4301_v52  ;;  %v4316_v42 = vadd.f32 0.2548296, %v4308_v37  ;;  %v4298_v19 = vmul.f32 %v8149_v24, %v4290_v46  ;;  %v4289_v34 = vadd.f32 1.4214138, %v4281_v11  ;;  %v6533_v31 = vpop.eup %6532 }
0x15d1   : > { %v4311_v9 = vmul.f32 %v8137_v44, %v4303_v50  ;;  %v4304_v23 = vadd.f32 -0.28449672, %v4296_v60  ;;  %v4275_v45 = vadd.f32 -1.4531521, %v4267_v62  ;;  %v4318_v52 = vadd.f32 0.2548296, %v4310_v6  ;;  %v6535_v35 = vpop.eup %6534 }
0x15d2   : > { %v4317_v54 = vadd.f32 0.2548296, %v4309_v8  ;;  %v4324_v56 = vmul.f32 %v8118_v12, %v4316_v42  ;;  %v4306_v10 = vadd.f32 -0.28449672, %v4298_v19  ;;  %v4297_v30 = vmul.f32 %v8154_v39, %v4289_v34  ;;  %v6537_v0 = vpop.eup %6536 }
0x15d3   : > { %v4319_v27 = vadd.f32 0.2548296, %v4311_v9  ;;  %v4312_v14 = vmul.f32 %v8143_v3, %v4304_v23  ;;  %6542 = vpow2.f32 %v4362_v32  ;;  %v4326_v20 = vmul.f32 %v8123_v61, %v4318_v52  ;;  %v6539_v60 = vpop.eup %6538 }
0x15d4   : > { %v4325_v2 = vmul.f32 %v8130_v15, %v4317_v54  ;;  %v4283_v15 = vmul.f32 %v8164_v16, %v4275_v45  ;;  %v4314_v12 = vmul.f32 %v8149_v24, %v4306_v10  ;;  %v4305_v37 = vadd.f32 -0.28449672, %v4297_v30 }
0x15d5   : > { %v4320_v58 = vadd.f32 0.2548296, %v4312_v14  ;;  %v4364_v38 = vmul.f32 %v6529_v33, %v4324_v56  ;;  %v4327_v8 = vmul.f32 %v8137_v44, %v4319_v27  ;;  %v4212_v54 = vsel %vm4204_vm5, 1.0, %v7157_v48 }
0x15d6   : > { %v4365_v26 = vmul.f32 %v6531_v22, %v4325_v2  ;;  %v4291_v50 = vadd.f32 1.4214138, %v4283_v15  ;;  %v4322_v7 = vadd.f32 0.2548296, %v4314_v12  ;;  %v4313_v53 = vmul.f32 %v8154_v39, %v4305_v37 }
0x15d7   : > { %v4328_v47 = vmul.f32 %v8143_v3, %v4320_v58  ;;  %v4213_v3 = vsel %vm4205_vm6, 1.0, %v7157_v48  ;;  %v4372_v6 = vsub.f32 1.0, %v4364_v38  ;;  %v4367_v46 = vmul.f32 %v6537_v0, %v4327_v8 }
0x15d8   : > { %v4299_v44 = vmul.f32 %v8164_v16, %v4291_v50  ;;  %v4373_v42 = vsub.f32 1.0, %v4365_v26  ;;  %v4330_v61 = vmul.f32 %v8149_v24, %v4322_v7  ;;  %v4321_v9 = vadd.f32 0.2548296, %v4313_v53  ;;  %v6541_v2 = vpop.eup %6540 }
0x15d9   : > { %v4368_v43 = vmul.f32 %v6533_v31, %v4328_v47  ;;  %v4366_v23 = vmul.f32 %v6535_v35, %v4326_v20  ;;  %v4380_v56 = vmul.f32 %v4372_v6, %v4212_v54  ;;  %v4375_v27 = vsub.f32 1.0, %v4367_v46 }
0x15da   : > { %v4307_v40 = vadd.f32 -0.28449672, %v4299_v44  ;;  %v4370_v62 = vmul.f32 %v6539_v60, %v4330_v61  ;;  %v4329_v32 = vmul.f32 %v8154_v39, %v4321_v9  ;;  %v4381_v19 = vmul.f32 %v4373_v42, %v4213_v3 }
0x15db   : > { %v4376_v11 = vsub.f32 1.0, %v4368_v43  ;;  %v4214_v39 = vsel %vm4206_vm7, 1.0, %v7157_v48  ;;  %v4374_v45 = vsub.f32 1.0, %v4366_v23  ;;  %v4217_v30 = vsel %vm4209_vm12, 1.0, %v7157_v48  ;;  %v5451_v23 = vld [vmem:[#allocation23 + $0x1] ss:$0 sm:$0xff] }
0x15dc   : > { %v4315_v24 = vmul.f32 %v8164_v16, %v4307_v40  ;;  %v4378_v34 = vsub.f32 1.0, %v4370_v62  ;;  %v4369_v33 = vmul.f32 %v6541_v2, %v4329_v32  ;;  %v4389_v58 = vadd.f32 1.0, %v4381_v19 }
0x15dd   : > { %v4384_v41 = vmul.f32 %v4376_v11, %v4216_v63  ;;  %v4192_v15 = vmul.f32 0.5, %v8098_v57  ;;  %v4388_v12 = vadd.f32 1.0, %v4380_v56  ;;  %v4383_v59 = vmul.f32 %v4375_v27, %v4215_v49 }
0x15de   : > { %v4323_v14 = vadd.f32 0.2548296, %v4315_v24  ;;  %v4377_v52 = vsub.f32 1.0, %v4369_v33  ;;  %v4386_v31 = vmul.f32 %v4378_v34, %v4218_v25  ;;  %v4382_v38 = vmul.f32 %v4374_v45, %v4214_v39 }
0x15df   : > { %v4392_v10 = vadd.f32 1.0, %v4384_v41  ;;  %v4189_v8 = vmul.f32 0.5, %v8081_v18  ;;  %v4193_v47 = vmul.f32 0.5, %v8102_v4  ;;  %v4188_v20 = vmul.f32 0.5, %v8071_v29 }
0x15e0   : > { %v4331_v22 = vmul.f32 %v8164_v16, %v4323_v14  ;;  %v6543_v17 = vpop.eup %6542  ;;  %v4385_v26 = vmul.f32 %v4377_v52, %v4217_v30  ;;  %v4394_v35 = vadd.f32 1.0, %v4386_v31  ;;  %v4219_v54 = vsel %vm4211_vm13, 1.0, %v7157_v48 }
0x15e1   : > { %v4400_v16 = vmul.f32 %v4392_v10, %v4192_v15  ;;  %v4397_v53 = vmul.f32 %v4389_v58, %v4189_v8  ;;  %v4396_v43 = vmul.f32 %v4388_v12, %v4188_v20  ;;  %v4391_v44 = vadd.f32 1.0, %v4383_v59  ;;  %v5485_v8 = vld [vmem:[#allocation26 + $0x1] ss:$0 sm:$0xff] }
0x15e2   : > { %v4371_v37 = vmul.f32 %v6543_v17, %v4331_v22  ;;  %v4393_v50 = vadd.f32 1.0, %v4385_v26  ;;  %v4390_v5 = vadd.f32 1.0, %v4382_v38  ;;  %v4194_v3 = vmul.f32 0.5, %v8100_v51 }
0x15e3   : > { %v4191_v18 = vmul.f32 0.5, %v8083_v21  ;;  %v4404_v4 = vpack.c.bf16 %v4400_v16, %v4396_v43  ;;  %v4195_v61 = vmul.f32 0.5, %v8116_v55  ;;  %v4190_v9 = vmul.f32 0.5, %v8073_v36 }
0x15e4   : > { %v4379_v7 = vsub.f32 1.0, %v4371_v37  ;;  %v4401_v57 = vmul.f32 %v4393_v50, %v4193_v47  ;;  %v4402_v60 = vmul.f32 %v4394_v35, %v4194_v3  ;;  %v5484_v37 = vld [vmem:[#allocation25 + $0x1] ss:$0 sm:$0xff]  ;;  %v6392_v35 = vld [vmem:[%s8405_s25 + $0x38] sm:$0xff]  }
0x15e5   : > { %v4399_v6 = vmul.f32 %v4391_v44, %v4191_v18  ;;  %v4398_v48 = vmul.f32 %v4390_v5, %v4190_v9  ;;  %v6393_v18 = vld [vmem:[%s8405_s25 + $0x30] sm:$0xff]  }
0x15e6   : > { %v4387_v0 = vmul.f32 %v4379_v7, %v4219_v54  ;;  %v4405_v42 = vpack.c.bf16 %v4401_v57, %v4397_v53  ;;  %v6397_v9 = vld [vmem:[%s8405_s25 + $0x10] sm:$0xff]  }
0x15e7   : > { %v4406_v51 = vpack.c.bf16 %v4402_v60, %v4398_v48  ;;  %v6398_v60 = vld [vmem:[%s8405_s25 + $0x8] sm:$0xff]  }
0x15e8   : > { %v4395_v29 = vadd.f32 1.0, %v4387_v0  ;;  %4705 = vmatprep.mubr.bf16.mxu1 %v4405_v42 }
0x15e9   : > { %4706 = vmatmul.mubr.bf16.vlgmr.msra.gmra.mxu1 %v4404_v4  ;;  %v6394_v4 = vld [vmem:[%s8405_s25 + $0x28] sm:$0xff]  }
0x15ea   : > { %v4403_v46 = vmul.f32 %v4395_v29, %v4195_v61  ;;  %5861 = vmatprep.mubr.msk.bf16.mxu1 %vm7153_vm8, %v7152_v1  ;;  %5846 = vmatpush3.bf16.msra.mxu1 %v6392_v35  ;;  %v6395_v61 = vld [vmem:[%s8405_s25 + $0x20] sm:$0xff]   ;;  %v6396_v29 = vld [vmem:[%s8405_s25 + $0x18] sm:$0xff]  }
0x15eb   : > { %5847 = vmatprep.subr.bf16.mxu1 %v7152_v1 }
0x15ec   : > { %v4407_v11 = vpack.c.bf16 %v4403_v46, %v4399_v6  ;;  %v6399_v6 = vld [vmem:[%s8405_s25] sm:$0xff]  }
0x15ee   : > { %4746 = vmatprep.mubr.bf16.mxu0 %v4407_v11  ;;  %5848 = vmatpush3.bf16.msra.mxu1 %v6393_v18 }
0x15ef   : > { %4747 = vmatmul.mubr.bf16.vlgmr.msra.gmra.mxu0 %v4406_v51  ;;  %5849 = vmatprep.subr.bf16.mxu1 %v7152_v1 }
0x15f2   : > { %5850 = vmatpush3.bf16.msra.mxu1 %v6394_v4 }
0x15f3   : > { %5851 = vmatprep.subr.bf16.mxu1 %v7152_v1 }
0x15f6   : > { %5852 = vmatpush3.bf16.msra.mxu1 %v6395_v61 }
0x15f7   : > { %5853 = vmatprep.subr.bf16.mxu1 %v7152_v1 }
0x15fa   : > { %5854 = vmatpush3.bf16.msra.mxu1 %v6396_v29 }
0x15fb   : > { %5855 = vmatprep.subr.bf16.mxu1 %v7152_v1 }
0x15fe   : > { %5856 = vmatpush3.bf16.msra.mxu1 %v6397_v9 }
0x15ff   : > { %5857 = vmatprep.subr.bf16.mxu1 %v7152_v1 }
0x1602   : > { %5858 = vmatpush3.bf16.msra.mxu1 %v6398_v60 }
0x1603   : > { %5859 = vmatprep.subr.bf16.mxu1 %v7152_v1 }
0x1606   : > { %5860 = vmatpush3.bf16.msra.mxu1 %v6399_v6 }
0x16a9   : > { %v5632_v21 = vpop.f32.mrf.mxu1 }
0x16ab   : > { %v5633_v40 = vpop.f32.mrf.mxu1 }
0x16ac   : > { %v5634_v55 = vadd.f32 %v5633_v40, %v5632_v21 }
0x16ad   : > { %v5635_v63 = vpop.f32.mrf.mxu1 }
0x16ae   : > { %v4708_v36 = vadd.f32 %v5634_v55, %v5451_v23 }
0x16af   : > { %v5654_v62 = vpop.f32.mrf.mxu0  ;;  %v5636_v32 = vpop.f32.mrf.mxu1 }
0x16b0   : > { %v5637_v41 = vadd.f32 %v5636_v32, %v5635_v63  ;;  %v5486_v63 = vld [vmem:[#allocation28] ss:$0 sm:$0xff] }
0x16b1   : > { %v5655_v2 = vpop.f32.mrf.mxu0 }
0x16b2   : > { %v5656_v24 = vadd.f32 %v5655_v2, %v5654_v62  ;;  %v4711_v33 = vadd.f32 %v5637_v41, %v5451_v23  ;;  %v5487_v2 = vld [vmem:[#allocation29] ss:$0 sm:$0xff] }
0x16b3   : > { %v5657_v19 = vpop.f32.mrf.mxu0 }
0x16b4   : > { %v4749_v34 = vadd.f32 %v5656_v24, %v4708_v36 }
0x16b5   : > { %v5658_v56 = vpop.f32.mrf.mxu0 }
0x16b6   : > { %v5659_v27 = vadd.f32 %v5658_v56, %v5657_v19  ;;  %v4755_v14 = vadd.f32 %v4749_v34, %v8060_v13  ;;  %v5488_v34 = vld [vmem:[%s8406_s20] ss:$0 sm:$0xff]  ;;  %s7028_s20 = scalar_lea.vmem %s7027_s9, 512 }
0x16b7   : > { %p7030_p4 = scmp.lt.s32.totalorder %s7028_s20, %s7022_s23 }
0x16b8   : > { %v4752_v39 = vadd.f32 %v5659_v27, %v4711_v33  ;;  %4761 = vadd.xlane.f32.xlu1 %v4755_v14 }
0x16b9   : > { %p7031_p5 = por %p7030_p4, %p7029_p1 }
0x16ba   : > { %v4756_v45 = vadd.f32 %v4752_v39, %v8062_v28 }
0x16bb   : > { %p7032_p8 = pnand %p7031_p5, %p7025_p13 }
0x16bc   : > { %4763 = vadd.xlane.f32.xlu0 %v4756_v45 }
0x1741   : > { %v4762_v49 = vpop.xlane.xlu1 %4761 }
0x1742   : > { %v4765_v52 = vmul.f32 0.0078125, %v4762_v49 }
0x1744   : > { %v4767_v10 = vsub.f32 %v4755_v14, %v4765_v52 }
0x1745   : > { %v4764_v25 = vpop.xlane.xlu0 %4763 }
0x1746   : > { %v4766_v30 = vmul.f32 0.0078125, %v4764_v25  ;;  %v4769_v22 = vmul.f32 %v4767_v10, %v4767_v10 }
0x1748   : > { %v4768_v17 = vsub.f32 %v4756_v45, %v4766_v30  ;;  %4771 = vadd.xlane.f32.xlu1 %v4769_v22 }
0x174a   : > { %v4770_v58 = vmul.f32 %v4768_v17, %v4768_v17 }
0x174c   : > { %4773 = vadd.xlane.f32.xlu0 %v4770_v58 }
0x17d1   : > { %v4772_v15 = vpop.xlane.xlu1 %4771 }
0x17d2   : > { %v4775_v31 = vmul.f32 0.0078125, %v4772_v15 }
0x17d4   : > { %v4777_v26 = vadd.f32 1e-05, %v4775_v31 }
0x17d5   : > { %v4774_v12 = vpop.xlane.xlu0 %4773 }
0x17d6   : > { %6544 = vrsqrt.f32 %v4777_v26  ;;  %v4776_v13 = vmul.f32 0.0078125, %v4774_v12 }
0x17d8   : > { %v4778_v59 = vadd.f32 1e-05, %v4776_v13 }
0x17da   : > { %6546 = vrsqrt.f32 %v4778_v59 }
0x17e3   : > { %v6545_v28 = vpop.eup %6544 }
0x17e4   : > { %v4781_v38 = vmul.f32 %v6545_v28, %v4767_v10 }
0x17e6   : > { %v4789_v47 = vmul.f32 %v5484_v37, %v4781_v38 }
0x17e7   : > { %v6547_v50 = vpop.eup %6546 }
0x17e8   : > { %v4797_v20 = vadd.f32 %v5485_v8, %v4789_v47  ;;  %v4782_v16 = vmul.f32 %v6547_v50, %v4768_v17 }
0x17ea   : > { %4801 = vadd.xlane.f32.xlu1 %v4797_v20  ;;  %v4790_v7 = vmul.f32 %v5484_v37, %v4782_v16 }
0x17ec   : > { %v4798_v53 = vadd.f32 %v5485_v8, %v4790_v7 }
0x17ee   : > { %4803 = vadd.xlane.f32.xlu0 %v4798_v53 }
0x1873   : > { %v4802_v57 = vpop.xlane.xlu1 %4801 }
0x1874   : > { %v4805_v54 = vmul.f32 0.0078125, %v4802_v57 }
0x1876   : > { %v4807_v43 = vsub.f32 %v4797_v20, %v4805_v54 }
0x1877   : > { %v4804_v44 = vpop.xlane.xlu0 %4803 }
0x1878   : > { %v4806_v0 = vmul.f32 0.0078125, %v4804_v44  ;;  %v4809_v5 = vmul.f32 %v4807_v43, %v4807_v43 }
0x187a   : > { %v4808_v3 = vsub.f32 %v4798_v53, %v4806_v0  ;;  %4811 = vadd.xlane.f32.xlu1 %v4809_v5 }
0x187c   : > { %v4810_v42 = vmul.f32 %v4808_v3, %v4808_v3 }
0x187e   : > { %4813 = vadd.xlane.f32.xlu0 %v4810_v42 }
0x1903   : > { %v4812_v46 = vpop.xlane.xlu1 %4811 }
0x1904   : > { %v4815_v48 = vmul.f32 0.0078125, %v4812_v46 }
0x1906   : > { %v4817_v11 = vadd.f32 1e-05, %v4815_v48 }
0x1907   : > { %v4814_v51 = vpop.xlane.xlu0 %4813 }
0x1908   : > { %6548 = vrsqrt.f32 %v4817_v11  ;;  %v4816_v21 = vmul.f32 0.0078125, %v4814_v51 }
0x190a   : > { %v4818_v40 = vadd.f32 1e-05, %v4816_v21 }
0x190c   : > { %6550 = vrsqrt.f32 %v4818_v40 }
0x1915   : > { %v6549_v23 = vpop.eup %6548 }
0x1916   : > { %v4821_v55 = vmul.f32 %v6549_v23, %v4807_v43 }
0x1918   : > { %v4829_v32 = vmul.f32 %v5486_v63, %v4821_v55 }
0x1919   : > { %v6551_v62 = vpop.eup %6550 }
0x191a   : > { %v4822_v36 = vmul.f32 %v6551_v62, %v4808_v3  ;;  %v4837_v1 = vadd.f32 %v5487_v2, %v4829_v32 }
0x191c   : > { %v4830_v41 = vmul.f32 %v5486_v63, %v4822_v36 }
0x191e   : > { %v4838_v24 = vadd.f32 %v5487_v2, %v4830_v41 }
0x1920   : > { %v4839_v19 = vpack.c.bf16 %v4838_v24, %v4837_v1 }
0x1922   : > { %5862 = vmatmul.mubr.bf16.vlgmr.msra.gmra.mxu1 %v4839_v19 }
0x19e2   : > { %v4945_v33 = vpop.f32.mrf.mxu1 }
0x19e3   : > { %v4946_v56 = vadd.f32 %v5488_v34, %v4945_v33 }
0x19e4   : > { %v5863_v27 = vpop.f32.mrf.mxu1 }
0x19e5   : > { %4952 = vst [vmem:[%s947_s5] sm:$0xff] %v4946_v56 }
0x19e6   : > { %v4948_v14 = vpop.f32.mrf.mxu1 }
0x19e7   : > { %v4949_v39 = vadd.f32 %v5488_v34, %v4948_v14 }
0x19e8   : > { %v5864_v45 = vpop.f32.mrf.mxu1 }
0x19e9   : > { %4953 = vst [vmem:[%s947_s5 + $0x8] sm:$0xff] %v4949_v39 }
0x19ea   : > { %7035 = shalt.err (!%p7032_p8)
}
0x19eb   : > { %s7036_s5 = scalar_lea.hbm %s8260_s24, 256  ;;  %s7040_s2 = scalar_lea.hbm %s8407_s0, 512 }
0x19ec   : > { %p7037_p7 = scmp.ne.s32.totalorder %s8260_s24, %s7036_s5  ;;  %p7041_p0 = scmp.lt.s32.totalorder %s8260_s24, %s8407_s0 }
0x19ed   : > { %p7042_p2 = scmp.lt.s32.totalorder %s7040_s2, %s7036_s5 }
0x19ee   : > { %p7038_p6 = pnand %p7037_p7, %p8408_p10 }
0x19ef   : > { %p7043_p9 = por %p7042_p2, %p7041_p0 }
0x19f0   : > { %p7039_p3 = pneg %p7038_p6 }
0x19f2   : > { %p7044_p11 = pnand %p7043_p9, %p7039_p3 }
0x19f4   : > { %7047 = shalt.err (!%p7044_p11)
}
0x19f5   : > { %s7159_s23 = smov 128   ;;  %s7160_s9 = smov 8  }
0x19f6   : > { %s8409_s20 = scalar_lea.sflag [#allocation4], %s7540_s10 }
0x19f7   : > { %5935 = dma.vmem_to_hbm [thread:$0]  (%p8408_p10), %s8255_s8, 256, %s8260_s24, %s8409_s20, %s7159_s23, %s7159_s23, %s7160_s9  }
0x19f8 PF: > { %s4983_s12 = sand.u32 1, %s7110_s3   ;;  %p8410_p12 = scmp.ne.s32.totalorder %s8379_s26, 0 }
0x19f9   : > { %p8411_p13 = scmp.ge.s32.totalorder %s7122_s30, 2  ;;  %s4984_s27 = scalar_lea.sflag [#allocation4], %s4983_s12 }
0x19fb   : > { %p5994_p1 = pnand %p8411_p13, %p8410_p12 }
0x19fd   : > { %p5995_p4 = pneg %p5994_p1 }
0x19ff   : > { %7105 = dma.done.wait (%p5995_p4), %s4984_s27, 256  }
0x1a00   : > { %7107 = vsyncadd (%p5995_p4), %s4984_s27, 4294967040  ;;  %p44_p5 = scmp.ge.s32.totalorder %s7477_s6, 4   ;;  %s8412_s3 = smov %s7114_s28 }
0x1a01   : > { %s8413_s28 = smov %s7118_s29  ;;  %s8414_s29 = smov %s7488_s4 }
0x1a02   : > { %s8415_s30 = smov %s7477_s6  ;;  %46 = sbr.rel (!%p44_p5) target bundleno = 31 (0x1f), region = 236 }
0x1a07   :  { %4989 = vsyncpa [#allocation3], 1 }
0x1a08   :  { %4991 = vsyncpa [#allocation3 + $0x1], 1 }
0x1a09   :  { %4992 = vsyncpa [#allocation6], 1 }
0x1a0a   :  { %4993 = vsyncpa [#allocation9], 1 }
0x1a0b   :  { %4994 = vsyncpa [#allocation12], 1 }
0x1a0c   :  { %4995 = vsyncpa [#allocation15], 1 }
0x1a0d   :  { %4996 = vsyncpa [#allocation18], 1 }
0x1a0e   :  { %4997 = vsyncpa [#allocation21], 1 }
0x1a0f   :  { %4998 = vsyncpa [#allocation24], 1 }
0x1a10   :  { %4999 = vsyncpa [#allocation27], 1 }
0x1a11   :  { %5000 = vsyncpa [#allocation30], 1 }
0x1a12   :  { %5001 = vsyncpa [#allocation4], 1 }
0x1a13   :  { %5003 = vsyncpa [#allocation4 + $0x1], 1 }

</bundles_post_ra>
